<compile_context>
chip_gen: v5e
topology: v5e:2x2
jax: 0.10.0
libtpu: 0.0.40
codegen_flags: <defaults>
</compile_context>

<pallas_src>
import math

import jax
import jax.numpy as jnp
from jax import lax
from jax.experimental import pallas as pl
from jax.experimental.pallas import tpu as pltpu

# ---- small, module-consistent hyper-parameters ----
D_EMB = 32        # d_emb   (512 in the reference; scaled down)
NHEAD = 8         # nhead
DH = D_EMB // NHEAD
D_HID = 64        # d_hid   (2048 in the reference; scaled down)
NLAYERS = 2       # nlayers (6 in the reference; scaled down)
NCLASSES = 15     # classifier output size (fixed at 15 in the module)
NC_PAD = 128      # lane-aligned classifier width (sliced back to 15 outside)
LN_EPS = 1e-5     # nn.LayerNorm default eps
LANE = 128

# ---- packed-slab row layout (all slabs are (rows, 128) f32, lane-dense) ----
WL_ROWS = 3 * D_EMB + D_HID      # per-layer matrices: Wqkv(D)+Wo(D)+W1(D)+W2(D_HID) rows
WH_ROWS = 3 * D_EMB              # head matrices:      Wqkv(D)+Wo(D)+Wc(D) rows
BL_ROWS = 8                      # per-layer vectors:  bqkv, bo, g1, be1, b1, b2, g2, be2
BH_ROWS = 3                      # head vectors:       bqkv, bo, bc
W_TOTAL_ROWS = NLAYERS * WL_ROWS + WH_ROWS
B_TOTAL_ROWS = ((NLAYERS * BL_ROWS + BH_ROWS + 7) // 8) * 8


# ----------------------------- in-kernel helpers -----------------------------
def _layernorm(x, gamma, beta):
    # x: (S, D), gamma/beta: (1, D). Biased variance — matches PyTorch.
    mu = jnp.mean(x, axis=-1, keepdims=True)
    var = jnp.mean((x - mu) ** 2, axis=-1, keepdims=True)
    return (x - mu) * lax.rsqrt(var + LN_EPS) * gamma + beta


def _mha(x, w_ref, b_ref, wr, br):
    """nn.MultiheadAttention self-attention (eval) on one batch element.

    x: (S, D).  Fused QKV projection (single matmul, 3D=96 output lanes),
    per-head softmax attention on lane slices, lane-concat of head contexts,
    fused (S, D) @ (D, D) output projection.  1/sqrt(DH) is folded into the
    Q weights/bias at pack time.
    """
    D = D_EMB
    wqkv = w_ref[wr:wr + D, :3 * D]                    # (D, 3D)
    bqkv = b_ref[br:br + 1, :3 * D]                    # (1, 3D)
    wo = w_ref[wr + D:wr + 2 * D, :D]                  # (D, D)
    bo = b_ref[br + 1:br + 2, :D]                      # (1, D)

    qkv = jnp.dot(x, wqkv, preferred_element_type=jnp.float32) + bqkv    # (S, 3D)

    ctx = []
    for h in range(NHEAD):                             # unrolled; S, DH are tiny
        q = qkv[:, h * DH:(h + 1) * DH]                # (S, DH), pre-scaled
        k = qkv[:, D + h * DH:D + (h + 1) * DH]
        v = qkv[:, 2 * D + h * DH:2 * D + (h + 1) * DH]
        s = lax.dot_general(q, k, (((1,), (1,)), ((), ())),
                            preferred_element_type=jnp.float32)           # (S, S)
        s = s - jnp.max(s, axis=-1, keepdims=True)
        p = jnp.exp(s)
        p = p / jnp.sum(p, axis=-1, keepdims=True)     # exact divide (torch parity)
        ctx.append(jnp.dot(p, v, preferred_element_type=jnp.float32))     # (S, DH)
    ctx = jnp.concatenate(ctx, axis=-1)                # (S, D) == concat of heads
    return jnp.dot(ctx, wo, preferred_element_type=jnp.float32) + bo      # (S, D)


# ----------------------------- fused Pallas kernel -----------------------------
def fused_transformer_kernel(x_ref, w_ref, b_ref, o_ref):
    """One batch element per grid step: all encoder layers + final MHA +
    mean-pool + classifier.  Activation stays VMEM/vreg resident throughout."""
    D = D_EMB
    x = x_ref[0]                                       # (S, D)

    # nn.TransformerEncoder: post-norm layers, ReLU FF, dropout == identity (eval)
    for li in range(NLAYERS):
        wr = li * WL_ROWS
        br = li * BL_ROWS
        attn = _mha(x, w_ref, b_ref, wr, br)
        y = _layernorm(x + attn,
                       b_ref[br + 2:br + 3, :D], b_ref[br + 3:br + 4, :D])
        w1 = w_ref[wr + 2 * D:wr + 3 * D, :D_HID]                          # (D, D_HID)
        b1 = b_ref[br + 4:br + 5, :D_HID]
        w2 = w_ref[wr + 3 * D:wr + 3 * D + D_HID, :D]                      # (D_HID, D)
        b2 = b_ref[br + 5:br + 6, :D]
        h = jnp.maximum(
            jnp.dot(y, w1, preferred_element_type=jnp.float32) + b1, 0.0)
        ff = jnp.dot(h, w2, preferred_element_type=jnp.float32) + b2
        x = _layernorm(y + ff,
                       b_ref[br + 6:br + 7, :D], b_ref[br + 7:br + 8, :D])

    # final MultiheadAttention -> mean over seq -> Linear(D, 15 padded to 128)
    wr = NLAYERS * WL_ROWS
    br = NLAYERS * BL_ROWS
    a = _mha(x, w_ref, b_ref, wr, br)                  # (S, D)
    pooled = jnp.mean(a, axis=0, keepdims=True)        # (1, D)
    wc = w_ref[wr + 2 * D:wr + 3 * D, :]               # (D, NC_PAD)
    bc = b_ref[br + 2:br + 3, :]                       # (1, NC_PAD)
    o_ref[0] = jnp.dot(pooled, wc, preferred_element_type=jnp.float32) + bc


# ----------------------------- wrapper -----------------------------
def _run_fused(x, w_slab, b_slab):
    B, S, D = x.shape
    mha_flops = B * (8 * S * D * D + 4 * S * S * D)
    ff_flops = B * 4 * S * D * D_HID
    cls_flops = B * 2 * D * NC_PAD
    flops = (NLAYERS + 1) * mha_flops + NLAYERS * ff_flops + cls_flops
    transcend = (NLAYERS + 1) * B * NHEAD * S * S + 2 * (NLAYERS + 1) * B * S
    bytes_acc = 4 * (int(x.size) + int(w_slab.size) + int(b_slab.size) + B * NC_PAD)

    grid_spec = pltpu.PrefetchScalarGridSpec(
        num_scalar_prefetch=0,
        grid=(B,),
        in_specs=[
            pl.BlockSpec((1, S, D), lambda b: (b, 0, 0)),
            pl.BlockSpec((W_TOTAL_ROWS, LANE), lambda b: (0, 0)),   # weights resident
            pl.BlockSpec((B_TOTAL_ROWS, LANE), lambda b: (0, 0)),   # biases resident
        ],
        out_specs=pl.BlockSpec((1, 1, NC_PAD), lambda b: (b, 0, 0)),
    )
    out = pl.pallas_call(
        fused_transformer_kernel,
        out_shape=jax.ShapeDtypeStruct((B, 1, NC_PAD), jnp.float32),
        grid_spec=grid_spec,
        compiler_params=pltpu.CompilerParams(
            dimension_semantics=("parallel",),
            vmem_limit_bytes=32 * 1024 * 1024),
        cost_estimate=pl.CostEstimate(flops=int(flops),
                                      transcendentals=int(transcend),
                                      bytes_accessed=int(bytes_acc)),
    )(x, w_slab, b_slab)
    return out


# ----------------------------- host-side parameter packing -----------------------------
def pack_params(params):
    """Pack every weight/bias/LayerNorm tensor into two lane-dense (rows,128) slabs.

    NOTE: real PyTorch nn.MultiheadAttention / nn.Linear store weights as
    (out, in) — transpose to math layout (y = x @ W + b) before feeding here,
    keeping the Q/K/V row-block order.
    """
    D = D_EMB
    scale = 1.0 / math.sqrt(DH)
    w = jnp.zeros((W_TOTAL_ROWS, LANE), jnp.float32)
    b = jnp.zeros((B_TOTAL_ROWS, LANE), jnp.float32)

    def put_mha(w, b, wr, br, wqkv, bqkv, wo, bo):
        wqkv = jnp.concatenate([wqkv[:, :D] * scale, wqkv[:, D:]], axis=1)
        bqkv = jnp.concatenate([bqkv[:D] * scale, bqkv[D:]])
        w = w.at[wr:wr + D, :3 * D].set(wqkv.astype(jnp.float32))
        w = w.at[wr + D:wr + 2 * D, :D].set(wo.astype(jnp.float32))
        b = b.at[br, :3 * D].set(bqkv.astype(jnp.float32))
        b = b.at[br + 1, :D].set(bo.astype(jnp.float32))
        return w, b

    for li, lp in enumerate(params["layers"]):
        wqkv, bqkv, wo, bo, g1, be1, w1, b1, w2, b2, g2, be2 = lp
        wr = li * WL_ROWS
        br = li * BL_ROWS
        w, b = put_mha(w, b, wr, br, wqkv, bqkv, wo, bo)
        w = w.at[wr + 2 * D:wr + 3 * D, :D_HID].set(w1)
        w = w.at[wr + 3 * D:wr + 3 * D + D_HID, :D].set(w2)
        b = b.at[br + 2, :D].set(g1)
        b = b.at[br + 3, :D].set(be1)
        b = b.at[br + 4, :D_HID].set(b1)
        b = b.at[br + 5, :D].set(b2)
        b = b.at[br + 6, :D].set(g2)
        b = b.at[br + 7, :D].set(be2)

    wqkv, bqkv, wo, bo, wc, bc = params["head"]
    wr = NLAYERS * WL_ROWS
    br = NLAYERS * BL_ROWS
    w, b = put_mha(w, b, wr, br, wqkv, bqkv, wo, bo)
    w = w.at[wr + 2 * D:wr + 3 * D, :NCLASSES].set(wc)   # classifier, lane-padded
    b = b.at[br + 2, :NCLASSES].set(bc)
    return w, b


# ----------------------------- model glue -----------------------------
def sinusoidal_pe(max_len, d):
    pos = jnp.arange(max_len, dtype=jnp.float32)[:, None]
    div = jnp.exp(jnp.arange(0, d, 2, dtype=jnp.float32) * (-math.log(10000.0) / d))
    pe = jnp.zeros((max_len, d), jnp.float32)
    pe = pe.at[:, 0::2].set(jnp.sin(pos * div))
    pe = pe.at[:, 1::2].set(jnp.cos(pos * div))
    return pe


def init_params(key, vocab_size, ntoken):
    def nrm(k, shape, scale=0.05):
        return (scale * jax.random.normal(k, shape)).astype(jnp.float32)

    keys = jax.random.split(key, 2 + NLAYERS)
    params = {"embed": nrm(keys[0], (vocab_size, D_EMB), 1.0),
              "pe": sinusoidal_pe(ntoken, D_EMB),
              "layers": []}
    for li in range(NLAYERS):
        lk = jax.random.split(keys[1 + li], 4)
        params["layers"].append([
            nrm(lk[0], (D_EMB, 3 * D_EMB)),           # MHA in_proj (math layout: x @ W)
            jnp.zeros((3 * D_EMB,), jnp.float32),     # in_proj bias
            nrm(lk[1], (D_EMB, D_EMB)),               # MHA out_proj
            jnp.zeros((D_EMB,), jnp.float32),         # out_proj bias
            jnp.ones((D_EMB,), jnp.float32),          # norm1 gamma
            jnp.zeros((D_EMB,), jnp.float32),         # norm1 beta
            nrm(lk[2], (D_EMB, D_HID)),               # linear1 weight
            jnp.zeros((D_HID,), jnp.float32),         # linear1 bias
            nrm(lk[3], (D_HID, D_EMB)),               # linear2 weight
            jnp.zeros((D_EMB,), jnp.float32),         # linear2 bias
            jnp.ones((D_EMB,), jnp.float32),          # norm2 gamma
            jnp.zeros((D_EMB,), jnp.float32),         # norm2 beta
        ])
    hk = jax.random.split(keys[1 + NLAYERS], 3)
    params["head"] = [
        nrm(hk[0], (D_EMB, 3 * D_EMB)),               # final MHA in_proj
        jnp.zeros((3 * D_EMB,), jnp.float32),
        nrm(hk[1], (D_EMB, D_EMB)),                   # final MHA out_proj
        jnp.zeros((D_EMB,), jnp.float32),
        nrm(hk[2], (D_EMB, NCLASSES)),                # classifier weight
        jnp.zeros((NCLASSES,), jnp.float32),          # classifier bias
    ]
    return params


def transformer_model_pre_forward(params, input_ids, attention_mask, token_type_ids):
    # TODO(synk): BertModel.from_pretrained('bert-base-chinese') is replaced by a
    # deterministic frozen token-embedding lookup (attention_mask / token_type_ids
    # are accepted but unused, as no checkpoint can be loaded in-script).
    del attention_mask, token_type_ids
    B, S = input_ids.shape
    x = jnp.take(params["embed"], input_ids, axis=0)          # (B, S, D)
    x = x + params["pe"][None, :S, :]                         # PositionalEncoding (dropout = identity)
    x = x.astype(jnp.float32)

    w_slab, b_slab = pack_params(params)
    out = _run_fused(x, w_slab, b_slab)                       # (B, 1, NC_PAD)
    return out[:, 0, :NCLASSES]                               # (B, 15)


# ----------------------------- main -----------------------------
if __name__ == "__main__":
    B, S = 2, 8
    VOCAB = 100
    NTOKEN = 16  # max_len for positional encoding (>= S)

    key = jax.random.PRNGKey(0)
    k_ids, k_params = jax.random.split(key)

    input_ids = jax.random.randint(k_ids, (B, S), 0, VOCAB, dtype=jnp.int32)
    attention_mask = jnp.ones((B, S), jnp.int32)
    token_type_ids = jnp.zeros((B, S), jnp.int32)

    params = init_params(k_params, VOCAB, NTOKEN)

    fwd = jax.jit(transformer_model_pre_forward)
    out = jax.block_until_ready(fwd(params, input_ids, attention_mask, token_type_ids))

    assert out.shape == (B, NCLASSES), out.shape
    assert bool(jnp.all(jnp.isfinite(out)))
    print("KERNEL_OK")
</pallas_src>

<mosaic_0001>
module attributes {stable_mosaic.version = 11 : i64} {
  func.func @fused_transformer_kernel(%arg0: i32, %arg1: memref<1x8x32xf32, #tpu.memory_space<vmem>>, %arg2: memref<416x128xf32, #tpu.memory_space<vmem>>, %arg3: memref<24x128xf32, #tpu.memory_space<vmem>>, %arg4: memref<1x1x128xf32, #tpu.memory_space<vmem>>) attributes {dimension_semantics = [#tpu.dimension_semantics<parallel>], iteration_bounds = array<i64: 2>, scalar_prefetch = 0 : i64, scratch_operands = 0 : i64, tpu.core_type = #tpu.core_type<tc>, window_params = [{transform_indices = @transform_0, window_bounds = array<i64: 1, 8, 32>}, {pipeline_mode = #tpu.pipeline_mode<synchronous>, transform_indices = @transform_1, window_bounds = array<i64: 416, 128>}, {pipeline_mode = #tpu.pipeline_mode<synchronous>, transform_indices = @transform_2, window_bounds = array<i64: 24, 128>}, {transform_indices = @transform_3, window_bounds = array<i64: 1, 1, 128>}]} {
    %c0 = arith.constant 0 : index
    %c0_0 = arith.constant 0 : index
    %c0_1 = arith.constant 0 : index
    %0 = vector.load %arg1[%c0, %c0_0, %c0_1] : memref<1x8x32xf32, #tpu.memory_space<vmem>>, vector<1x8x32xf32>
    %1 = vector.shape_cast %0 : vector<1x8x32xf32> to vector<8x32xf32>
    %c0_2 = arith.constant 0 : index
    %c0_3 = arith.constant 0 : index
    %2 = vector.load %arg2[%c0_2, %c0_3] : memref<416x128xf32, #tpu.memory_space<vmem>>, vector<32x96xf32>
    %c0_4 = arith.constant 0 : index
    %c0_5 = arith.constant 0 : index
    %3 = vector.load %arg3[%c0_4, %c0_5] : memref<24x128xf32, #tpu.memory_space<vmem>>, vector<1x96xf32>
    %c32 = arith.constant 32 : index
    %c0_6 = arith.constant 0 : index
    %4 = vector.load %arg2[%c32, %c0_6] : memref<416x128xf32, #tpu.memory_space<vmem>>, vector<32x32xf32>
    %c1 = arith.constant 1 : index
    %c0_7 = arith.constant 0 : index
    %5 = vector.load %arg3[%c1, %c0_7] : memref<24x128xf32, #tpu.memory_space<vmem>>, vector<1x32xf32>
    %cst = arith.constant dense<0.000000e+00> : vector<8x96xf32>
    %6 = tpu.matmul %1, %2, %cst {dimension_numbers = #tpu.dot_dimension_numbers<[1], [0], [0], [1], [0, 0, 1, 1], [], []>} : vector<8x32xf32>, vector<32x96xf32>, vector<8x96xf32> -> vector<8x96xf32>
    %7 = vector.broadcast %3 : vector<1x96xf32> to vector<8x96xf32>
    %8 = arith.addf %6, %7 : vector<8x96xf32>
    %9 = vector.extract_strided_slice %8 {offsets = [0, 0], sizes = [8, 4], strides = [1, 1]} : vector<8x96xf32> to vector<8x4xf32>
    %10 = vector.extract_strided_slice %8 {offsets = [0, 32], sizes = [8, 4], strides = [1, 1]} : vector<8x96xf32> to vector<8x4xf32>
    %11 = vector.extract_strided_slice %8 {offsets = [0, 64], sizes = [8, 4], strides = [1, 1]} : vector<8x96xf32> to vector<8x4xf32>
    %cst_8 = arith.constant dense<0.000000e+00> : vector<8x8xf32>
    %12 = tpu.matmul %9, %10, %cst_8 {dimension_numbers = #tpu.dot_dimension_numbers<[1], [1], [0], [0], [0, 0, 1, 0], [], []>} : vector<8x4xf32>, vector<8x4xf32>, vector<8x8xf32> -> vector<8x8xf32>
    %cst_9 = arith.constant dense<0xFF800000> : vector<8xf32>
    %13 = vector.multi_reduction <maximumf>, %12, %cst_9 [1] : vector<8x8xf32> to vector<8xf32>
    %14 = vector.shape_cast %13 : vector<8xf32> to vector<8x1xf32>
    %15 = vector.broadcast %14 : vector<8x1xf32> to vector<8x8xf32>
    %16 = arith.subf %12, %15 : vector<8x8xf32>
    %17 = math.exp %16 : vector<8x8xf32>
    %cst_10 = arith.constant dense<0.000000e+00> : vector<8xf32>
    %18 = vector.multi_reduction <add>, %17, %cst_10 [1] : vector<8x8xf32> to vector<8xf32>
    %19 = vector.shape_cast %18 : vector<8xf32> to vector<8x1xf32>
    %20 = vector.broadcast %19 : vector<8x1xf32> to vector<8x8xf32>
    %21 = arith.divf %17, %20 : vector<8x8xf32>
    %cst_11 = arith.constant dense<0.000000e+00> : vector<8x4xf32>
    %22 = tpu.matmul %21, %11, %cst_11 {dimension_numbers = #tpu.dot_dimension_numbers<[1], [0], [0], [1], [0, 0, 1, 1], [], []>} : vector<8x8xf32>, vector<8x4xf32>, vector<8x4xf32> -> vector<8x4xf32>
    %23 = vector.extract_strided_slice %8 {offsets = [0, 4], sizes = [8, 4], strides = [1, 1]} : vector<8x96xf32> to vector<8x4xf32>
    %24 = vector.extract_strided_slice %8 {offsets = [0, 36], sizes = [8, 4], strides = [1, 1]} : vector<8x96xf32> to vector<8x4xf32>
    %25 = vector.extract_strided_slice %8 {offsets = [0, 68], sizes = [8, 4], strides = [1, 1]} : vector<8x96xf32> to vector<8x4xf32>
    %cst_12 = arith.constant dense<0.000000e+00> : vector<8x8xf32>
    %26 = tpu.matmul %23, %24, %cst_12 {dimension_numbers = #tpu.dot_dimension_numbers<[1], [1], [0], [0], [0, 0, 1, 0], [], []>} : vector<8x4xf32>, vector<8x4xf32>, vector<8x8xf32> -> vector<8x8xf32>
    %cst_13 = arith.constant dense<0xFF800000> : vector<8xf32>
    %27 = vector.multi_reduction <maximumf>, %26, %cst_13 [1] : vector<8x8xf32> to vector<8xf32>
    %28 = vector.shape_cast %27 : vector<8xf32> to vector<8x1xf32>
    %29 = vector.broadcast %28 : vector<8x1xf32> to vector<8x8xf32>
    %30 = arith.subf %26, %29 : vector<8x8xf32>
    %31 = math.exp %30 : vector<8x8xf32>
    %cst_14 = arith.constant dense<0.000000e+00> : vector<8xf32>
    %32 = vector.multi_reduction <add>, %31, %cst_14 [1] : vector<8x8xf32> to vector<8xf32>
    %33 = vector.shape_cast %32 : vector<8xf32> to vector<8x1xf32>
    %34 = vector.broadcast %33 : vector<8x1xf32> to vector<8x8xf32>
    %35 = arith.divf %31, %34 : vector<8x8xf32>
    %cst_15 = arith.constant dense<0.000000e+00> : vector<8x4xf32>
    %36 = tpu.matmul %35, %25, %cst_15 {dimension_numbers = #tpu.dot_dimension_numbers<[1], [0], [0], [1], [0, 0, 1, 1], [], []>} : vector<8x8xf32>, vector<8x4xf32>, vector<8x4xf32> -> vector<8x4xf32>
    %37 = vector.extract_strided_slice %8 {offsets = [0, 8], sizes = [8, 4], strides = [1, 1]} : vector<8x96xf32> to vector<8x4xf32>
    %38 = vector.extract_strided_slice %8 {offsets = [0, 40], sizes = [8, 4], strides = [1, 1]} : vector<8x96xf32> to vector<8x4xf32>
    %39 = vector.extract_strided_slice %8 {offsets = [0, 72], sizes = [8, 4], strides = [1, 1]} : vector<8x96xf32> to vector<8x4xf32>
    %cst_16 = arith.constant dense<0.000000e+00> : vector<8x8xf32>
    %40 = tpu.matmul %37, %38, %cst_16 {dimension_numbers = #tpu.dot_dimension_numbers<[1], [1], [0], [0], [0, 0, 1, 0], [], []>} : vector<8x4xf32>, vector<8x4xf32>, vector<8x8xf32> -> vector<8x8xf32>
    %cst_17 = arith.constant dense<0xFF800000> : vector<8xf32>
    %41 = vector.multi_reduction <maximumf>, %40, %cst_17 [1] : vector<8x8xf32> to vector<8xf32>
    %42 = vector.shape_cast %41 : vector<8xf32> to vector<8x1xf32>
    %43 = vector.broadcast %42 : vector<8x1xf32> to vector<8x8xf32>
    %44 = arith.subf %40, %43 : vector<8x8xf32>
    %45 = math.exp %44 : vector<8x8xf32>
    %cst_18 = arith.constant dense<0.000000e+00> : vector<8xf32>
    %46 = vector.multi_reduction <add>, %45, %cst_18 [1] : vector<8x8xf32> to vector<8xf32>
    %47 = vector.shape_cast %46 : vector<8xf32> to vector<8x1xf32>
    %48 = vector.broadcast %47 : vector<8x1xf32> to vector<8x8xf32>
    %49 = arith.divf %45, %48 : vector<8x8xf32>
    %cst_19 = arith.constant dense<0.000000e+00> : vector<8x4xf32>
    %50 = tpu.matmul %49, %39, %cst_19 {dimension_numbers = #tpu.dot_dimension_numbers<[1], [0], [0], [1], [0, 0, 1, 1], [], []>} : vector<8x8xf32>, vector<8x4xf32>, vector<8x4xf32> -> vector<8x4xf32>
    %51 = vector.extract_strided_slice %8 {offsets = [0, 12], sizes = [8, 4], strides = [1, 1]} : vector<8x96xf32> to vector<8x4xf32>
    %52 = vector.extract_strided_slice %8 {offsets = [0, 44], sizes = [8, 4], strides = [1, 1]} : vector<8x96xf32> to vector<8x4xf32>
    %53 = vector.extract_strided_slice %8 {offsets = [0, 76], sizes = [8, 4], strides = [1, 1]} : vector<8x96xf32> to vector<8x4xf32>
    %cst_20 = arith.constant dense<0.000000e+00> : vector<8x8xf32>
    %54 = tpu.matmul %51, %52, %cst_20 {dimension_numbers = #tpu.dot_dimension_numbers<[1], [1], [0], [0], [0, 0, 1, 0], [], []>} : vector<8x4xf32>, vector<8x4xf32>, vector<8x8xf32> -> vector<8x8xf32>
    %cst_21 = arith.constant dense<0xFF800000> : vector<8xf32>
    %55 = vector.multi_reduction <maximumf>, %54, %cst_21 [1] : vector<8x8xf32> to vector<8xf32>
    %56 = vector.shape_cast %55 : vector<8xf32> to vector<8x1xf32>
    %57 = vector.broadcast %56 : vector<8x1xf32> to vector<8x8xf32>
    %58 = arith.subf %54, %57 : vector<8x8xf32>
    %59 = math.exp %58 : vector<8x8xf32>
    %cst_22 = arith.constant dense<0.000000e+00> : vector<8xf32>
    %60 = vector.multi_reduction <add>, %59, %cst_22 [1] : vector<8x8xf32> to vector<8xf32>
    %61 = vector.shape_cast %60 : vector<8xf32> to vector<8x1xf32>
    %62 = vector.broadcast %61 : vector<8x1xf32> to vector<8x8xf32>
    %63 = arith.divf %59, %62 : vector<8x8xf32>
    %cst_23 = arith.constant dense<0.000000e+00> : vector<8x4xf32>
    %64 = tpu.matmul %63, %53, %cst_23 {dimension_numbers = #tpu.dot_dimension_numbers<[1], [0], [0], [1], [0, 0, 1, 1], [], []>} : vector<8x8xf32>, vector<8x4xf32>, vector<8x4xf32> -> vector<8x4xf32>
    %65 = vector.extract_strided_slice %8 {offsets = [0, 16], sizes = [8, 4], strides = [1, 1]} : vector<8x96xf32> to vector<8x4xf32>
    %66 = vector.extract_strided_slice %8 {offsets = [0, 48], sizes = [8, 4], strides = [1, 1]} : vector<8x96xf32> to vector<8x4xf32>
    %67 = vector.extract_strided_slice %8 {offsets = [0, 80], sizes = [8, 4], strides = [1, 1]} : vector<8x96xf32> to vector<8x4xf32>
    %cst_24 = arith.constant dense<0.000000e+00> : vector<8x8xf32>
    %68 = tpu.matmul %65, %66, %cst_24 {dimension_numbers = #tpu.dot_dimension_numbers<[1], [1], [0], [0], [0, 0, 1, 0], [], []>} : vector<8x4xf32>, vector<8x4xf32>, vector<8x8xf32> -> vector<8x8xf32>
    %cst_25 = arith.constant dense<0xFF800000> : vector<8xf32>
    %69 = vector.multi_reduction <maximumf>, %68, %cst_25 [1] : vector<8x8xf32> to vector<8xf32>
    %70 = vector.shape_cast %69 : vector<8xf32> to vector<8x1xf32>
    %71 = vector.broadcast %70 : vector<8x1xf32> to vector<8x8xf32>
    %72 = arith.subf %68, %71 : vector<8x8xf32>
    %73 = math.exp %72 : vector<8x8xf32>
    %cst_26 = arith.constant dense<0.000000e+00> : vector<8xf32>
    %74 = vector.multi_reduction <add>, %73, %cst_26 [1] : vector<8x8xf32> to vector<8xf32>
    %75 = vector.shape_cast %74 : vector<8xf32> to vector<8x1xf32>
    %76 = vector.broadcast %75 : vector<8x1xf32> to vector<8x8xf32>
    %77 = arith.divf %73, %76 : vector<8x8xf32>
    %cst_27 = arith.constant dense<0.000000e+00> : vector<8x4xf32>
    %78 = tpu.matmul %77, %67, %cst_27 {dimension_numbers = #tpu.dot_dimension_numbers<[1], [0], [0], [1], [0, 0, 1, 1], [], []>} : vector<8x8xf32>, vector<8x4xf32>, vector<8x4xf32> -> vector<8x4xf32>
    %79 = vector.extract_strided_slice %8 {offsets = [0, 20], sizes = [8, 4], strides = [1, 1]} : vector<8x96xf32> to vector<8x4xf32>
    %80 = vector.extract_strided_slice %8 {offsets = [0, 52], sizes = [8, 4], strides = [1, 1]} : vector<8x96xf32> to vector<8x4xf32>
    %81 = vector.extract_strided_slice %8 {offsets = [0, 84], sizes = [8, 4], strides = [1, 1]} : vector<8x96xf32> to vector<8x4xf32>
    %cst_28 = arith.constant dense<0.000000e+00> : vector<8x8xf32>
    %82 = tpu.matmul %79, %80, %cst_28 {dimension_numbers = #tpu.dot_dimension_numbers<[1], [1], [0], [0], [0, 0, 1, 0], [], []>} : vector<8x4xf32>, vector<8x4xf32>, vector<8x8xf32> -> vector<8x8xf32>
    %cst_29 = arith.constant dense<0xFF800000> : vector<8xf32>
    %83 = vector.multi_reduction <maximumf>, %82, %cst_29 [1] : vector<8x8xf32> to vector<8xf32>
    %84 = vector.shape_cast %83 : vector<8xf32> to vector<8x1xf32>
    %85 = vector.broadcast %84 : vector<8x1xf32> to vector<8x8xf32>
    %86 = arith.subf %82, %85 : vector<8x8xf32>
    %87 = math.exp %86 : vector<8x8xf32>
    %cst_30 = arith.constant dense<0.000000e+00> : vector<8xf32>
    %88 = vector.multi_reduction <add>, %87, %cst_30 [1] : vector<8x8xf32> to vector<8xf32>
    %89 = vector.shape_cast %88 : vector<8xf32> to vector<8x1xf32>
    %90 = vector.broadcast %89 : vector<8x1xf32> to vector<8x8xf32>
    %91 = arith.divf %87, %90 : vector<8x8xf32>
    %cst_31 = arith.constant dense<0.000000e+00> : vector<8x4xf32>
    %92 = tpu.matmul %91, %81, %cst_31 {dimension_numbers = #tpu.dot_dimension_numbers<[1], [0], [0], [1], [0, 0, 1, 1], [], []>} : vector<8x8xf32>, vector<8x4xf32>, vector<8x4xf32> -> vector<8x4xf32>
    %93 = vector.extract_strided_slice %8 {offsets = [0, 24], sizes = [8, 4], strides = [1, 1]} : vector<8x96xf32> to vector<8x4xf32>
    %94 = vector.extract_strided_slice %8 {offsets = [0, 56], sizes = [8, 4], strides = [1, 1]} : vector<8x96xf32> to vector<8x4xf32>
    %95 = vector.extract_strided_slice %8 {offsets = [0, 88], sizes = [8, 4], strides = [1, 1]} : vector<8x96xf32> to vector<8x4xf32>
    %cst_32 = arith.constant dense<0.000000e+00> : vector<8x8xf32>
    %96 = tpu.matmul %93, %94, %cst_32 {dimension_numbers = #tpu.dot_dimension_numbers<[1], [1], [0], [0], [0, 0, 1, 0], [], []>} : vector<8x4xf32>, vector<8x4xf32>, vector<8x8xf32> -> vector<8x8xf32>
    %cst_33 = arith.constant dense<0xFF800000> : vector<8xf32>
    %97 = vector.multi_reduction <maximumf>, %96, %cst_33 [1] : vector<8x8xf32> to vector<8xf32>
    %98 = vector.shape_cast %97 : vector<8xf32> to vector<8x1xf32>
    %99 = vector.broadcast %98 : vector<8x1xf32> to vector<8x8xf32>
    %100 = arith.subf %96, %99 : vector<8x8xf32>
    %101 = math.exp %100 : vector<8x8xf32>
    %cst_34 = arith.constant dense<0.000000e+00> : vector<8xf32>
    %102 = vector.multi_reduction <add>, %101, %cst_34 [1] : vector<8x8xf32> to vector<8xf32>
    %103 = vector.shape_cast %102 : vector<8xf32> to vector<8x1xf32>
    %104 = vector.broadcast %103 : vector<8x1xf32> to vector<8x8xf32>
    %105 = arith.divf %101, %104 : vector<8x8xf32>
    %cst_35 = arith.constant dense<0.000000e+00> : vector<8x4xf32>
    %106 = tpu.matmul %105, %95, %cst_35 {dimension_numbers = #tpu.dot_dimension_numbers<[1], [0], [0], [1], [0, 0, 1, 1], [], []>} : vector<8x8xf32>, vector<8x4xf32>, vector<8x4xf32> -> vector<8x4xf32>
    %107 = vector.extract_strided_slice %8 {offsets = [0, 28], sizes = [8, 4], strides = [1, 1]} : vector<8x96xf32> to vector<8x4xf32>
    %108 = vector.extract_strided_slice %8 {offsets = [0, 60], sizes = [8, 4], strides = [1, 1]} : vector<8x96xf32> to vector<8x4xf32>
    %109 = vector.extract_strided_slice %8 {offsets = [0, 92], sizes = [8, 4], strides = [1, 1]} : vector<8x96xf32> to vector<8x4xf32>
    %cst_36 = arith.constant dense<0.000000e+00> : vector<8x8xf32>
    %110 = tpu.matmul %107, %108, %cst_36 {dimension_numbers = #tpu.dot_dimension_numbers<[1], [1], [0], [0], [0, 0, 1, 0], [], []>} : vector<8x4xf32>, vector<8x4xf32>, vector<8x8xf32> -> vector<8x8xf32>
    %cst_37 = arith.constant dense<0xFF800000> : vector<8xf32>
    %111 = vector.multi_reduction <maximumf>, %110, %cst_37 [1] : vector<8x8xf32> to vector<8xf32>
    %112 = vector.shape_cast %111 : vector<8xf32> to vector<8x1xf32>
    %113 = vector.broadcast %112 : vector<8x1xf32> to vector<8x8xf32>
    %114 = arith.subf %110, %113 : vector<8x8xf32>
    %115 = math.exp %114 : vector<8x8xf32>
    %cst_38 = arith.constant dense<0.000000e+00> : vector<8xf32>
    %116 = vector.multi_reduction <add>, %115, %cst_38 [1] : vector<8x8xf32> to vector<8xf32>
    %117 = vector.shape_cast %116 : vector<8xf32> to vector<8x1xf32>
    %118 = vector.broadcast %117 : vector<8x1xf32> to vector<8x8xf32>
    %119 = arith.divf %115, %118 : vector<8x8xf32>
    %cst_39 = arith.constant dense<0.000000e+00> : vector<8x4xf32>
    %120 = tpu.matmul %119, %109, %cst_39 {dimension_numbers = #tpu.dot_dimension_numbers<[1], [0], [0], [1], [0, 0, 1, 1], [], []>} : vector<8x8xf32>, vector<8x4xf32>, vector<8x4xf32> -> vector<8x4xf32>
    %121 = tpu.concatenate %22, %36, %50, %64, %78, %92, %106, %120 in 1 : vector<8x4xf32>, vector<8x4xf32>, vector<8x4xf32>, vector<8x4xf32>, vector<8x4xf32>, vector<8x4xf32>, vector<8x4xf32>, vector<8x4xf32> -> vector<8x32xf32>
    %cst_40 = arith.constant dense<0.000000e+00> : vector<8x32xf32>
    %122 = tpu.matmul %121, %4, %cst_40 {dimension_numbers = #tpu.dot_dimension_numbers<[1], [0], [0], [1], [0, 0, 1, 1], [], []>} : vector<8x32xf32>, vector<32x32xf32>, vector<8x32xf32> -> vector<8x32xf32>
    %123 = vector.broadcast %5 : vector<1x32xf32> to vector<8x32xf32>
    %124 = arith.addf %122, %123 : vector<8x32xf32>
    %125 = arith.addf %1, %124 : vector<8x32xf32>
    %c2 = arith.constant 2 : index
    %c0_41 = arith.constant 0 : index
    %126 = vector.load %arg3[%c2, %c0_41] : memref<24x128xf32, #tpu.memory_space<vmem>>, vector<1x32xf32>
    %c3 = arith.constant 3 : index
    %c0_42 = arith.constant 0 : index
    %127 = vector.load %arg3[%c3, %c0_42] : memref<24x128xf32, #tpu.memory_space<vmem>>, vector<1x32xf32>
    %cst_43 = arith.constant dense<0.000000e+00> : vector<8xf32>
    %128 = vector.multi_reduction <add>, %125, %cst_43 [1] : vector<8x32xf32> to vector<8xf32>
    %129 = vector.shape_cast %128 : vector<8xf32> to vector<8x1xf32>
    %cst_44 = arith.constant 3.200000e+01 : f32
    %130 = vector.broadcast %cst_44 : f32 to vector<8x1xf32>
    %131 = arith.divf %129, %130 : vector<8x1xf32>
    %132 = vector.broadcast %131 : vector<8x1xf32> to vector<8x32xf32>
    %133 = arith.subf %125, %132 : vector<8x32xf32>
    %134 = arith.mulf %133, %133 : vector<8x32xf32>
    %cst_45 = arith.constant dense<0.000000e+00> : vector<8xf32>
    %135 = vector.multi_reduction <add>, %134, %cst_45 [1] : vector<8x32xf32> to vector<8xf32>
    %136 = vector.shape_cast %135 : vector<8xf32> to vector<8x1xf32>
    %cst_46 = arith.constant 3.200000e+01 : f32
    %137 = vector.broadcast %cst_46 : f32 to vector<8x1xf32>
    %138 = arith.divf %136, %137 : vector<8x1xf32>
    %139 = vector.broadcast %131 : vector<8x1xf32> to vector<8x32xf32>
    %140 = arith.subf %125, %139 : vector<8x32xf32>
    %cst_47 = arith.constant 9.99999974E-6 : f32
    %141 = vector.broadcast %cst_47 : f32 to vector<8x1xf32>
    %142 = arith.addf %138, %141 : vector<8x1xf32>
    %143 = math.rsqrt %142 : vector<8x1xf32>
    %144 = vector.broadcast %143 : vector<8x1xf32> to vector<8x32xf32>
    %145 = arith.mulf %140, %144 : vector<8x32xf32>
    %146 = vector.broadcast %126 : vector<1x32xf32> to vector<8x32xf32>
    %147 = arith.mulf %145, %146 : vector<8x32xf32>
    %148 = vector.broadcast %127 : vector<1x32xf32> to vector<8x32xf32>
    %149 = arith.addf %147, %148 : vector<8x32xf32>
    %c64 = arith.constant 64 : index
    %c0_48 = arith.constant 0 : index
    %150 = vector.load %arg2[%c64, %c0_48] : memref<416x128xf32, #tpu.memory_space<vmem>>, vector<32x64xf32>
    %c4 = arith.constant 4 : index
    %c0_49 = arith.constant 0 : index
    %151 = vector.load %arg3[%c4, %c0_49] : memref<24x128xf32, #tpu.memory_space<vmem>>, vector<1x64xf32>
    %c96 = arith.constant 96 : index
    %c0_50 = arith.constant 0 : index
    %152 = vector.load %arg2[%c96, %c0_50] : memref<416x128xf32, #tpu.memory_space<vmem>>, vector<64x32xf32>
    %c5 = arith.constant 5 : index
    %c0_51 = arith.constant 0 : index
    %153 = vector.load %arg3[%c5, %c0_51] : memref<24x128xf32, #tpu.memory_space<vmem>>, vector<1x32xf32>
    %cst_52 = arith.constant dense<0.000000e+00> : vector<8x64xf32>
    %154 = tpu.matmul %149, %150, %cst_52 {dimension_numbers = #tpu.dot_dimension_numbers<[1], [0], [0], [1], [0, 0, 1, 1], [], []>} : vector<8x32xf32>, vector<32x64xf32>, vector<8x64xf32> -> vector<8x64xf32>
    %155 = vector.broadcast %151 : vector<1x64xf32> to vector<8x64xf32>
    %156 = arith.addf %154, %155 : vector<8x64xf32>
    %cst_53 = arith.constant 0.000000e+00 : f32
    %157 = vector.broadcast %cst_53 : f32 to vector<8x64xf32>
    %158 = arith.maximumf %156, %157 : vector<8x64xf32>
    %cst_54 = arith.constant dense<0.000000e+00> : vector<8x32xf32>
    %159 = tpu.matmul %158, %152, %cst_54 {dimension_numbers = #tpu.dot_dimension_numbers<[1], [0], [0], [1], [0, 0, 1, 1], [], []>} : vector<8x64xf32>, vector<64x32xf32>, vector<8x32xf32> -> vector<8x32xf32>
    %160 = vector.broadcast %153 : vector<1x32xf32> to vector<8x32xf32>
    %161 = arith.addf %159, %160 : vector<8x32xf32>
    %162 = arith.addf %149, %161 : vector<8x32xf32>
    %c6 = arith.constant 6 : index
    %c0_55 = arith.constant 0 : index
    %163 = vector.load %arg3[%c6, %c0_55] : memref<24x128xf32, #tpu.memory_space<vmem>>, vector<1x32xf32>
    %c7 = arith.constant 7 : index
    %c0_56 = arith.constant 0 : index
    %164 = vector.load %arg3[%c7, %c0_56] : memref<24x128xf32, #tpu.memory_space<vmem>>, vector<1x32xf32>
    %cst_57 = arith.constant dense<0.000000e+00> : vector<8xf32>
    %165 = vector.multi_reduction <add>, %162, %cst_57 [1] : vector<8x32xf32> to vector<8xf32>
    %166 = vector.shape_cast %165 : vector<8xf32> to vector<8x1xf32>
    %cst_58 = arith.constant 3.200000e+01 : f32
    %167 = vector.broadcast %cst_58 : f32 to vector<8x1xf32>
    %168 = arith.divf %166, %167 : vector<8x1xf32>
    %169 = vector.broadcast %168 : vector<8x1xf32> to vector<8x32xf32>
    %170 = arith.subf %162, %169 : vector<8x32xf32>
    %171 = arith.mulf %170, %170 : vector<8x32xf32>
    %cst_59 = arith.constant dense<0.000000e+00> : vector<8xf32>
    %172 = vector.multi_reduction <add>, %171, %cst_59 [1] : vector<8x32xf32> to vector<8xf32>
    %173 = vector.shape_cast %172 : vector<8xf32> to vector<8x1xf32>
    %cst_60 = arith.constant 3.200000e+01 : f32
    %174 = vector.broadcast %cst_60 : f32 to vector<8x1xf32>
    %175 = arith.divf %173, %174 : vector<8x1xf32>
    %176 = vector.broadcast %168 : vector<8x1xf32> to vector<8x32xf32>
    %177 = arith.subf %162, %176 : vector<8x32xf32>
    %cst_61 = arith.constant 9.99999974E-6 : f32
    %178 = vector.broadcast %cst_61 : f32 to vector<8x1xf32>
    %179 = arith.addf %175, %178 : vector<8x1xf32>
    %180 = math.rsqrt %179 : vector<8x1xf32>
    %181 = vector.broadcast %180 : vector<8x1xf32> to vector<8x32xf32>
    %182 = arith.mulf %177, %181 : vector<8x32xf32>
    %183 = vector.broadcast %163 : vector<1x32xf32> to vector<8x32xf32>
    %184 = arith.mulf %182, %183 : vector<8x32xf32>
    %185 = vector.broadcast %164 : vector<1x32xf32> to vector<8x32xf32>
    %186 = arith.addf %184, %185 : vector<8x32xf32>
    %c160 = arith.constant 160 : index
    %c0_62 = arith.constant 0 : index
    %187 = vector.load %arg2[%c160, %c0_62] : memref<416x128xf32, #tpu.memory_space<vmem>>, vector<32x96xf32>
    %c8 = arith.constant 8 : index
    %c0_63 = arith.constant 0 : index
    %188 = vector.load %arg3[%c8, %c0_63] : memref<24x128xf32, #tpu.memory_space<vmem>>, vector<1x96xf32>
    %c192 = arith.constant 192 : index
    %c0_64 = arith.constant 0 : index
    %189 = vector.load %arg2[%c192, %c0_64] : memref<416x128xf32, #tpu.memory_space<vmem>>, vector<32x32xf32>
    %c9 = arith.constant 9 : index
    %c0_65 = arith.constant 0 : index
    %190 = vector.load %arg3[%c9, %c0_65] : memref<24x128xf32, #tpu.memory_space<vmem>>, vector<1x32xf32>
    %cst_66 = arith.constant dense<0.000000e+00> : vector<8x96xf32>
    %191 = tpu.matmul %186, %187, %cst_66 {dimension_numbers = #tpu.dot_dimension_numbers<[1], [0], [0], [1], [0, 0, 1, 1], [], []>} : vector<8x32xf32>, vector<32x96xf32>, vector<8x96xf32> -> vector<8x96xf32>
    %192 = vector.broadcast %188 : vector<1x96xf32> to vector<8x96xf32>
    %193 = arith.addf %191, %192 : vector<8x96xf32>
    %194 = vector.extract_strided_slice %193 {offsets = [0, 0], sizes = [8, 4], strides = [1, 1]} : vector<8x96xf32> to vector<8x4xf32>
    %195 = vector.extract_strided_slice %193 {offsets = [0, 32], sizes = [8, 4], strides = [1, 1]} : vector<8x96xf32> to vector<8x4xf32>
    %196 = vector.extract_strided_slice %193 {offsets = [0, 64], sizes = [8, 4], strides = [1, 1]} : vector<8x96xf32> to vector<8x4xf32>
    %cst_67 = arith.constant dense<0.000000e+00> : vector<8x8xf32>
    %197 = tpu.matmul %194, %195, %cst_67 {dimension_numbers = #tpu.dot_dimension_numbers<[1], [1], [0], [0], [0, 0, 1, 0], [], []>} : vector<8x4xf32>, vector<8x4xf32>, vector<8x8xf32> -> vector<8x8xf32>
    %cst_68 = arith.constant dense<0xFF800000> : vector<8xf32>
    %198 = vector.multi_reduction <maximumf>, %197, %cst_68 [1] : vector<8x8xf32> to vector<8xf32>
    %199 = vector.shape_cast %198 : vector<8xf32> to vector<8x1xf32>
    %200 = vector.broadcast %199 : vector<8x1xf32> to vector<8x8xf32>
    %201 = arith.subf %197, %200 : vector<8x8xf32>
    %202 = math.exp %201 : vector<8x8xf32>
    %cst_69 = arith.constant dense<0.000000e+00> : vector<8xf32>
    %203 = vector.multi_reduction <add>, %202, %cst_69 [1] : vector<8x8xf32> to vector<8xf32>
    %204 = vector.shape_cast %203 : vector<8xf32> to vector<8x1xf32>
    %205 = vector.broadcast %204 : vector<8x1xf32> to vector<8x8xf32>
    %206 = arith.divf %202, %205 : vector<8x8xf32>
    %cst_70 = arith.constant dense<0.000000e+00> : vector<8x4xf32>
    %207 = tpu.matmul %206, %196, %cst_70 {dimension_numbers = #tpu.dot_dimension_numbers<[1], [0], [0], [1], [0, 0, 1, 1], [], []>} : vector<8x8xf32>, vector<8x4xf32>, vector<8x4xf32> -> vector<8x4xf32>
    %208 = vector.extract_strided_slice %193 {offsets = [0, 4], sizes = [8, 4], strides = [1, 1]} : vector<8x96xf32> to vector<8x4xf32>
    %209 = vector.extract_strided_slice %193 {offsets = [0, 36], sizes = [8, 4], strides = [1, 1]} : vector<8x96xf32> to vector<8x4xf32>
    %210 = vector.extract_strided_slice %193 {offsets = [0, 68], sizes = [8, 4], strides = [1, 1]} : vector<8x96xf32> to vector<8x4xf32>
    %cst_71 = arith.constant dense<0.000000e+00> : vector<8x8xf32>
    %211 = tpu.matmul %208, %209, %cst_71 {dimension_numbers = #tpu.dot_dimension_numbers<[1], [1], [0], [0], [0, 0, 1, 0], [], []>} : vector<8x4xf32>, vector<8x4xf32>, vector<8x8xf32> -> vector<8x8xf32>
    %cst_72 = arith.constant dense<0xFF800000> : vector<8xf32>
    %212 = vector.multi_reduction <maximumf>, %211, %cst_72 [1] : vector<8x8xf32> to vector<8xf32>
    %213 = vector.shape_cast %212 : vector<8xf32> to vector<8x1xf32>
    %214 = vector.broadcast %213 : vector<8x1xf32> to vector<8x8xf32>
    %215 = arith.subf %211, %214 : vector<8x8xf32>
    %216 = math.exp %215 : vector<8x8xf32>
    %cst_73 = arith.constant dense<0.000000e+00> : vector<8xf32>
    %217 = vector.multi_reduction <add>, %216, %cst_73 [1] : vector<8x8xf32> to vector<8xf32>
    %218 = vector.shape_cast %217 : vector<8xf32> to vector<8x1xf32>
    %219 = vector.broadcast %218 : vector<8x1xf32> to vector<8x8xf32>
    %220 = arith.divf %216, %219 : vector<8x8xf32>
    %cst_74 = arith.constant dense<0.000000e+00> : vector<8x4xf32>
    %221 = tpu.matmul %220, %210, %cst_74 {dimension_numbers = #tpu.dot_dimension_numbers<[1], [0], [0], [1], [0, 0, 1, 1], [], []>} : vector<8x8xf32>, vector<8x4xf32>, vector<8x4xf32> -> vector<8x4xf32>
    %222 = vector.extract_strided_slice %193 {offsets = [0, 8], sizes = [8, 4], strides = [1, 1]} : vector<8x96xf32> to vector<8x4xf32>
    %223 = vector.extract_strided_slice %193 {offsets = [0, 40], sizes = [8, 4], strides = [1, 1]} : vector<8x96xf32> to vector<8x4xf32>
    %224 = vector.extract_strided_slice %193 {offsets = [0, 72], sizes = [8, 4], strides = [1, 1]} : vector<8x96xf32> to vector<8x4xf32>
    %cst_75 = arith.constant dense<0.000000e+00> : vector<8x8xf32>
    %225 = tpu.matmul %222, %223, %cst_75 {dimension_numbers = #tpu.dot_dimension_numbers<[1], [1], [0], [0], [0, 0, 1, 0], [], []>} : vector<8x4xf32>, vector<8x4xf32>, vector<8x8xf32> -> vector<8x8xf32>
    %cst_76 = arith.constant dense<0xFF800000> : vector<8xf32>
    %226 = vector.multi_reduction <maximumf>, %225, %cst_76 [1] : vector<8x8xf32> to vector<8xf32>
    %227 = vector.shape_cast %226 : vector<8xf32> to vector<8x1xf32>
    %228 = vector.broadcast %227 : vector<8x1xf32> to vector<8x8xf32>
    %229 = arith.subf %225, %228 : vector<8x8xf32>
    %230 = math.exp %229 : vector<8x8xf32>
    %cst_77 = arith.constant dense<0.000000e+00> : vector<8xf32>
    %231 = vector.multi_reduction <add>, %230, %cst_77 [1] : vector<8x8xf32> to vector<8xf32>
    %232 = vector.shape_cast %231 : vector<8xf32> to vector<8x1xf32>
    %233 = vector.broadcast %232 : vector<8x1xf32> to vector<8x8xf32>
    %234 = arith.divf %230, %233 : vector<8x8xf32>
    %cst_78 = arith.constant dense<0.000000e+00> : vector<8x4xf32>
    %235 = tpu.matmul %234, %224, %cst_78 {dimension_numbers = #tpu.dot_dimension_numbers<[1], [0], [0], [1], [0, 0, 1, 1], [], []>} : vector<8x8xf32>, vector<8x4xf32>, vector<8x4xf32> -> vector<8x4xf32>
    %236 = vector.extract_strided_slice %193 {offsets = [0, 12], sizes = [8, 4], strides = [1, 1]} : vector<8x96xf32> to vector<8x4xf32>
    %237 = vector.extract_strided_slice %193 {offsets = [0, 44], sizes = [8, 4], strides = [1, 1]} : vector<8x96xf32> to vector<8x4xf32>
    %238 = vector.extract_strided_slice %193 {offsets = [0, 76], sizes = [8, 4], strides = [1, 1]} : vector<8x96xf32> to vector<8x4xf32>
    %cst_79 = arith.constant dense<0.000000e+00> : vector<8x8xf32>
    %239 = tpu.matmul %236, %237, %cst_79 {dimension_numbers = #tpu.dot_dimension_numbers<[1], [1], [0], [0], [0, 0, 1, 0], [], []>} : vector<8x4xf32>, vector<8x4xf32>, vector<8x8xf32> -> vector<8x8xf32>
    %cst_80 = arith.constant dense<0xFF800000> : vector<8xf32>
    %240 = vector.multi_reduction <maximumf>, %239, %cst_80 [1] : vector<8x8xf32> to vector<8xf32>
    %241 = vector.shape_cast %240 : vector<8xf32> to vector<8x1xf32>
    %242 = vector.broadcast %241 : vector<8x1xf32> to vector<8x8xf32>
    %243 = arith.subf %239, %242 : vector<8x8xf32>
    %244 = math.exp %243 : vector<8x8xf32>
    %cst_81 = arith.constant dense<0.000000e+00> : vector<8xf32>
    %245 = vector.multi_reduction <add>, %244, %cst_81 [1] : vector<8x8xf32> to vector<8xf32>
    %246 = vector.shape_cast %245 : vector<8xf32> to vector<8x1xf32>
    %247 = vector.broadcast %246 : vector<8x1xf32> to vector<8x8xf32>
    %248 = arith.divf %244, %247 : vector<8x8xf32>
    %cst_82 = arith.constant dense<0.000000e+00> : vector<8x4xf32>
    %249 = tpu.matmul %248, %238, %cst_82 {dimension_numbers = #tpu.dot_dimension_numbers<[1], [0], [0], [1], [0, 0, 1, 1], [], []>} : vector<8x8xf32>, vector<8x4xf32>, vector<8x4xf32> -> vector<8x4xf32>
    %250 = vector.extract_strided_slice %193 {offsets = [0, 16], sizes = [8, 4], strides = [1, 1]} : vector<8x96xf32> to vector<8x4xf32>
    %251 = vector.extract_strided_slice %193 {offsets = [0, 48], sizes = [8, 4], strides = [1, 1]} : vector<8x96xf32> to vector<8x4xf32>
    %252 = vector.extract_strided_slice %193 {offsets = [0, 80], sizes = [8, 4], strides = [1, 1]} : vector<8x96xf32> to vector<8x4xf32>
    %cst_83 = arith.constant dense<0.000000e+00> : vector<8x8xf32>
    %253 = tpu.matmul %250, %251, %cst_83 {dimension_numbers = #tpu.dot_dimension_numbers<[1], [1], [0], [0], [0, 0, 1, 0], [], []>} : vector<8x4xf32>, vector<8x4xf32>, vector<8x8xf32> -> vector<8x8xf32>
    %cst_84 = arith.constant dense<0xFF800000> : vector<8xf32>
    %254 = vector.multi_reduction <maximumf>, %253, %cst_84 [1] : vector<8x8xf32> to vector<8xf32>
    %255 = vector.shape_cast %254 : vector<8xf32> to vector<8x1xf32>
    %256 = vector.broadcast %255 : vector<8x1xf32> to vector<8x8xf32>
    %257 = arith.subf %253, %256 : vector<8x8xf32>
    %258 = math.exp %257 : vector<8x8xf32>
    %cst_85 = arith.constant dense<0.000000e+00> : vector<8xf32>
    %259 = vector.multi_reduction <add>, %258, %cst_85 [1] : vector<8x8xf32> to vector<8xf32>
    %260 = vector.shape_cast %259 : vector<8xf32> to vector<8x1xf32>
    %261 = vector.broadcast %260 : vector<8x1xf32> to vector<8x8xf32>
    %262 = arith.divf %258, %261 : vector<8x8xf32>
    %cst_86 = arith.constant dense<0.000000e+00> : vector<8x4xf32>
    %263 = tpu.matmul %262, %252, %cst_86 {dimension_numbers = #tpu.dot_dimension_numbers<[1], [0], [0], [1], [0, 0, 1, 1], [], []>} : vector<8x8xf32>, vector<8x4xf32>, vector<8x4xf32> -> vector<8x4xf32>
    %264 = vector.extract_strided_slice %193 {offsets = [0, 20], sizes = [8, 4], strides = [1, 1]} : vector<8x96xf32> to vector<8x4xf32>
    %265 = vector.extract_strided_slice %193 {offsets = [0, 52], sizes = [8, 4], strides = [1, 1]} : vector<8x96xf32> to vector<8x4xf32>
    %266 = vector.extract_strided_slice %193 {offsets = [0, 84], sizes = [8, 4], strides = [1, 1]} : vector<8x96xf32> to vector<8x4xf32>
    %cst_87 = arith.constant dense<0.000000e+00> : vector<8x8xf32>
    %267 = tpu.matmul %264, %265, %cst_87 {dimension_numbers = #tpu.dot_dimension_numbers<[1], [1], [0], [0], [0, 0, 1, 0], [], []>} : vector<8x4xf32>, vector<8x4xf32>, vector<8x8xf32> -> vector<8x8xf32>
    %cst_88 = arith.constant dense<0xFF800000> : vector<8xf32>
    %268 = vector.multi_reduction <maximumf>, %267, %cst_88 [1] : vector<8x8xf32> to vector<8xf32>
    %269 = vector.shape_cast %268 : vector<8xf32> to vector<8x1xf32>
    %270 = vector.broadcast %269 : vector<8x1xf32> to vector<8x8xf32>
    %271 = arith.subf %267, %270 : vector<8x8xf32>
    %272 = math.exp %271 : vector<8x8xf32>
    %cst_89 = arith.constant dense<0.000000e+00> : vector<8xf32>
    %273 = vector.multi_reduction <add>, %272, %cst_89 [1] : vector<8x8xf32> to vector<8xf32>
    %274 = vector.shape_cast %273 : vector<8xf32> to vector<8x1xf32>
    %275 = vector.broadcast %274 : vector<8x1xf32> to vector<8x8xf32>
    %276 = arith.divf %272, %275 : vector<8x8xf32>
    %cst_90 = arith.constant dense<0.000000e+00> : vector<8x4xf32>
    %277 = tpu.matmul %276, %266, %cst_90 {dimension_numbers = #tpu.dot_dimension_numbers<[1], [0], [0], [1], [0, 0, 1, 1], [], []>} : vector<8x8xf32>, vector<8x4xf32>, vector<8x4xf32> -> vector<8x4xf32>
    %278 = vector.extract_strided_slice %193 {offsets = [0, 24], sizes = [8, 4], strides = [1, 1]} : vector<8x96xf32> to vector<8x4xf32>
    %279 = vector.extract_strided_slice %193 {offsets = [0, 56], sizes = [8, 4], strides = [1, 1]} : vector<8x96xf32> to vector<8x4xf32>
    %280 = vector.extract_strided_slice %193 {offsets = [0, 88], sizes = [8, 4], strides = [1, 1]} : vector<8x96xf32> to vector<8x4xf32>
    %cst_91 = arith.constant dense<0.000000e+00> : vector<8x8xf32>
    %281 = tpu.matmul %278, %279, %cst_91 {dimension_numbers = #tpu.dot_dimension_numbers<[1], [1], [0], [0], [0, 0, 1, 0], [], []>} : vector<8x4xf32>, vector<8x4xf32>, vector<8x8xf32> -> vector<8x8xf32>
    %cst_92 = arith.constant dense<0xFF800000> : vector<8xf32>
    %282 = vector.multi_reduction <maximumf>, %281, %cst_92 [1] : vector<8x8xf32> to vector<8xf32>
    %283 = vector.shape_cast %282 : vector<8xf32> to vector<8x1xf32>
    %284 = vector.broadcast %283 : vector<8x1xf32> to vector<8x8xf32>
    %285 = arith.subf %281, %284 : vector<8x8xf32>
    %286 = math.exp %285 : vector<8x8xf32>
    %cst_93 = arith.constant dense<0.000000e+00> : vector<8xf32>
    %287 = vector.multi_reduction <add>, %286, %cst_93 [1] : vector<8x8xf32> to vector<8xf32>
    %288 = vector.shape_cast %287 : vector<8xf32> to vector<8x1xf32>
    %289 = vector.broadcast %288 : vector<8x1xf32> to vector<8x8xf32>
    %290 = arith.divf %286, %289 : vector<8x8xf32>
    %cst_94 = arith.constant dense<0.000000e+00> : vector<8x4xf32>
    %291 = tpu.matmul %290, %280, %cst_94 {dimension_numbers = #tpu.dot_dimension_numbers<[1], [0], [0], [1], [0, 0, 1, 1], [], []>} : vector<8x8xf32>, vector<8x4xf32>, vector<8x4xf32> -> vector<8x4xf32>
    %292 = vector.extract_strided_slice %193 {offsets = [0, 28], sizes = [8, 4], strides = [1, 1]} : vector<8x96xf32> to vector<8x4xf32>
    %293 = vector.extract_strided_slice %193 {offsets = [0, 60], sizes = [8, 4], strides = [1, 1]} : vector<8x96xf32> to vector<8x4xf32>
    %294 = vector.extract_strided_slice %193 {offsets = [0, 92], sizes = [8, 4], strides = [1, 1]} : vector<8x96xf32> to vector<8x4xf32>
    %cst_95 = arith.constant dense<0.000000e+00> : vector<8x8xf32>
    %295 = tpu.matmul %292, %293, %cst_95 {dimension_numbers = #tpu.dot_dimension_numbers<[1], [1], [0], [0], [0, 0, 1, 0], [], []>} : vector<8x4xf32>, vector<8x4xf32>, vector<8x8xf32> -> vector<8x8xf32>
    %cst_96 = arith.constant dense<0xFF800000> : vector<8xf32>
    %296 = vector.multi_reduction <maximumf>, %295, %cst_96 [1] : vector<8x8xf32> to vector<8xf32>
    %297 = vector.shape_cast %296 : vector<8xf32> to vector<8x1xf32>
    %298 = vector.broadcast %297 : vector<8x1xf32> to vector<8x8xf32>
    %299 = arith.subf %295, %298 : vector<8x8xf32>
    %300 = math.exp %299 : vector<8x8xf32>
    %cst_97 = arith.constant dense<0.000000e+00> : vector<8xf32>
    %301 = vector.multi_reduction <add>, %300, %cst_97 [1] : vector<8x8xf32> to vector<8xf32>
    %302 = vector.shape_cast %301 : vector<8xf32> to vector<8x1xf32>
    %303 = vector.broadcast %302 : vector<8x1xf32> to vector<8x8xf32>
    %304 = arith.divf %300, %303 : vector<8x8xf32>
    %cst_98 = arith.constant dense<0.000000e+00> : vector<8x4xf32>
    %305 = tpu.matmul %304, %294, %cst_98 {dimension_numbers = #tpu.dot_dimension_numbers<[1], [0], [0], [1], [0, 0, 1, 1], [], []>} : vector<8x8xf32>, vector<8x4xf32>, vector<8x4xf32> -> vector<8x4xf32>
    %306 = tpu.concatenate %207, %221, %235, %249, %263, %277, %291, %305 in 1 : vector<8x4xf32>, vector<8x4xf32>, vector<8x4xf32>, vector<8x4xf32>, vector<8x4xf32>, vector<8x4xf32>, vector<8x4xf32>, vector<8x4xf32> -> vector<8x32xf32>
    %cst_99 = arith.constant dense<0.000000e+00> : vector<8x32xf32>
    %307 = tpu.matmul %306, %189, %cst_99 {dimension_numbers = #tpu.dot_dimension_numbers<[1], [0], [0], [1], [0, 0, 1, 1], [], []>} : vector<8x32xf32>, vector<32x32xf32>, vector<8x32xf32> -> vector<8x32xf32>
    %308 = vector.broadcast %190 : vector<1x32xf32> to vector<8x32xf32>
    %309 = arith.addf %307, %308 : vector<8x32xf32>
    %310 = arith.addf %186, %309 : vector<8x32xf32>
    %c10 = arith.constant 10 : index
    %c0_100 = arith.constant 0 : index
    %311 = vector.load %arg3[%c10, %c0_100] : memref<24x128xf32, #tpu.memory_space<vmem>>, vector<1x32xf32>
    %c11 = arith.constant 11 : index
    %c0_101 = arith.constant 0 : index
    %312 = vector.load %arg3[%c11, %c0_101] : memref<24x128xf32, #tpu.memory_space<vmem>>, vector<1x32xf32>
    %cst_102 = arith.constant dense<0.000000e+00> : vector<8xf32>
    %313 = vector.multi_reduction <add>, %310, %cst_102 [1] : vector<8x32xf32> to vector<8xf32>
    %314 = vector.shape_cast %313 : vector<8xf32> to vector<8x1xf32>
    %cst_103 = arith.constant 3.200000e+01 : f32
    %315 = vector.broadcast %cst_103 : f32 to vector<8x1xf32>
    %316 = arith.divf %314, %315 : vector<8x1xf32>
    %317 = vector.broadcast %316 : vector<8x1xf32> to vector<8x32xf32>
    %318 = arith.subf %310, %317 : vector<8x32xf32>
    %319 = arith.mulf %318, %318 : vector<8x32xf32>
    %cst_104 = arith.constant dense<0.000000e+00> : vector<8xf32>
    %320 = vector.multi_reduction <add>, %319, %cst_104 [1] : vector<8x32xf32> to vector<8xf32>
    %321 = vector.shape_cast %320 : vector<8xf32> to vector<8x1xf32>
    %cst_105 = arith.constant 3.200000e+01 : f32
    %322 = vector.broadcast %cst_105 : f32 to vector<8x1xf32>
    %323 = arith.divf %321, %322 : vector<8x1xf32>
    %324 = vector.broadcast %316 : vector<8x1xf32> to vector<8x32xf32>
    %325 = arith.subf %310, %324 : vector<8x32xf32>
    %cst_106 = arith.constant 9.99999974E-6 : f32
    %326 = vector.broadcast %cst_106 : f32 to vector<8x1xf32>
    %327 = arith.addf %323, %326 : vector<8x1xf32>
    %328 = math.rsqrt %327 : vector<8x1xf32>
    %329 = vector.broadcast %328 : vector<8x1xf32> to vector<8x32xf32>
    %330 = arith.mulf %325, %329 : vector<8x32xf32>
    %331 = vector.broadcast %311 : vector<1x32xf32> to vector<8x32xf32>
    %332 = arith.mulf %330, %331 : vector<8x32xf32>
    %333 = vector.broadcast %312 : vector<1x32xf32> to vector<8x32xf32>
    %334 = arith.addf %332, %333 : vector<8x32xf32>
    %c224 = arith.constant 224 : index
    %c0_107 = arith.constant 0 : index
    %335 = vector.load %arg2[%c224, %c0_107] : memref<416x128xf32, #tpu.memory_space<vmem>>, vector<32x64xf32>
    %c12 = arith.constant 12 : index
    %c0_108 = arith.constant 0 : index
    %336 = vector.load %arg3[%c12, %c0_108] : memref<24x128xf32, #tpu.memory_space<vmem>>, vector<1x64xf32>
    %c256 = arith.constant 256 : index
    %c0_109 = arith.constant 0 : index
    %337 = vector.load %arg2[%c256, %c0_109] : memref<416x128xf32, #tpu.memory_space<vmem>>, vector<64x32xf32>
    %c13 = arith.constant 13 : index
    %c0_110 = arith.constant 0 : index
    %338 = vector.load %arg3[%c13, %c0_110] : memref<24x128xf32, #tpu.memory_space<vmem>>, vector<1x32xf32>
    %cst_111 = arith.constant dense<0.000000e+00> : vector<8x64xf32>
    %339 = tpu.matmul %334, %335, %cst_111 {dimension_numbers = #tpu.dot_dimension_numbers<[1], [0], [0], [1], [0, 0, 1, 1], [], []>} : vector<8x32xf32>, vector<32x64xf32>, vector<8x64xf32> -> vector<8x64xf32>
    %340 = vector.broadcast %336 : vector<1x64xf32> to vector<8x64xf32>
    %341 = arith.addf %339, %340 : vector<8x64xf32>
    %cst_112 = arith.constant 0.000000e+00 : f32
    %342 = vector.broadcast %cst_112 : f32 to vector<8x64xf32>
    %343 = arith.maximumf %341, %342 : vector<8x64xf32>
    %cst_113 = arith.constant dense<0.000000e+00> : vector<8x32xf32>
    %344 = tpu.matmul %343, %337, %cst_113 {dimension_numbers = #tpu.dot_dimension_numbers<[1], [0], [0], [1], [0, 0, 1, 1], [], []>} : vector<8x64xf32>, vector<64x32xf32>, vector<8x32xf32> -> vector<8x32xf32>
    %345 = vector.broadcast %338 : vector<1x32xf32> to vector<8x32xf32>
    %346 = arith.addf %344, %345 : vector<8x32xf32>
    %347 = arith.addf %334, %346 : vector<8x32xf32>
    %c14 = arith.constant 14 : index
    %c0_114 = arith.constant 0 : index
    %348 = vector.load %arg3[%c14, %c0_114] : memref<24x128xf32, #tpu.memory_space<vmem>>, vector<1x32xf32>
    %c15 = arith.constant 15 : index
    %c0_115 = arith.constant 0 : index
    %349 = vector.load %arg3[%c15, %c0_115] : memref<24x128xf32, #tpu.memory_space<vmem>>, vector<1x32xf32>
    %cst_116 = arith.constant dense<0.000000e+00> : vector<8xf32>
    %350 = vector.multi_reduction <add>, %347, %cst_116 [1] : vector<8x32xf32> to vector<8xf32>
    %351 = vector.shape_cast %350 : vector<8xf32> to vector<8x1xf32>
    %cst_117 = arith.constant 3.200000e+01 : f32
    %352 = vector.broadcast %cst_117 : f32 to vector<8x1xf32>
    %353 = arith.divf %351, %352 : vector<8x1xf32>
    %354 = vector.broadcast %353 : vector<8x1xf32> to vector<8x32xf32>
    %355 = arith.subf %347, %354 : vector<8x32xf32>
    %356 = arith.mulf %355, %355 : vector<8x32xf32>
    %cst_118 = arith.constant dense<0.000000e+00> : vector<8xf32>
    %357 = vector.multi_reduction <add>, %356, %cst_118 [1] : vector<8x32xf32> to vector<8xf32>
    %358 = vector.shape_cast %357 : vector<8xf32> to vector<8x1xf32>
    %cst_119 = arith.constant 3.200000e+01 : f32
    %359 = vector.broadcast %cst_119 : f32 to vector<8x1xf32>
    %360 = arith.divf %358, %359 : vector<8x1xf32>
    %361 = vector.broadcast %353 : vector<8x1xf32> to vector<8x32xf32>
    %362 = arith.subf %347, %361 : vector<8x32xf32>
    %cst_120 = arith.constant 9.99999974E-6 : f32
    %363 = vector.broadcast %cst_120 : f32 to vector<8x1xf32>
    %364 = arith.addf %360, %363 : vector<8x1xf32>
    %365 = math.rsqrt %364 : vector<8x1xf32>
    %366 = vector.broadcast %365 : vector<8x1xf32> to vector<8x32xf32>
    %367 = arith.mulf %362, %366 : vector<8x32xf32>
    %368 = vector.broadcast %348 : vector<1x32xf32> to vector<8x32xf32>
    %369 = arith.mulf %367, %368 : vector<8x32xf32>
    %370 = vector.broadcast %349 : vector<1x32xf32> to vector<8x32xf32>
    %371 = arith.addf %369, %370 : vector<8x32xf32>
    %c320 = arith.constant 320 : index
    %c0_121 = arith.constant 0 : index
    %372 = vector.load %arg2[%c320, %c0_121] : memref<416x128xf32, #tpu.memory_space<vmem>>, vector<32x96xf32>
    %c16 = arith.constant 16 : index
    %c0_122 = arith.constant 0 : index
    %373 = vector.load %arg3[%c16, %c0_122] : memref<24x128xf32, #tpu.memory_space<vmem>>, vector<1x96xf32>
    %c352 = arith.constant 352 : index
    %c0_123 = arith.constant 0 : index
    %374 = vector.load %arg2[%c352, %c0_123] : memref<416x128xf32, #tpu.memory_space<vmem>>, vector<32x32xf32>
    %c17 = arith.constant 17 : index
    %c0_124 = arith.constant 0 : index
    %375 = vector.load %arg3[%c17, %c0_124] : memref<24x128xf32, #tpu.memory_space<vmem>>, vector<1x32xf32>
    %cst_125 = arith.constant dense<0.000000e+00> : vector<8x96xf32>
    %376 = tpu.matmul %371, %372, %cst_125 {dimension_numbers = #tpu.dot_dimension_numbers<[1], [0], [0], [1], [0, 0, 1, 1], [], []>} : vector<8x32xf32>, vector<32x96xf32>, vector<8x96xf32> -> vector<8x96xf32>
    %377 = vector.broadcast %373 : vector<1x96xf32> to vector<8x96xf32>
    %378 = arith.addf %376, %377 : vector<8x96xf32>
    %379 = vector.extract_strided_slice %378 {offsets = [0, 0], sizes = [8, 4], strides = [1, 1]} : vector<8x96xf32> to vector<8x4xf32>
    %380 = vector.extract_strided_slice %378 {offsets = [0, 32], sizes = [8, 4], strides = [1, 1]} : vector<8x96xf32> to vector<8x4xf32>
    %381 = vector.extract_strided_slice %378 {offsets = [0, 64], sizes = [8, 4], strides = [1, 1]} : vector<8x96xf32> to vector<8x4xf32>
    %cst_126 = arith.constant dense<0.000000e+00> : vector<8x8xf32>
    %382 = tpu.matmul %379, %380, %cst_126 {dimension_numbers = #tpu.dot_dimension_numbers<[1], [1], [0], [0], [0, 0, 1, 0], [], []>} : vector<8x4xf32>, vector<8x4xf32>, vector<8x8xf32> -> vector<8x8xf32>
    %cst_127 = arith.constant dense<0xFF800000> : vector<8xf32>
    %383 = vector.multi_reduction <maximumf>, %382, %cst_127 [1] : vector<8x8xf32> to vector<8xf32>
    %384 = vector.shape_cast %383 : vector<8xf32> to vector<8x1xf32>
    %385 = vector.broadcast %384 : vector<8x1xf32> to vector<8x8xf32>
    %386 = arith.subf %382, %385 : vector<8x8xf32>
    %387 = math.exp %386 : vector<8x8xf32>
    %cst_128 = arith.constant dense<0.000000e+00> : vector<8xf32>
    %388 = vector.multi_reduction <add>, %387, %cst_128 [1] : vector<8x8xf32> to vector<8xf32>
    %389 = vector.shape_cast %388 : vector<8xf32> to vector<8x1xf32>
    %390 = vector.broadcast %389 : vector<8x1xf32> to vector<8x8xf32>
    %391 = arith.divf %387, %390 : vector<8x8xf32>
    %cst_129 = arith.constant dense<0.000000e+00> : vector<8x4xf32>
    %392 = tpu.matmul %391, %381, %cst_129 {dimension_numbers = #tpu.dot_dimension_numbers<[1], [0], [0], [1], [0, 0, 1, 1], [], []>} : vector<8x8xf32>, vector<8x4xf32>, vector<8x4xf32> -> vector<8x4xf32>
    %393 = vector.extract_strided_slice %378 {offsets = [0, 4], sizes = [8, 4], strides = [1, 1]} : vector<8x96xf32> to vector<8x4xf32>
    %394 = vector.extract_strided_slice %378 {offsets = [0, 36], sizes = [8, 4], strides = [1, 1]} : vector<8x96xf32> to vector<8x4xf32>
    %395 = vector.extract_strided_slice %378 {offsets = [0, 68], sizes = [8, 4], strides = [1, 1]} : vector<8x96xf32> to vector<8x4xf32>
    %cst_130 = arith.constant dense<0.000000e+00> : vector<8x8xf32>
    %396 = tpu.matmul %393, %394, %cst_130 {dimension_numbers = #tpu.dot_dimension_numbers<[1], [1], [0], [0], [0, 0, 1, 0], [], []>} : vector<8x4xf32>, vector<8x4xf32>, vector<8x8xf32> -> vector<8x8xf32>
    %cst_131 = arith.constant dense<0xFF800000> : vector<8xf32>
    %397 = vector.multi_reduction <maximumf>, %396, %cst_131 [1] : vector<8x8xf32> to vector<8xf32>
    %398 = vector.shape_cast %397 : vector<8xf32> to vector<8x1xf32>
    %399 = vector.broadcast %398 : vector<8x1xf32> to vector<8x8xf32>
    %400 = arith.subf %396, %399 : vector<8x8xf32>
    %401 = math.exp %400 : vector<8x8xf32>
    %cst_132 = arith.constant dense<0.000000e+00> : vector<8xf32>
    %402 = vector.multi_reduction <add>, %401, %cst_132 [1] : vector<8x8xf32> to vector<8xf32>
    %403 = vector.shape_cast %402 : vector<8xf32> to vector<8x1xf32>
    %404 = vector.broadcast %403 : vector<8x1xf32> to vector<8x8xf32>
    %405 = arith.divf %401, %404 : vector<8x8xf32>
    %cst_133 = arith.constant dense<0.000000e+00> : vector<8x4xf32>
    %406 = tpu.matmul %405, %395, %cst_133 {dimension_numbers = #tpu.dot_dimension_numbers<[1], [0], [0], [1], [0, 0, 1, 1], [], []>} : vector<8x8xf32>, vector<8x4xf32>, vector<8x4xf32> -> vector<8x4xf32>
    %407 = vector.extract_strided_slice %378 {offsets = [0, 8], sizes = [8, 4], strides = [1, 1]} : vector<8x96xf32> to vector<8x4xf32>
    %408 = vector.extract_strided_slice %378 {offsets = [0, 40], sizes = [8, 4], strides = [1, 1]} : vector<8x96xf32> to vector<8x4xf32>
    %409 = vector.extract_strided_slice %378 {offsets = [0, 72], sizes = [8, 4], strides = [1, 1]} : vector<8x96xf32> to vector<8x4xf32>
    %cst_134 = arith.constant dense<0.000000e+00> : vector<8x8xf32>
    %410 = tpu.matmul %407, %408, %cst_134 {dimension_numbers = #tpu.dot_dimension_numbers<[1], [1], [0], [0], [0, 0, 1, 0], [], []>} : vector<8x4xf32>, vector<8x4xf32>, vector<8x8xf32> -> vector<8x8xf32>
    %cst_135 = arith.constant dense<0xFF800000> : vector<8xf32>
    %411 = vector.multi_reduction <maximumf>, %410, %cst_135 [1] : vector<8x8xf32> to vector<8xf32>
    %412 = vector.shape_cast %411 : vector<8xf32> to vector<8x1xf32>
    %413 = vector.broadcast %412 : vector<8x1xf32> to vector<8x8xf32>
    %414 = arith.subf %410, %413 : vector<8x8xf32>
    %415 = math.exp %414 : vector<8x8xf32>
    %cst_136 = arith.constant dense<0.000000e+00> : vector<8xf32>
    %416 = vector.multi_reduction <add>, %415, %cst_136 [1] : vector<8x8xf32> to vector<8xf32>
    %417 = vector.shape_cast %416 : vector<8xf32> to vector<8x1xf32>
    %418 = vector.broadcast %417 : vector<8x1xf32> to vector<8x8xf32>
    %419 = arith.divf %415, %418 : vector<8x8xf32>
    %cst_137 = arith.constant dense<0.000000e+00> : vector<8x4xf32>
    %420 = tpu.matmul %419, %409, %cst_137 {dimension_numbers = #tpu.dot_dimension_numbers<[1], [0], [0], [1], [0, 0, 1, 1], [], []>} : vector<8x8xf32>, vector<8x4xf32>, vector<8x4xf32> -> vector<8x4xf32>
    %421 = vector.extract_strided_slice %378 {offsets = [0, 12], sizes = [8, 4], strides = [1, 1]} : vector<8x96xf32> to vector<8x4xf32>
    %422 = vector.extract_strided_slice %378 {offsets = [0, 44], sizes = [8, 4], strides = [1, 1]} : vector<8x96xf32> to vector<8x4xf32>
    %423 = vector.extract_strided_slice %378 {offsets = [0, 76], sizes = [8, 4], strides = [1, 1]} : vector<8x96xf32> to vector<8x4xf32>
    %cst_138 = arith.constant dense<0.000000e+00> : vector<8x8xf32>
    %424 = tpu.matmul %421, %422, %cst_138 {dimension_numbers = #tpu.dot_dimension_numbers<[1], [1], [0], [0], [0, 0, 1, 0], [], []>} : vector<8x4xf32>, vector<8x4xf32>, vector<8x8xf32> -> vector<8x8xf32>
    %cst_139 = arith.constant dense<0xFF800000> : vector<8xf32>
    %425 = vector.multi_reduction <maximumf>, %424, %cst_139 [1] : vector<8x8xf32> to vector<8xf32>
    %426 = vector.shape_cast %425 : vector<8xf32> to vector<8x1xf32>
    %427 = vector.broadcast %426 : vector<8x1xf32> to vector<8x8xf32>
    %428 = arith.subf %424, %427 : vector<8x8xf32>
    %429 = math.exp %428 : vector<8x8xf32>
    %cst_140 = arith.constant dense<0.000000e+00> : vector<8xf32>
    %430 = vector.multi_reduction <add>, %429, %cst_140 [1] : vector<8x8xf32> to vector<8xf32>
    %431 = vector.shape_cast %430 : vector<8xf32> to vector<8x1xf32>
    %432 = vector.broadcast %431 : vector<8x1xf32> to vector<8x8xf32>
    %433 = arith.divf %429, %432 : vector<8x8xf32>
    %cst_141 = arith.constant dense<0.000000e+00> : vector<8x4xf32>
    %434 = tpu.matmul %433, %423, %cst_141 {dimension_numbers = #tpu.dot_dimension_numbers<[1], [0], [0], [1], [0, 0, 1, 1], [], []>} : vector<8x8xf32>, vector<8x4xf32>, vector<8x4xf32> -> vector<8x4xf32>
    %435 = vector.extract_strided_slice %378 {offsets = [0, 16], sizes = [8, 4], strides = [1, 1]} : vector<8x96xf32> to vector<8x4xf32>
    %436 = vector.extract_strided_slice %378 {offsets = [0, 48], sizes = [8, 4], strides = [1, 1]} : vector<8x96xf32> to vector<8x4xf32>
    %437 = vector.extract_strided_slice %378 {offsets = [0, 80], sizes = [8, 4], strides = [1, 1]} : vector<8x96xf32> to vector<8x4xf32>
    %cst_142 = arith.constant dense<0.000000e+00> : vector<8x8xf32>
    %438 = tpu.matmul %435, %436, %cst_142 {dimension_numbers = #tpu.dot_dimension_numbers<[1], [1], [0], [0], [0, 0, 1, 0], [], []>} : vector<8x4xf32>, vector<8x4xf32>, vector<8x8xf32> -> vector<8x8xf32>
    %cst_143 = arith.constant dense<0xFF800000> : vector<8xf32>
    %439 = vector.multi_reduction <maximumf>, %438, %cst_143 [1] : vector<8x8xf32> to vector<8xf32>
    %440 = vector.shape_cast %439 : vector<8xf32> to vector<8x1xf32>
    %441 = vector.broadcast %440 : vector<8x1xf32> to vector<8x8xf32>
    %442 = arith.subf %438, %441 : vector<8x8xf32>
    %443 = math.exp %442 : vector<8x8xf32>
    %cst_144 = arith.constant dense<0.000000e+00> : vector<8xf32>
    %444 = vector.multi_reduction <add>, %443, %cst_144 [1] : vector<8x8xf32> to vector<8xf32>
    %445 = vector.shape_cast %444 : vector<8xf32> to vector<8x1xf32>
    %446 = vector.broadcast %445 : vector<8x1xf32> to vector<8x8xf32>
    %447 = arith.divf %443, %446 : vector<8x8xf32>
    %cst_145 = arith.constant dense<0.000000e+00> : vector<8x4xf32>
    %448 = tpu.matmul %447, %437, %cst_145 {dimension_numbers = #tpu.dot_dimension_numbers<[1], [0], [0], [1], [0, 0, 1, 1], [], []>} : vector<8x8xf32>, vector<8x4xf32>, vector<8x4xf32> -> vector<8x4xf32>
    %449 = vector.extract_strided_slice %378 {offsets = [0, 20], sizes = [8, 4], strides = [1, 1]} : vector<8x96xf32> to vector<8x4xf32>
    %450 = vector.extract_strided_slice %378 {offsets = [0, 52], sizes = [8, 4], strides = [1, 1]} : vector<8x96xf32> to vector<8x4xf32>
    %451 = vector.extract_strided_slice %378 {offsets = [0, 84], sizes = [8, 4], strides = [1, 1]} : vector<8x96xf32> to vector<8x4xf32>
    %cst_146 = arith.constant dense<0.000000e+00> : vector<8x8xf32>
    %452 = tpu.matmul %449, %450, %cst_146 {dimension_numbers = #tpu.dot_dimension_numbers<[1], [1], [0], [0], [0, 0, 1, 0], [], []>} : vector<8x4xf32>, vector<8x4xf32>, vector<8x8xf32> -> vector<8x8xf32>
    %cst_147 = arith.constant dense<0xFF800000> : vector<8xf32>
    %453 = vector.multi_reduction <maximumf>, %452, %cst_147 [1] : vector<8x8xf32> to vector<8xf32>
    %454 = vector.shape_cast %453 : vector<8xf32> to vector<8x1xf32>
    %455 = vector.broadcast %454 : vector<8x1xf32> to vector<8x8xf32>
    %456 = arith.subf %452, %455 : vector<8x8xf32>
    %457 = math.exp %456 : vector<8x8xf32>
    %cst_148 = arith.constant dense<0.000000e+00> : vector<8xf32>
    %458 = vector.multi_reduction <add>, %457, %cst_148 [1] : vector<8x8xf32> to vector<8xf32>
    %459 = vector.shape_cast %458 : vector<8xf32> to vector<8x1xf32>
    %460 = vector.broadcast %459 : vector<8x1xf32> to vector<8x8xf32>
    %461 = arith.divf %457, %460 : vector<8x8xf32>
    %cst_149 = arith.constant dense<0.000000e+00> : vector<8x4xf32>
    %462 = tpu.matmul %461, %451, %cst_149 {dimension_numbers = #tpu.dot_dimension_numbers<[1], [0], [0], [1], [0, 0, 1, 1], [], []>} : vector<8x8xf32>, vector<8x4xf32>, vector<8x4xf32> -> vector<8x4xf32>
    %463 = vector.extract_strided_slice %378 {offsets = [0, 24], sizes = [8, 4], strides = [1, 1]} : vector<8x96xf32> to vector<8x4xf32>
    %464 = vector.extract_strided_slice %378 {offsets = [0, 56], sizes = [8, 4], strides = [1, 1]} : vector<8x96xf32> to vector<8x4xf32>
    %465 = vector.extract_strided_slice %378 {offsets = [0, 88], sizes = [8, 4], strides = [1, 1]} : vector<8x96xf32> to vector<8x4xf32>
    %cst_150 = arith.constant dense<0.000000e+00> : vector<8x8xf32>
    %466 = tpu.matmul %463, %464, %cst_150 {dimension_numbers = #tpu.dot_dimension_numbers<[1], [1], [0], [0], [0, 0, 1, 0], [], []>} : vector<8x4xf32>, vector<8x4xf32>, vector<8x8xf32> -> vector<8x8xf32>
    %cst_151 = arith.constant dense<0xFF800000> : vector<8xf32>
    %467 = vector.multi_reduction <maximumf>, %466, %cst_151 [1] : vector<8x8xf32> to vector<8xf32>
    %468 = vector.shape_cast %467 : vector<8xf32> to vector<8x1xf32>
    %469 = vector.broadcast %468 : vector<8x1xf32> to vector<8x8xf32>
    %470 = arith.subf %466, %469 : vector<8x8xf32>
    %471 = math.exp %470 : vector<8x8xf32>
    %cst_152 = arith.constant dense<0.000000e+00> : vector<8xf32>
    %472 = vector.multi_reduction <add>, %471, %cst_152 [1] : vector<8x8xf32> to vector<8xf32>
    %473 = vector.shape_cast %472 : vector<8xf32> to vector<8x1xf32>
    %474 = vector.broadcast %473 : vector<8x1xf32> to vector<8x8xf32>
    %475 = arith.divf %471, %474 : vector<8x8xf32>
    %cst_153 = arith.constant dense<0.000000e+00> : vector<8x4xf32>
    %476 = tpu.matmul %475, %465, %cst_153 {dimension_numbers = #tpu.dot_dimension_numbers<[1], [0], [0], [1], [0, 0, 1, 1], [], []>} : vector<8x8xf32>, vector<8x4xf32>, vector<8x4xf32> -> vector<8x4xf32>
    %477 = vector.extract_strided_slice %378 {offsets = [0, 28], sizes = [8, 4], strides = [1, 1]} : vector<8x96xf32> to vector<8x4xf32>
    %478 = vector.extract_strided_slice %378 {offsets = [0, 60], sizes = [8, 4], strides = [1, 1]} : vector<8x96xf32> to vector<8x4xf32>
    %479 = vector.extract_strided_slice %378 {offsets = [0, 92], sizes = [8, 4], strides = [1, 1]} : vector<8x96xf32> to vector<8x4xf32>
    %cst_154 = arith.constant dense<0.000000e+00> : vector<8x8xf32>
    %480 = tpu.matmul %477, %478, %cst_154 {dimension_numbers = #tpu.dot_dimension_numbers<[1], [1], [0], [0], [0, 0, 1, 0], [], []>} : vector<8x4xf32>, vector<8x4xf32>, vector<8x8xf32> -> vector<8x8xf32>
    %cst_155 = arith.constant dense<0xFF800000> : vector<8xf32>
    %481 = vector.multi_reduction <maximumf>, %480, %cst_155 [1] : vector<8x8xf32> to vector<8xf32>
    %482 = vector.shape_cast %481 : vector<8xf32> to vector<8x1xf32>
    %483 = vector.broadcast %482 : vector<8x1xf32> to vector<8x8xf32>
    %484 = arith.subf %480, %483 : vector<8x8xf32>
    %485 = math.exp %484 : vector<8x8xf32>
    %cst_156 = arith.constant dense<0.000000e+00> : vector<8xf32>
    %486 = vector.multi_reduction <add>, %485, %cst_156 [1] : vector<8x8xf32> to vector<8xf32>
    %487 = vector.shape_cast %486 : vector<8xf32> to vector<8x1xf32>
    %488 = vector.broadcast %487 : vector<8x1xf32> to vector<8x8xf32>
    %489 = arith.divf %485, %488 : vector<8x8xf32>
    %cst_157 = arith.constant dense<0.000000e+00> : vector<8x4xf32>
    %490 = tpu.matmul %489, %479, %cst_157 {dimension_numbers = #tpu.dot_dimension_numbers<[1], [0], [0], [1], [0, 0, 1, 1], [], []>} : vector<8x8xf32>, vector<8x4xf32>, vector<8x4xf32> -> vector<8x4xf32>
    %491 = tpu.concatenate %392, %406, %420, %434, %448, %462, %476, %490 in 1 : vector<8x4xf32>, vector<8x4xf32>, vector<8x4xf32>, vector<8x4xf32>, vector<8x4xf32>, vector<8x4xf32>, vector<8x4xf32>, vector<8x4xf32> -> vector<8x32xf32>
    %cst_158 = arith.constant dense<0.000000e+00> : vector<8x32xf32>
    %492 = tpu.matmul %491, %374, %cst_158 {dimension_numbers = #tpu.dot_dimension_numbers<[1], [0], [0], [1], [0, 0, 1, 1], [], []>} : vector<8x32xf32>, vector<32x32xf32>, vector<8x32xf32> -> vector<8x32xf32>
    %493 = vector.broadcast %375 : vector<1x32xf32> to vector<8x32xf32>
    %494 = arith.addf %492, %493 : vector<8x32xf32>
    %cst_159 = arith.constant dense<0.000000e+00> : vector<32xf32>
    %495 = vector.multi_reduction <add>, %494, %cst_159 [0] : vector<8x32xf32> to vector<32xf32>
    %496 = vector.shape_cast %495 : vector<32xf32> to vector<1x32xf32>
    %cst_160 = arith.constant 8.000000e+00 : f32
    %497 = vector.broadcast %cst_160 : f32 to vector<1x32xf32>
    %498 = arith.divf %496, %497 : vector<1x32xf32>
    %c384 = arith.constant 384 : index
    %c0_161 = arith.constant 0 : index
    %499 = vector.load %arg2[%c384, %c0_161] : memref<416x128xf32, #tpu.memory_space<vmem>>, vector<32x128xf32>
    %c18 = arith.constant 18 : index
    %c0_162 = arith.constant 0 : index
    %500 = vector.load %arg3[%c18, %c0_162] : memref<24x128xf32, #tpu.memory_space<vmem>>, vector<1x128xf32>
    %cst_163 = arith.constant dense<0.000000e+00> : vector<1x128xf32>
    %501 = tpu.matmul %498, %499, %cst_163 {dimension_numbers = #tpu.dot_dimension_numbers<[1], [0], [0], [1], [0, 0, 1, 1], [], []>} : vector<1x32xf32>, vector<32x128xf32>, vector<1x128xf32> -> vector<1x128xf32>
    %502 = arith.addf %501, %500 : vector<1x128xf32>
    %c0_164 = arith.constant 0 : index
    %c0_165 = arith.constant 0 : index
    %c0_166 = arith.constant 0 : index
    %503 = vector.load %arg4[%c0_164, %c0_165, %c0_166] : memref<1x1x128xf32, #tpu.memory_space<vmem>>, vector<1x1x128xf32>
    %504 = vector.shape_cast %503 : vector<1x1x128xf32> to vector<1x128xf32>
    %505 = vector.shape_cast %502 : vector<1x128xf32> to vector<1x1x128xf32>
    tpu.vector_store %arg4[%c0_164, %c0_165, %c0_166], %505 {strides = array<i32>} : memref<1x1x128xf32, #tpu.memory_space<vmem>>, vector<1x1x128xf32>,
    return
  }
  func.func @transform_0(%arg0: i32) -> (i32, i32, i32) {
    %c0_i32 = arith.constant 0 : i32
    %c0_i32_0 = arith.constant 0 : i32
    %c0_i32_1 = arith.constant 0 : i32
    return %arg0, %c0_i32, %c0_i32_0 : i32, i32, i32
  }
  func.func @transform_1(%arg0: i32) -> (i32, i32) {
    %c0_i32 = arith.constant 0 : i32
    %c0_i32_0 = arith.constant 0 : i32
    %c0_i32_1 = arith.constant 0 : i32
    return %c0_i32, %c0_i32_0 : i32, i32
  }
  func.func @transform_2(%arg0: i32) -> (i32, i32) {
    %c0_i32 = arith.constant 0 : i32
    %c0_i32_0 = arith.constant 0 : i32
    %c0_i32_1 = arith.constant 0 : i32
    return %c0_i32, %c0_i32_0 : i32, i32
  }
  func.func @transform_3(%arg0: i32) -> (i32, i32, i32) {
    %c0_i32 = arith.constant 0 : i32
    %c0_i32_0 = arith.constant 0 : i32
    %c0_i32_1 = arith.constant 0 : i32
    return %arg0, %c0_i32, %c0_i32_0 : i32, i32, i32
  }
}

</mosaic_0001>

<bundles_post_ra>
// kernel: transformer_model_pre_forward.1
= control target key start
LH: loop header
LB: loop body
LE: loop exit
PB: predicated region body
PF: predicated region fallthrough
CT: control target
= control target key end

     0   :  { %s3935_s0 = inlined_call_operand.vmem [shape: f32[2,8,32], index: 0, kind: input, shape index: {}]   ;;  %s3936_s1 = inlined_call_operand.vmem [shape: f32[416,128], index: 1, kind: input, shape index: {}]   ;;  %s3937_s2 = inlined_call_operand.vmem [shape: f32[24,128], index: 2, kind: input, shape index: {}]   ;;  %s3938_s3 = inlined_call_operand.hbm [shape: f32[2,1,128], index: 3, kind: output, shape index: {}]  }
   0x1   :  { %4004 = sst [smem:[#allocation14_spill]] %s3935_s0 }
   0x2   :  { %4005 = sst [smem:[#allocation15_spill]] %s3938_s3 }
   0x3   :  { %8 = vsyncpa [#allocation3], 0 }
   0x4   :  { %10 = vsyncpa [#allocation3 + $0x1], 0  ;;  %s3087_s12 = smov 0   ;;  %s3089_s13 = smov 0  }
   0x5   :  { %s3091_s14 = smov 0   ;;  %s3093_s15 = smov 0  }
   0x6 LB: > { %4006 = sst [smem:[#allocation5_spill]] %s3021_s12  ;;  %s3108_s16 = sadd.s32 4294967295, %s3033_s15   ;;  %s3033_s15 = sphi %s3093_s15, %s4073_s15   ;;  %s3029_s14 = sphi %s3091_s14, %s4076_s14   ;;  %s3025_s13 = sphi %s3089_s13, %s4075_s13   ;;  %s3021_s12 = sphi %s3087_s12, %s4074_s12  }
   0x7   : > { %4007 = sst [smem:[#allocation6_spill]] %s3025_s13  ;;  %s2684_s17 = sadd.s32 4294967294, %s3033_s15  }
   0x8   : > { %4008 = sst [smem:[#allocation7_spill]] %s3029_s14  ;;  %s3112_s18 = sadd.s32 1, %s3033_s15  }
   0x9   : > { %4009 = sst [smem:[#allocation8_spill]] %s3033_s15  ;;  %s91_s19 = sadd.s32 1, %s3029_s14 }
   0xa   : > { %4010 = sst [smem:[#allocation9_spill]] %s3108_s16  ;;  %s88_s20 = ssub.s32 %s3033_s15, %s3112_s18 }
   0xb   : > { %4011 = sst [smem:[#allocation10_spill]] %s3112_s18  ;;  %p101_p0 = scmp.ne.s32.totalorder %s3029_s14, %s3025_s13 }
   0xc   : > { %p89_p1 = scmp.eq.s32.totalorder %s88_s20, 0  ;;  %p102_p2 = scmp.eq.s32.totalorder %s3108_s16, 1 }
   0xd   : > { %p107_p3 = scmp.ne.s32.totalorder %s3025_s13, %s3021_s12  ;;  %p108_p4 = scmp.eq.s32.totalorder %s2684_s17, 1 }
   0xe   : > { %s3123_s21 = scalar_select %p89_p1, %s3029_s14, %s91_s19  }
   0xf   : > { %p3125_p5 = por %p102_p2, %p101_p0  ;;  %p3129_p6 = por %p108_p4, %p107_p3 }
  0x10   : > { %4012 = sst [smem:[#allocation11_spill]] %s3123_s21  ;;  %p2687_p7 = scmp.ge.s32.totalorder %s3033_s15, 1 }
  0x11   : > { %s4013_s22 = scalar_select %p3125_p5, 1, 0 }
  0x12   : > { %s4015_s23 = scalar_select %p3129_p6, 1, 0 }
  0x13   : > { %4014 = sst [smem:[#allocation12_spill]] %s4013_s22  ;;  %p139_p8 = scmp.lt.s32.totalorder %s3033_s15, 3 }
  0x14   : > { %4016 = sst [smem:[#allocation13_spill]] %s4015_s23 }
  0x15   : > { %p140_p9 = pnand %p2687_p7, %p139_p8 }
  0x16   : > { %p161_p10 = scmp.lt.s32.totalorder (!%p140_p9), %s3108_s16, 1  ;;  %s4017_s0 = sld [smem:[#allocation14_spill]] (!%p140_p9) }
  0x17   : > { %143 = sbr.rel (%p140_p9) target bundleno = 5903 (0x170f), region = 32  ;;  %s3985_s17 = smov (!%p140_p9), 84  }
  0x18   : > { %s3990_s19 = smov (!%p140_p9), 124   ;;  %s3991_s20 = smov (!%p140_p9), 96  }
  0x19   : > { %s3987_s24 = smov (!%p140_p9), 120   ;;  %s3969_s25 = smov (!%p140_p9), 88  }
  0x1a   : > { %s3973_s26 = smov (!%p140_p9), 92   ;;  %s3986_s27 = smov (!%p140_p9), 76  }
  0x1b   : > { %s3984_s28 = smov (!%p140_p9), 80   ;;  %s3965_s29 = smov (!%p140_p9), 116  }
  0x1c   : > { %v169_v0 = vld [vmem:[%s3936_s1 + $0x18] sm:$0xff]  ;;  %v168_v1 = vld [vmem:[%s3936_s1 + $0x10] sm:$0xff]  ;;  %v167_v2 = vld [vmem:[%s3936_s1 + $0x8] sm:$0xff]  ;;  %s162_s30 = scalar_select %p161_p10, %s3108_s16, 1  ;;  %vm3989_vm0 = vcmask 261120   ;;  %vm204_vm1 = vcmask 31744  }
  0x1d   : > { %193 = vmatpush.msra.mxu0 %v169_v0  ;;  %v166_v3 = vld [vmem:[%s3936_s1] sm:$0xff]  ;;  %s3983_s4 = smov 108   ;;  %s3959_s5 = smov 112   ;;  %vm229_vm2 = vcmask 64512  }
  0x1e   : > { %s2688_s6 = sshll.u32 %s162_s30, 3  ;;  %v2845_v5 = vld [vmem:[%s3937_s2] ss:$0 sm:$0xff]  ;;  %s3945_s30 = smov 72  }
  0x1f   : > { %194 = vmatpush.msra.mxu0 %v168_v1  ;;  %s164_s9 = scalar_lea.vmem %s4017_s0, %s2688_s6  ;;  %s3943_s6 = smov 100  }
  0x20   : > { %v3152_v4 = vld [vmem:[%s164_s9] sm:$0xff]  ;;  %s3981_s7 = smov 104   ;;  %s3947_s8 = smov 68  }
  0x21   : > { %195 = vmatpush.msra.mxu0 %v167_v2  ;;  %s3992_s9 = smov 64   ;;  %s3939_s10 = smov 60  }
  0x22   : > { %s3941_s11 = smov 56   ;;  %s4040_s0 = smov 20  }
  0x23   : > { %196 = vmatpush.msra.mxu0 %v166_v3  ;;  %s4041_s21 = smov 16   ;;  %s4042_s14 = smov 28  }
  0x24   : > { %2689 = vmatmul.msk.f32.vlgmr.msra.gmra.mxu0 %vm3989_vm0, %v3152_v4  ;;  %s4043_s18 = smov 24   ;;  %s4054_s3 = smov 124  }
  0x25   : > { %s4055_s12 = smov 120   ;;  %s4056_s13 = smov 76  }
  0xa1   : > { %v198_v6 = vpop.f32.mrf.mxu0 }
  0xa2   : > { %v3159_v7 = vadd.f32 %v2845_v5, %v198_v6 }
  0xa4   : > { %438 = vrot.lane.b32.xlu2 %v3159_v7, %s3985_s17  ;;  %280 = vrot.lane.b32.xlu1 %v3159_v7, %s3990_s19 }
  0xa5   : > { %202 = vrot.lane.b32.xlu0 %v3159_v7, %s3991_s20 }
  0xac   : > { %358 = vrot.lane.b32.xlu2 %v3159_v7, %s3987_s24  ;;  %360 = vrot.lane.b32.xlu1 %v3159_v7, %s3969_s25  ;;  %s4020_s25 = smov 88  }
  0xad   : > { %282 = vrot.lane.b32.xlu0 %v3159_v7, %s3973_s26  ;;  %s4021_s26 = smov 116  }
  0xb4   : > { %594 = vrot.lane.b32.xlu2 %v3159_v7, %s3986_s27  ;;  %516 = vrot.lane.b32.xlu1 %v3159_v7, %s3984_s28 }
  0xb5   : > { %436 = vrot.lane.b32.xlu0 %v3159_v7, %s3965_s29  ;;  %s4022_s29 = smov 112  }
  0xbc   : > { %672 = vrot.lane.b32.xlu2 %v3159_v7, %s3945_s30  ;;  %592 = vrot.lane.b32.xlu1 %v3159_v7, %s3983_s4  ;;  %s3949_s30 = smov 40  }
  0xbd   : > { %514 = vrot.lane.b32.xlu0 %v3159_v7, %s3959_s5  ;;  %s3975_s5 = smov 24  }
  0xc4   : > { %748 = vrot.lane.b32.xlu2 %v3159_v7, %s3943_s6  ;;  %670 = vrot.lane.b32.xlu1 %v3159_v7, %s3981_s7  ;;  %s3957_s6 = smov 48   ;;  %s4019_s7 = smov 92  }
  0xc5   : > { %750 = vrot.lane.b32.xlu0 %v3159_v7, %s3947_s8  ;;  %s3951_s8 = smov 52  }
  0xcc   : > { %254 = vrot.lane.b32.xlu2 %v3159_v7, %s3992_s9 }
  0xfe   : > { %v439_v8 = vpop.permute.xlu2 %438 }
  0xff   : > { %2699 = vmatpush.xpose.msk.msrb.mxu0 %vm204_vm1, %v439_v8 }
 0x106   : > { %v359_v9 = vpop.permute.xlu2 %358 }
 0x10e   : > { %v595_v10 = vpop.permute.xlu2 %594 }
 0x10f   : > { %2705 = vmatpush.xpose.msk.msra.mxu0 %vm204_vm1, %v595_v10 }
 0x116   : > { %v673_v11 = vpop.permute.xlu2 %672  ;;  %v281_v12 = vpop.permute.xlu1 %280 }
 0x117   : > { %v203_v13 = vpop.permute.xlu0 %202 }
 0x118   : > { %2690 = vmatpush.xpose.msk.msra.mxu1 %vm204_vm1, %v203_v13 }
 0x11b   : > { %2691 = vmatmul.msk.f32.vlgmr.msra.gmra.mxu1 %vm204_vm1, %v3159_v7 }
 0x11e   : > { %v749_v14 = vpop.permute.xlu2 %748  ;;  %v361_v15 = vpop.permute.xlu1 %360 }
 0x11f   : > { %v283_v16 = vpop.permute.xlu0 %282  ;;  %2696 = vmatpush.xpose.msk.msrb.mxu1 %vm204_vm1, %v361_v15 }
 0x120   : > { %2693 = vmatpush.xpose.msk.msra.mxu3 %vm204_vm1, %v283_v16 }
 0x123   : > { %2694 = vmatmul.msk.f32.vlgmr.msra.gmra.mxu3 %vm204_vm1, %v281_v12  ;;  %2697 = vmatmul.msk.f32.vlgmr.msrb.gmra.mxu1 %vm204_vm1, %v359_v9 }
 0x126   : > { %v255_v17 = vpop.permute.xlu2 %254  ;;  %v517_v18 = vpop.permute.xlu1 %516 }
 0x127   : > { %v437_v19 = vpop.permute.xlu0 %436  ;;  %275 = vmatpush.msra.mxu2 %v255_v17  ;;  %2702 = vmatpush.xpose.msk.msra.mxu1 %vm204_vm1, %v517_v18 }
 0x128   : > { %2700 = vmatmul.msk.f32.vlgmr.msrb.gmra.mxu0 %vm204_vm1, %v437_v19 }
 0x12b   : > { %2708 = vmatpush.xpose.msk.msrb.mxu1 %vm204_vm1, %v673_v11 }
 0x12e   : > { %v593_v20 = vpop.permute.xlu1 %592 }
 0x12f   : > { %v515_v21 = vpop.permute.xlu0 %514 }
 0x130   : > { %2703 = vmatmul.msk.f32.vlgmr.msra.gmra.mxu1 %vm204_vm1, %v515_v21  ;;  %2706 = vmatmul.msk.f32.vlgmr.msra.gmra.mxu0 %vm204_vm1, %v593_v20 }
 0x136   : > { %v671_v22 = vpop.permute.xlu1 %670 }
 0x137   : > { %v751_v23 = vpop.permute.xlu0 %750 }
 0x138   : > { %2709 = vmatmul.msk.f32.vlgmr.msrb.gmra.mxu1 %vm204_vm1, %v671_v22  ;;  %2711 = vmatpush.xpose.msk.msrb.mxu0 %vm204_vm1, %v751_v23 }
 0x13b   : > { %2712 = vmatmul.msk.f32.vlgmr.msrb.gmra.mxu0 %vm204_vm1, %v749_v14 }
 0x198   : > { %v226_v24 = vpop.f32.mrf.mxu1 }
 0x199   : > { %v230_v25 = vsel %vm229_vm2, %v226_v24, -inf }
 0x19a   : > { %231 = vmax.xlane.f32.xlu0 %v230_v25 }
 0x1a0   : > { %v383_v26 = vpop.f32.mrf.mxu1 }
 0x1a1   : > { %v386_v33 = vsel %vm229_vm2, %v383_v26, -inf }
 0x1a5   : > { %v461_v27 = vpop.f32.mrf.mxu0 }
 0x1a6   : > { %v305_v28 = vpop.f32.mrf.mxu3  ;;  %v464_v29 = vsel %vm229_vm2, %v461_v27, -inf }
 0x1a7   : > { %465 = vmax.xlane.f32.xlu2 %v464_v29  ;;  %v308_v30 = vsel %vm229_vm2, %v305_v28, -inf }
 0x1a8   : > { %309 = vmax.xlane.f32.xlu1 %v308_v30 }
 0x1ad   : > { %v539_v31 = vpop.f32.mrf.mxu1  ;;  %v617_v32 = vpop.f32.mrf.mxu0 }
 0x1ae   : > { %v542_v34 = vsel %vm229_vm2, %v539_v31, -inf  ;;  %v620_v35 = vsel %vm229_vm2, %v617_v32, -inf }
 0x1af   : > { %387 = vmax.xlane.f32.xlu2 %v386_v33  ;;  %543 = vmax.xlane.f32.xlu0 %v542_v34 }
 0x1b0   : > { %621 = vmax.xlane.f32.xlu1 %v620_v35 }
 0x1b5   : > { %v695_v36 = vpop.f32.mrf.mxu1 }
 0x1b6   : > { %v698_v37 = vsel %vm229_vm2, %v695_v36, -inf }
 0x1b7   : > { %699 = vmax.xlane.f32.xlu2 %v698_v37 }
 0x1b8   : > { %v773_v38 = vpop.f32.mrf.mxu0 }
 0x1b9   : > { %v776_v39 = vsel %vm229_vm2, %v773_v38, -inf }
 0x1ba   : > { %777 = vmax.xlane.f32.xlu0 %v776_v39 }
 0x1ce   : > { %332 = vrot.lane.b32.xlu0 %v3159_v7, %s3939_s10  ;;  %s3955_s10 = smov 44  }
 0x1cf   : > { %410 = vrot.lane.b32.xlu2 %v3159_v7, %s3941_s11  ;;  %s3953_s11 = smov 36  }
 0x20d   : > { %v232_v40 = vpop.xlane.xlu0 %231 }
 0x20e   : > { %v233_v41 = vsub.f32 %v226_v24, %v232_v40 }
 0x210   : > { %v234_v42 = vmul.f32 1.442695, %v233_v41 }
 0x212   : > { %2863 = vpow2.f32 %v234_v42 }
 0x218   : > { %v3222_v43 = vpop.eup %2863 }
 0x219   : > { %v236_v44 = vsel %vm229_vm2, %v3222_v43, 0.0 }
 0x21a   : > { %v466_v45 = vpop.xlane.xlu2 %465  ;;  %237 = vadd.xlane.f32.xlu1 %v236_v44 }
 0x21b   : > { %v467_v46 = vsub.f32 %v461_v27, %v466_v45  ;;  %v310_v47 = vpop.xlane.xlu1 %309 }
 0x21c   : > { %v311_v48 = vsub.f32 %v305_v28, %v310_v47 }
 0x21d   : > { %v468_v49 = vmul.f32 1.442695, %v467_v46 }
 0x21e   : > { %v312_v50 = vmul.f32 1.442695, %v311_v48 }
 0x21f   : > { %2865 = vpow2.f32 %v468_v49 }
 0x220   : > { %2867 = vpow2.f32 %v312_v50 }
 0x222   : > { %v388_v51 = vpop.xlane.xlu2 %387  ;;  %v544_v52 = vpop.xlane.xlu0 %543 }
 0x223   : > { %v389_v53 = vsub.f32 %v383_v26, %v388_v51  ;;  %v622_v54 = vpop.xlane.xlu1 %621  ;;  %v545_v58 = vsub.f32 %v539_v31, %v544_v52 }
 0x224   : > { %v623_v55 = vsub.f32 %v617_v32, %v622_v54 }
 0x225   : > { %v3226_v56 = vpop.eup %2865  ;;  %v390_v57 = vmul.f32 1.442695, %v389_v53  ;;  %v546_v63 = vmul.f32 1.442695, %v545_v58 }
 0x226   : > { %v3228_v59 = vpop.eup %2867  ;;  %v624_v60 = vmul.f32 1.442695, %v623_v55  ;;  %v470_v61 = vsel %vm229_vm2, %v3226_v56, 0.0 }
 0x227   : > { %2869 = vpow2.f32 %v390_v57  ;;  %471 = vadd.xlane.f32.xlu1 %v470_v61  ;;  %v314_v62 = vsel %vm229_vm2, %v3228_v59, 0.0 }
 0x228   : > { %315 = vadd.xlane.f32.xlu2 %v314_v62  ;;  %2871 = vpow2.f32 %v624_v60 }
 0x229   : > { %2873 = vpow2.f32 %v546_v63 }
 0x22a   : > { %v700_v0 = vpop.xlane.xlu2 %699 }
 0x22b   : > { %v701_v8 = vsub.f32 %v695_v36, %v700_v0 }
 0x22d   : > { %v3234_v1 = vpop.eup %2869  ;;  %v778_v2 = vpop.xlane.xlu0 %777  ;;  %v702_v13 = vmul.f32 1.442695, %v701_v8 }
 0x22e   : > { %v779_v3 = vsub.f32 %v773_v38, %v778_v2  ;;  %v392_v5 = vsel %vm229_vm2, %v3234_v1, 0.0  ;;  %v3238_v6 = vpop.eup %2871 }
 0x22f   : > { %393 = vadd.xlane.f32.xlu0 %v392_v5  ;;  %v626_v10 = vsel %vm229_vm2, %v3238_v6, 0.0  ;;  %v3242_v12 = vpop.eup %2873 }
 0x230   : > { %v780_v9 = vmul.f32 1.442695, %v779_v3  ;;  %627 = vadd.xlane.f32.xlu1 %v626_v10  ;;  %v548_v14 = vsel %vm229_vm2, %v3242_v12, 0.0 }
 0x232   : > { %2875 = vpow2.f32 %v780_v9  ;;  %v411_v11 = vpop.permute.xlu2 %410 }
 0x233   : > { %431 = vmatpush.msrb.mxu3 %v411_v11  ;;  %2877 = vpow2.f32 %v702_v13 }
 0x237   : > { %549 = vadd.xlane.f32.xlu0 %v548_v14 }
 0x238   : > { %v3246_v15 = vpop.eup %2875 }
 0x239   : > { %v782_v16 = vsel %vm229_vm2, %v3246_v15, 0.0  ;;  %v3250_v17 = vpop.eup %2877 }
 0x23a   : > { %783 = vadd.xlane.f32.xlu1 %v782_v16  ;;  %v704_v19 = vsel %vm229_vm2, %v3250_v17, 0.0 }
 0x240   : > { %644 = vrot.lane.b32.xlu2 %v3159_v7, %s3955_s10  ;;  %v333_v18 = vpop.permute.xlu0 %332  ;;  %s3971_s10 = smov 12  }
 0x241   : > { %353 = vmatpush.msrb.mxu2 %v333_v18 }
 0x242   : > { %705 = vadd.xlane.f32.xlu1 %v704_v19 }
 0x248   : > { %800 = vrot.lane.b32.xlu2 %v3159_v7, %s3953_s11  ;;  %s3967_s11 = smov 16  }
 0x24b   : > { %566 = vrot.lane.b32.xlu0 %v3159_v7, %s3957_s6  ;;  %s3977_s6 = smov 20  }
 0x253   : > { %722 = vrot.lane.b32.xlu0 %v3159_v7, %s3949_s30  ;;  %s3961_s30 = smov 4  }
 0x25b   : > { %488 = vrot.lane.b32.xlu1 %v3159_v7, %s3951_s8  ;;  %s3963_s8 = smov 8  }
 0x28d   : > { %v238_v20 = vpop.xlane.xlu1 %237 }
 0x28e   : > { %2879 = vrcp.f32 %v238_v20  ;;  %v250_v25 = vand.u32 2147483648, %v238_v20  ;;  %v248_v28 = vand.u32 2147483647, %v238_v20  ;;  %vm244_vm4 = vweird.f32 %v238_v20 }
 0x290   : > { %v251_v30 = vor.u32 1.1754944e-38, %v250_v25  ;;  %vm249_vm6 = vcmp.eq.f32.partialorder %v248_v28, 8.507059e+37 }
 0x294   : > { %v2880_v21 = vpop.eup %2879 }
 0x295   : > { %v240_v22 = vmul.f32 %v2880_v21, %v238_v20  ;;  %vm245_vm3 = vweird.f32 %v2880_v21 }
 0x296   : > { %vm246_vm5 = vmor %vm244_vm4, %vm245_vm3 }
 0x297   : > { %v241_v23 = vsub.f32 1.0, %v240_v22 }
 0x299   : > { %v242_v24 = vmul.f32 %v2880_v21, %v241_v23 }
 0x29a   : > { %v3264_v26 = vpop.xlane.xlu1 %471 }
 0x29b   : > { %v316_v27 = vpop.xlane.xlu2 %315  ;;  %v243_v29 = vadd.f32 %v2880_v21, %v242_v24 }
 0x29c   : > { %2881 = vrcp.f32 %v316_v27  ;;  %v328_v41 = vand.u32 2147483648, %v316_v27  ;;  %v326_v42 = vand.u32 2147483647, %v316_v27  ;;  %vm322_vm8 = vweird.f32 %v316_v27 }
 0x29d   : > { %v247_v31 = vsel %vm246_vm5, %v2880_v21, %v243_v29 }
 0x29e   : > { %v252_v7 = vsel %vm249_vm6, %v251_v30, %v247_v31  ;;  %v329_v46 = vor.u32 1.1754944e-38, %v328_v41  ;;  %vm327_vm10 = vcmp.eq.f32.partialorder %v326_v42, 8.507059e+37  ;;  %v484_v31 = vand.u32 2147483648, %v3264_v26 }
 0x29f   : > { %v253_v32 = vmul.f32 %v3222_v43, %v252_v7 }
 0x2a0   : > { %v485_v42 = vor.u32 1.1754944e-38, %v484_v31  ;;  %v3065_v31 = vmov 32.0  }
 0x2a1   : > { %2692 = vmatmul.msk.f32.vlgmr.msra.gmra.mxu2 %vm229_vm2, %v253_v32  ;;  %v482_v32 = vand.u32 2147483647, %v3264_v26 }
 0x2a2   : > { %v2882_v33 = vpop.eup %2881  ;;  %v394_v34 = vpop.xlane.xlu0 %393 }
 0x2a3   : > { %v318_v35 = vmul.f32 %v2882_v33, %v316_v27  ;;  %2883 = vrcp.f32 %v394_v34  ;;  %v3268_v37 = vpop.xlane.xlu1 %627  ;;  %vm323_vm7 = vweird.f32 %v2882_v33  ;;  %v406_v47 = vand.u32 2147483648, %v394_v34 }
 0x2a4   : > { %vm324_vm9 = vmor %vm322_vm8, %vm323_vm7  ;;  %v404_v51 = vand.u32 2147483647, %v394_v34  ;;  %vm400_vm12 = vweird.f32 %v394_v34 }
 0x2a5   : > { %v319_v36 = vsub.f32 1.0, %v318_v35  ;;  %v407_v57 = vor.u32 1.1754944e-38, %v406_v47  ;;  %v645_v35 = vpop.permute.xlu2 %644 }
 0x2a6   : > { %vm405_vm14 = vcmp.eq.f32.partialorder %v404_v51, 8.507059e+37 }
 0x2a7   : > { %v320_v38 = vmul.f32 %v2882_v33, %v319_v36 }
 0x2a9   : > { %v2884_v39 = vpop.eup %2883  ;;  %v321_v40 = vadd.f32 %v2882_v33, %v320_v38 }
 0x2aa   : > { %v396_v44 = vmul.f32 %v2884_v39, %v394_v34  ;;  %v550_v45 = vpop.xlane.xlu0 %549  ;;  %vm401_vm11 = vweird.f32 %v2884_v39 }
 0x2ab   : > { %2885 = vrcp.f32 %v550_v45  ;;  %v325_v49 = vsel %vm324_vm9, %v2882_v33, %v321_v40  ;;  %vm402_vm13 = vmor %vm400_vm12, %vm401_vm11  ;;  %v562_v2 = vand.u32 2147483648, %v550_v45  ;;  %vm556_vm3 = vweird.f32 %v550_v45 }
 0x2ac   : > { %v397_v43 = vsub.f32 1.0, %v396_v44  ;;  %2887 = vrcp.f32 %v3264_v26  ;;  %v330_v52 = vsel %vm327_vm10, %v329_v46, %v325_v49  ;;  %vm478_vm10 = vweird.f32 %v3264_v26 }
 0x2ad   : > { %v3271_v48 = vpop.xlane.xlu1 %783  ;;  %v331_v54 = vmul.f32 %v3228_v59, %v330_v52  ;;  %2889 = vrcp.f32 %v3268_v37  ;;  %v560_v59 = vand.u32 2147483647, %v550_v45  ;;  %v563_v10 = vor.u32 1.1754944e-38, %v562_v2  ;;  %v801_v52 = vpop.permute.xlu2 %800 }
 0x2ae   : > { %v398_v50 = vmul.f32 %v2884_v39, %v397_v43  ;;  %v640_v43 = vand.u32 2147483648, %v3268_v37  ;;  %v638_v46 = vand.u32 2147483647, %v3268_v37 }
 0x2af   : > { %2695 = vmatmul.msk.f32.vlgmr.msrb.gmra.mxu2 %vm229_vm2, %v331_v54  ;;  %vm561_vm5 = vcmp.eq.f32.partialorder %v560_v59, 8.507059e+37  ;;  %v173_v59 = vld [vmem:[%s3936_s1 + $0x30] sm:$0xff] }
 0x2b0   : > { %v399_v53 = vadd.f32 %v2884_v39, %v398_v50  ;;  %v641_v51 = vor.u32 1.1754944e-38, %v640_v43  ;;  %v938_v43 = vld [vmem:[%s3936_s1 + $0x98] sm:$0xff] }
 0x2b1   : > { %v2886_v55 = vpop.eup %2885  ;;  %978 = vmatpush.msra.mxu0 %v938_v43 }
 0x2b2   : > { %v552_v58 = vmul.f32 %v2886_v55, %v550_v45  ;;  %v403_v60 = vsel %vm402_vm13, %v2884_v39, %v399_v53  ;;  %v3275_v61 = vpop.eup %2887  ;;  %vm557_vm15 = vweird.f32 %v2886_v55  ;;  %vm483_vm13 = vcmp.eq.f32.partialorder %v482_v32, 8.507059e+37 }
 0x2b3   : > { %v408_v62 = vsel %vm405_vm14, %v407_v57, %v403_v60  ;;  %v474_v8 = vmul.f32 %v3275_v61, %v3264_v26  ;;  %vm558_vm4 = vmor %vm556_vm3, %vm557_vm15  ;;  %vm479_vm7 = vweird.f32 %v3275_v61  ;;  %vm634_vm15 = vweird.f32 %v3268_v37 }
 0x2b4   : > { %v553_v63 = vsub.f32 1.0, %v552_v58  ;;  %v409_v0 = vmul.f32 %v3234_v1, %v408_v62  ;;  %v3282_v1 = vpop.eup %2889  ;;  %vm480_vm12 = vmor %vm478_vm10, %vm479_vm7  ;;  %vm858_vm10 = vcmask 130048  }
 0x2b5   : > { %v706_v3 = vpop.xlane.xlu1 %705  ;;  %v475_v13 = vsub.f32 1.0, %v474_v8  ;;  %v630_v22 = vmul.f32 %v3282_v1, %v3268_v37  ;;  %vm635_vm14 = vweird.f32 %v3282_v1  ;;  %v796_v37 = vand.u32 2147483648, %v3271_v48  ;;  %v172_v8 = vld [vmem:[%s3936_s1 + $0x28] sm:$0xff] }
 0x2b6   : > { %v554_v5 = vmul.f32 %v2886_v55, %v553_v63  ;;  %2891 = vrcp.f32 %v706_v3  ;;  %2698 = vmatmul.msk.f32.vlgmr.msrb.gmra.mxu3 %vm229_vm2, %v409_v0  ;;  %v718_v24 = vand.u32 2147483648, %v706_v3  ;;  %v716_v27 = vand.u32 2147483647, %v706_v3  ;;  %vm636_vm3 = vmor %vm634_vm15, %vm635_vm14 }
 0x2b7   : > { %2893 = vrcp.f32 %v3271_v48  ;;  %v476_v21 = vmul.f32 %v3275_v61, %v475_v13  ;;  %v631_v28 = vsub.f32 1.0, %v630_v22  ;;  %vm712_vm8 = vweird.f32 %v706_v3 }
 0x2b8   : > { %v555_v9 = vadd.f32 %v2886_v55, %v554_v5  ;;  %v719_v7 = vor.u32 1.1754944e-38, %v718_v24  ;;  %vm717_vm11 = vcmp.eq.f32.partialorder %v716_v27, 8.507059e+37  ;;  %v797_v58 = vor.u32 1.1754944e-38, %v796_v37  ;;  %v174_v5 = vld [vmem:[%s3936_s1 + $0x38] sm:$0xff]  ;;  %v2846_v27 = vld [vmem:[%s3937_s2 + $0x1] ss:$0 sm:$0xff] }
 0x2b9   : > { %v632_v39 = vmul.f32 %v3282_v1, %v631_v28  ;;  %882 = vmatpush.msra.mxu1 %v174_v5  ;;  %2895 = vrcp.f32 %v3065_v31 }
 0x2ba   : > { %v559_v11 = vsel %vm558_vm4, %v2886_v55, %v555_v9  ;;  %vm639_vm4 = vcmp.eq.f32.partialorder %v638_v46, 8.507059e+37  ;;  %v171_v9 = vld [vmem:[%s3936_s1 + $0x20] sm:$0xff]  ;;  %v937_v46 = vld [vmem:[%s3936_s1 + $0x90] sm:$0xff] }
 0x2bb   : > { %v564_v14 = vsel %vm561_vm5, %v563_v10, %v559_v11  ;;  %v633_v44 = vadd.f32 %v3282_v1, %v632_v39  ;;  %883 = vmatpush.msra.mxu1 %v173_v59  ;;  %979 = vmatpush.msra.mxu0 %v937_v46 }
 0x2bc   : > { %v2892_v16 = vpop.eup %2891  ;;  %v565_v18 = vmul.f32 %v3242_v12, %v564_v14  ;;  %v477_v12 = vadd.f32 %v3275_v61, %v476_v21 }
 0x2bd   : > { %v708_v19 = vmul.f32 %v2892_v16, %v706_v3  ;;  %v567_v20 = vpop.permute.xlu0 %566  ;;  %vm713_vm6 = vweird.f32 %v2892_v16  ;;  %v2894_v30 = vpop.eup %2893  ;;  %884 = vmatpush.msra.mxu1 %v172_v8  ;;  %v2850_v8 = vld [vmem:[%s3937_s2 + $0x5] ss:$0 sm:$0xff] }
 0x2be   : > { %587 = vmatpush.msra.mxu3 %v567_v20  ;;  %vm714_vm9 = vmor %vm712_vm8, %vm713_vm6  ;;  %v481_v38 = vsel %vm480_vm12, %v3275_v61, %v477_v12  ;;  %v786_v40 = vmul.f32 %v2894_v30, %v3271_v48  ;;  %vm791_vm5 = vweird.f32 %v2894_v30  ;;  %vm790_vm6 = vweird.f32 %v3271_v48 }
 0x2bf   : > { %v709_v23 = vsub.f32 1.0, %v708_v19  ;;  %2704 = vmatmul.msk.f32.vlgmr.msra.gmra.mxu3 %vm229_vm2, %v565_v18  ;;  %v486_v26 = vsel %vm483_vm13, %v485_v42, %v481_v38  ;;  %vm792_vm7 = vmor %vm790_vm6, %vm791_vm5  ;;  %885 = vmatpush.msra.mxu1 %v171_v9  ;;  %vm862_vm12 = vcmask 195584   ;;  %vm864_vm13 = vcmask 228352   ;;  %v929_v42 = vld [vmem:[%s3936_s1 + $0x58] sm:$0xff] }
 0x2c0   : > { %v787_v45 = vsub.f32 1.0, %v786_v40  ;;  %v487_v49 = vmul.f32 %v3226_v56, %v486_v26  ;;  %v794_v56 = vand.u32 2147483647, %v3271_v48  ;;  %v928_v26 = vld [vmem:[%s3936_s1 + $0x50] sm:$0xff]  ;;  %vm3988_vm5 = vcmask 523264  }
 0x2c1   : > { %v710_v25 = vmul.f32 %v2892_v16, %v709_v23 }
 0x2c2   : > { %v788_v50 = vmul.f32 %v2894_v30, %v787_v45  ;;  %vm795_vm8 = vcmp.eq.f32.partialorder %v794_v56, 8.507059e+37  ;;  %v926_v45 = vld [vmem:[%s3936_s1 + $0x40] sm:$0xff] }
 0x2c3   : > { %v711_v29 = vadd.f32 %v2892_v16, %v710_v25 }
 0x2c4   : > { %v789_v54 = vadd.f32 %v2894_v30, %v788_v50  ;;  %v935_v50 = vld [vmem:[%s3936_s1 + $0x80] sm:$0xff] }
 0x2c5   : > { %v715_v33 = vsel %vm714_vm9, %v2892_v16, %v711_v29  ;;  %v723_v34 = vpop.permute.xlu0 %722  ;;  %vm856_vm9 = vcmask 97280  }
 0x2c6   : > { %v720_v36 = vsel %vm717_vm11, %v719_v7, %v715_v33  ;;  %743 = vmatpush.msrb.mxu3 %v723_v34  ;;  %v793_v57 = vsel %vm792_vm7, %v2894_v30, %v789_v54  ;;  %vm860_vm11 = vcmask 162816   ;;  %v2896_v7 = vpop.eup %2895 }
 0x2c7   : > { %v721_v41 = vmul.f32 %v3250_v17, %v720_v36  ;;  %v637_v17 = vsel %vm636_vm3, %v3282_v1, %v633_v44  ;;  %v798_v60 = vsel %vm795_vm8, %v797_v58, %v793_v57  ;;  %v897_v32 = vmul.f32 32.0, %v2896_v7  ;;  %v927_v44 = vld [vmem:[%s3936_s1 + $0x48] sm:$0xff]  ;;  %v2847_v58 = vld [vmem:[%s3937_s2 + $0x2] ss:$0 sm:$0xff] }
 0x2c8   : > { %v642_v53 = vsel %vm639_vm4, %v641_v51, %v637_v17  ;;  %v799_v61 = vmul.f32 %v3246_v15, %v798_v60  ;;  %vm901_vm14 = vweird.f32 %v2896_v7  ;;  %956 = vmatpush.msra.mxu3 %v929_v42 }
 0x2c9   : > { %2710 = vmatmul.msk.f32.vlgmr.msrb.gmra.mxu3 %vm229_vm2, %v721_v41  ;;  %v643_v55 = vmul.f32 %v3238_v6, %v642_v53  ;;  %v898_v33 = vsub.f32 1.0, %v897_v32  ;;  %v2851_v32 = vld [vmem:[%s3937_s2 + $0x6] ss:$0 sm:$0xff] }
 0x2ca   : > { %957 = vmatpush.msra.mxu3 %v928_v26 }
 0x2cb   : > { %v899_v34 = vmul.f32 %v2896_v7, %v898_v33 }
 0x2cc   : > { %958 = vmatpush.msra.mxu3 %v927_v44 }
 0x2cd   : > { %v489_v47 = vpop.permute.xlu1 %488 }
 0x2ce   : > { %509 = vmatpush.msra.mxu2 %v489_v47  ;;  %959 = vmatpush.msra.mxu3 %v926_v45  ;;  %v936_v47 = vld [vmem:[%s3936_s1 + $0x88] sm:$0xff] }
 0x2cf   : > { %2701 = vmatmul.msk.f32.vlgmr.msra.gmra.mxu2 %vm229_vm2, %v487_v49  ;;  %980 = vmatpush.msra.mxu0 %v936_v47 }
 0x2d0   : > { %665 = vmatpush.msrb.mxu2 %v645_v35  ;;  %v900_v35 = vadd.f32 %v2896_v7, %v899_v34 }
 0x2d1   : > { %981 = vmatpush.msra.mxu0 %v935_v50 }
 0x2d2   : > { %821 = vmatpush.msra.mxu2 %v801_v52  ;;  %v3347_v36 = vsel %vm901_vm14, %v2896_v7, %v900_v35  ;;  %v934_v52 = vld [vmem:[%s3936_s1 + $0x78] sm:$0xff]  ;;  %v2852_v35 = vld [vmem:[%s3937_s2 + $0x7] ss:$0 sm:$0xff] }
 0x2d3   : > { %982 = vmatpush.msra.mxu0 %v934_v52 }
 0x2d7   : > { %2707 = vmatmul.msk.f32.vlgmr.msrb.gmra.mxu2 %vm229_vm2, %v643_v55 }
 0x2df   : > { %2713 = vmatmul.msk.f32.vlgmr.msra.gmra.mxu2 %vm229_vm2, %v799_v61 }
 0x324   : > { %v277_v62 = vpop.f32.mrf.mxu2 }
 0x332   : > { %v355_v63 = vpop.f32.mrf.mxu2 }
 0x333   : > { %827 = vrot.lane.b32.xlu0 %v355_v63, %s3961_s30  ;;  %s3979_s30 = smov 28  }
 0x339   : > { %v433_v0 = vpop.f32.mrf.mxu3 }
 0x33a   : > { %831 = vrot.lane.b32.xlu2 %v433_v0, %s3963_s8  ;;  %s4025_s8 = smov 100  }
 0x342   : > { %v589_v6 = vpop.f32.mrf.mxu3 }
 0x343   : > { %839 = vrot.lane.b32.xlu0 %v589_v6, %s3967_s11  ;;  %v933_v6 = vld [vmem:[%s3936_s1 + $0x70] sm:$0xff]  ;;  %s4027_s11 = smov 60  }
 0x344   : > { %983 = vmatpush.msra.mxu0 %v933_v6 }
 0x34c   : > { %v745_v15 = vpop.f32.mrf.mxu3 }
 0x352   : > { %v511_v48 = vpop.f32.mrf.mxu2 }
 0x353   : > { %835 = vrot.lane.b32.xlu1 %v511_v48, %s3971_s10  ;;  %v932_v48 = vld [vmem:[%s3936_s1 + $0x68] sm:$0xff]  ;;  %s4026_s10 = smov 56  }
 0x354   : > { %984 = vmatpush.msra.mxu0 %v932_v48 }
 0x35a   : > { %v667_v2 = vpop.f32.mrf.mxu2 }
 0x35b   : > { %843 = vrot.lane.b32.xlu2 %v667_v2, %s3977_s6  ;;  %847 = vrot.lane.b32.xlu1 %v745_v15, %s3975_s5  ;;  %v931_v15 = vld [vmem:[%s3936_s1 + $0x60] sm:$0xff]  ;;  %s4023_s5 = smov 68   ;;  %s4024_s6 = smov 72  }
 0x35c   : > { %985 = vmatpush.msra.mxu0 %v931_v15  ;;  %v2849_v2 = vld [vmem:[%s3937_s2 + $0x4] ss:$0 sm:$0xff] }
 0x362   : > { %v823_v3 = vpop.f32.mrf.mxu2 }
 0x363   : > { %851 = vrot.lane.b32.xlu0 %v823_v3, %s3979_s30  ;;  %s4018_s30 = smov 104  }
 0x394   : > { %v832_v13 = vpop.permute.xlu2 %831 }
 0x3a5   : > { %v828_v10 = vpop.permute.xlu0 %827 }
 0x3a6   : > { %v854_v1 = vsel %vm204_vm1, %v277_v62, %v828_v10  ;;  %v2848_v62 = vld [vmem:[%s3937_s2 + $0x3] ss:$0 sm:$0xff] }
 0x3a7   : > { %v855_v16 = vsel %vm229_vm2, %v854_v1, %v832_v13 }
 0x3b5   : > { %v840_v14 = vpop.permute.xlu0 %839  ;;  %v844_v21 = vpop.permute.xlu2 %843 }
 0x3c5   : > { %v836_v11 = vpop.permute.xlu1 %835 }
 0x3c6   : > { %v857_v18 = vsel %vm856_vm9, %v855_v16, %v836_v11 }
 0x3c7   : > { %v859_v19 = vsel %vm858_vm10, %v857_v18, %v840_v14 }
 0x3c8   : > { %v861_v22 = vsel %vm860_vm11, %v859_v19, %v844_v21  ;;  %v1021_v21 = vld [vmem:[%s3936_s1 + $0xb0] sm:$0xff] }
 0x3cd   : > { %v848_v20 = vpop.permute.xlu1 %847 }
 0x3ce   : > { %v863_v23 = vsel %vm862_vm12, %v861_v22, %v848_v20  ;;  %v1022_v20 = vld [vmem:[%s3936_s1 + $0xb8] sm:$0xff]  ;;  %v1020_v22 = vld [vmem:[%s3936_s1 + $0xa8] sm:$0xff] }
 0x3cf   : > { %1045 = vmatpush.msrb.mxu2 %v1022_v20 }
 0x3d1   : > { %1046 = vmatpush.msrb.mxu2 %v1021_v21 }
 0x3d3   : > { %1047 = vmatpush.msrb.mxu2 %v1020_v22 }
 0x3d5   : > { %v852_v24 = vpop.permute.xlu0 %851 }
 0x3d6   : > { %v865_v25 = vsel %vm864_vm13, %v863_v23, %v852_v24  ;;  %v1019_v23 = vld [vmem:[%s3936_s1 + $0xa0] sm:$0xff] }
 0x3d7   : > { %2714 = vmatmul.msk.f32.vlgmr.msra.gmra.mxu1 %vm3989_vm0, %v865_v25  ;;  %1048 = vmatpush.msrb.mxu2 %v1019_v23 }
 0x454   : > { %v887_v12 = vpop.f32.mrf.mxu1 }
 0x455   : > { %v888_v28 = vadd.f32 %v2846_v27, %v887_v12 }
 0x457   : > { %v890_v29 = vadd.f32 %v888_v28, %v3152_v4 }
 0x459   : > { %v893_v30 = vsel %vm3989_vm0, %v890_v29, 0.0 }
 0x45a   : > { %894 = vadd.xlane.f32.xlu2 %v893_v30 }
 0x4cd   : > { %v895_v38 = vpop.xlane.xlu2 %894 }
 0x4ce   : > { %v903_v39 = vmul.f32 %v3347_v36, %v895_v38 }
 0x4d0   : > { %v904_v40 = vsub.f32 %v890_v29, %v903_v39 }
 0x4d2   : > { %v905_v41 = vmul.f32 %v904_v40, %v904_v40 }
 0x4d4   : > { %v906_v4 = vsel %vm3989_vm0, %v905_v41, 0.0 }
 0x4d5   : > { %907 = vadd.xlane.f32.xlu1 %v906_v4 }
 0x548   : > { %v908_v49 = vpop.xlane.xlu1 %907 }
 0x549   : > { %v909_v17 = vmul.f32 %v908_v49, %v3347_v36 }
 0x54b   : > { %v910_v51 = vadd.f32 1e-05, %v909_v17 }
 0x54d   : > { %2897 = vrsqrt.f32 %v910_v51  ;;  %vm917_vm3 = vweird.f32 %v910_v51 }
 0x553   : > { %v2898_v53 = vpop.eup %2897 }
 0x554   : > { %v912_v54 = vmul.f32 %v2898_v53, %v910_v51  ;;  %vm918_vm15 = vweird.f32 %v2898_v53 }
 0x555   : > { %vm919_vm4 = vmor %vm917_vm3, %vm918_vm15 }
 0x556   : > { %v913_v37 = vmul.f32 %v2898_v53, %v912_v54 }
 0x558   : > { %v914_v56 = vmul.f32 0.5, %v913_v37 }
 0x55a   : > { %v915_v55 = vsub.f32 1.5, %v914_v56 }
 0x55c   : > { %v916_v57 = vmul.f32 %v2898_v53, %v915_v55 }
 0x55e   : > { %v920_v60 = vsel %vm919_vm4, %v2898_v53, %v916_v57 }
 0x55f   : > { %v921_v61 = vmul.f32 %v920_v60, %v904_v40  ;;  %v2853_v40 = vld [vmem:[%s3937_s2 + $0x8] ss:$0 sm:$0xff] }
 0x561   : > { %v923_v63 = vmul.f32 %v2847_v58, %v921_v61 }
 0x563   : > { %v925_v0 = vadd.f32 %v2848_v62, %v923_v63 }
 0x565   : > { %2715 = vmatmul.msk.f32.vlgmr.msra.gmra.mxu3 %vm3989_vm0, %v925_v0 }
 0x5e8   : > { %v961_v3 = vpop.f32.mrf.mxu3 }
 0x5e9   : > { %v962_v5 = vadd.f32 %v2849_v2, %v961_v3 }
 0x5eb   : > { %v964_v59 = vmax.f32 %v962_v5, 0.0 }
 0x5ed   : > { %2716 = vmatmul.msk.f32.vlgmr.msra.gmra.mxu0 %vm3988_vm5, %v964_v59 }
 0x66a   : > { %v987_v9 = vpop.f32.mrf.mxu0 }
 0x66b   : > { %v988_v10 = vadd.f32 %v2850_v8, %v987_v9 }
 0x66d   : > { %v990_v11 = vadd.f32 %v988_v10, %v925_v0 }
 0x66f   : > { %v993_v1 = vsel %vm3989_vm0, %v990_v11, 0.0 }
 0x670   : > { %994 = vadd.xlane.f32.xlu0 %v993_v1 }
 0x6e3   : > { %v995_v13 = vpop.xlane.xlu0 %994 }
 0x6e4   : > { %v996_v14 = vmul.f32 %v995_v13, %v3347_v36 }
 0x6e6   : > { %v997_v16 = vsub.f32 %v990_v11, %v996_v14 }
 0x6e8   : > { %v998_v18 = vmul.f32 %v997_v16, %v997_v16 }
 0x6ea   : > { %v999_v19 = vsel %vm3989_vm0, %v998_v18, 0.0 }
 0x6eb   : > { %1000 = vadd.xlane.f32.xlu2 %v999_v19 }
 0x75e   : > { %v1001_v24 = vpop.xlane.xlu2 %1000 }
 0x75f   : > { %v1002_v25 = vmul.f32 %v1001_v24, %v3347_v36 }
 0x761   : > { %v1003_v27 = vadd.f32 1e-05, %v1002_v25 }
 0x763   : > { %2899 = vrsqrt.f32 %v1003_v27  ;;  %vm1010_vm7 = vweird.f32 %v1003_v27 }
 0x769   : > { %v2900_v12 = vpop.eup %2899 }
 0x76a   : > { %v1005_v28 = vmul.f32 %v2900_v12, %v1003_v27  ;;  %vm1011_vm6 = vweird.f32 %v2900_v12 }
 0x76b   : > { %vm1012_vm8 = vmor %vm1010_vm7, %vm1011_vm6 }
 0x76c   : > { %v1006_v29 = vmul.f32 %v2900_v12, %v1005_v28 }
 0x76e   : > { %v1007_v30 = vmul.f32 0.5, %v1006_v29 }
 0x770   : > { %v1008_v31 = vsub.f32 1.5, %v1007_v30 }
 0x772   : > { %v1009_v7 = vmul.f32 %v2900_v12, %v1008_v31 }
 0x774   : > { %v1013_v33 = vsel %vm1012_vm8, %v2900_v12, %v1009_v7 }
 0x775   : > { %v1014_v34 = vmul.f32 %v1013_v33, %v997_v16 }
 0x777   : > { %v1016_v38 = vmul.f32 %v2851_v32, %v1014_v34 }
 0x779   : > { %v3424_v39 = vadd.f32 %v2852_v35, %v1016_v38 }
 0x77b   : > { %2717 = vmatmul.msk.f32.vlgmr.msrb.gmra.mxu2 %vm3989_vm0, %v3424_v39 }
 0x7fe   : > { %v1050_v41 = vpop.f32.mrf.mxu2 }
 0x7ff   : > { %v3431_v4 = vadd.f32 %v2853_v40, %v1050_v41 }
 0x801   : > { %1104 = vrot.lane.b32.xlu2 %v3431_v4, %s3992_s9  ;;  %1054 = vrot.lane.b32.xlu1 %v3431_v4, %s3991_s20  ;;  %s4038_s20 = smov 12   ;;  %s4039_s9 = smov 8  }
 0x809   : > { %1208 = vrot.lane.b32.xlu2 %v3431_v4, %s3987_s24  ;;  %1130 = vrot.lane.b32.xlu1 %v3431_v4, %s3990_s19  ;;  %s4032_s24 = smov 40   ;;  %s4037_s19 = smov 4  }
 0x811   : > { %1444 = vrot.lane.b32.xlu2 %v3431_v4, %s3986_s27  ;;  %1288 = vrot.lane.b32.xlu1 %v3431_v4, %s3985_s17  ;;  %s4030_s17 = smov 36   ;;  %s4031_s27 = smov 52  }
 0x819   : > { %1366 = vrot.lane.b32.xlu1 %v3431_v4, %s3984_s28  ;;  %s4029_s28 = smov 44  }
 0x821   : > { %1442 = vrot.lane.b32.xlu1 %v3431_v4, %s3983_s4  ;;  %s4028_s4 = smov 48  }
 0x829   : > { %1520 = vrot.lane.b32.xlu1 %v3431_v4, %s4018_s30 }
 0x85b   : > { %v1105_v42 = vpop.permute.xlu2 %1104 }
 0x85c   : > { %1125 = vmatpush.msrb.mxu3 %v1105_v42 }
 0x863   : > { %v1209_v51 = vpop.permute.xlu2 %1208 }
 0x86b   : > { %v1445_v54 = vpop.permute.xlu2 %1444 }
 0x873   : > { %v1055_v26 = vpop.permute.xlu1 %1054 }
 0x874   : > { %2718 = vmatpush.xpose.msk.msrb.mxu1 %vm204_vm1, %v1055_v26 }
 0x877   : > { %2719 = vmatmul.msk.f32.vlgmr.msrb.gmra.mxu1 %vm204_vm1, %v3431_v4 }
 0x87b   : > { %v1131_v49 = vpop.permute.xlu1 %1130 }
 0x883   : > { %v1289_v53 = vpop.permute.xlu1 %1288 }
 0x88b   : > { %v1367_v56 = vpop.permute.xlu1 %1366 }
 0x893   : > { %v1443_v57 = vpop.permute.xlu1 %1442 }
 0x89b   : > { %v1521_v16 = vpop.permute.xlu1 %1520 }
 0x8f4   : > { %v1077_v44 = vpop.f32.mrf.mxu1 }
 0x8f5   : > { %v1080_v45 = vsel %vm229_vm2, %v1077_v44, -inf }
 0x8f6   : > { %1081 = vmax.xlane.f32.xlu0 %v1080_v45 }
 0x90a   : > { %1132 = vrot.lane.b32.xlu0 %v3431_v4, %s4019_s7 }
 0x912   : > { %1210 = vrot.lane.b32.xlu0 %v3431_v4, %s4020_s25 }
 0x91a   : > { %1286 = vrot.lane.b32.xlu0 %v3431_v4, %s4021_s26 }
 0x922   : > { %1364 = vrot.lane.b32.xlu0 %v3431_v4, %s4022_s29 }
 0x92a   : > { %1600 = vrot.lane.b32.xlu0 %v3431_v4, %s4023_s5 }
 0x969   : > { %v1082_v43 = vpop.xlane.xlu0 %1081 }
 0x96a   : > { %v1083_v46 = vsub.f32 %v1077_v44, %v1082_v43 }
 0x96c   : > { %v1084_v47 = vmul.f32 1.442695, %v1083_v46 }
 0x96e   : > { %2901 = vpow2.f32 %v1084_v47 }
 0x974   : > { %v2902_v17 = vpop.eup %2901 }
 0x975   : > { %v1086_v50 = vsel %vm229_vm2, %v2902_v17, 0.0 }
 0x976   : > { %1087 = vadd.xlane.f32.xlu2 %v1086_v50 }
 0x97c   : > { %v1133_v52 = vpop.permute.xlu0 %1132 }
 0x97d   : > { %2721 = vmatpush.xpose.msk.msra.mxu2 %vm204_vm1, %v1133_v52 }
 0x980   : > { %2722 = vmatmul.msk.f32.vlgmr.msra.gmra.mxu2 %vm204_vm1, %v1131_v49 }
 0x981   : > { %2727 = vmatpush.xpose.msk.msrb.mxu2 %vm204_vm1, %v1289_v53 }
 0x984   : > { %v1211_v37 = vpop.permute.xlu0 %1210 }
 0x985   : > { %2733 = vmatpush.xpose.msk.msra.mxu2 %vm204_vm1, %v1445_v54  ;;  %2724 = vmatpush.xpose.msk.msra.mxu3 %vm204_vm1, %v1211_v37 }
 0x98c   : > { %v1287_v55 = vpop.permute.xlu0 %1286 }
 0x98d   : > { %2728 = vmatmul.msk.f32.vlgmr.msrb.gmra.mxu2 %vm204_vm1, %v1287_v55 }
 0x98e   : > { %1522 = vrot.lane.b32.xlu2 %v3431_v4, %s4024_s6 }
 0x994   : > { %v1365_v58 = vpop.permute.xlu0 %1364 }
 0x995   : > { %2734 = vmatmul.msk.f32.vlgmr.msra.gmra.mxu2 %vm204_vm1, %v1443_v57 }
 0x996   : > { %1598 = vrot.lane.b32.xlu2 %v3431_v4, %s4025_s8 }
 0x99c   : > { %v1601_v60 = vpop.permute.xlu0 %1600 }
 0x99d   : > { %2739 = vmatpush.xpose.msk.msrb.mxu2 %vm204_vm1, %v1601_v60 }
 0x9e9   : > { %v1088_v61 = vpop.xlane.xlu2 %1087 }
 0x9ea   : > { %2903 = vrcp.f32 %v1088_v61  ;;  %v1100_v48 = vand.u32 2147483648, %v1088_v61  ;;  %v1098_v2 = vand.u32 2147483647, %v1088_v61  ;;  %vm1094_vm15 = vweird.f32 %v1088_v61 }
 0x9ec   : > { %v1101_v5 = vor.u32 1.1754944e-38, %v1100_v48  ;;  %vm1099_vm4 = vcmp.eq.f32.partialorder %v1098_v2, 8.507059e+37 }
 0x9f0   : > { %v2904_v62 = vpop.eup %2903 }
 0x9f1   : > { %v1090_v63 = vmul.f32 %v2904_v62, %v1088_v61  ;;  %v1523_v0 = vpop.permute.xlu2 %1522  ;;  %vm1095_vm14 = vweird.f32 %v2904_v62 }
 0x9f2   : > { %vm1096_vm3 = vmor %vm1094_vm15, %vm1095_vm14 }
 0x9f3   : > { %v1091_v6 = vsub.f32 1.0, %v1090_v63 }
 0x9f5   : > { %v1092_v15 = vmul.f32 %v2904_v62, %v1091_v6 }
 0x9f7   : > { %v1093_v3 = vadd.f32 %v2904_v62, %v1092_v15 }
 0x9f9   : > { %v1097_v59 = vsel %vm1096_vm3, %v2904_v62, %v1093_v3  ;;  %v1599_v8 = vpop.permute.xlu2 %1598 }
 0x9fa   : > { %v1102_v9 = vsel %vm1099_vm4, %v1101_v5, %v1097_v59  ;;  %2740 = vmatmul.msk.f32.vlgmr.msrb.gmra.mxu2 %vm204_vm1, %v1599_v8 }
 0x9fb   : > { %v1103_v10 = vmul.f32 %v2902_v17, %v1102_v9 }
 0x9fd   : > { %2720 = vmatmul.msk.f32.vlgmr.msrb.gmra.mxu3 %vm229_vm2, %v1103_v10 }
 0x9fe   : > { %2730 = vmatpush.xpose.msk.msrb.mxu3 %vm204_vm1, %v1367_v56 }
 0xa03   : > { %v1155_v11 = vpop.f32.mrf.mxu2 }
 0xa04   : > { %v1158_v1 = vsel %vm229_vm2, %v1155_v11, -inf }
 0xa05   : > { %2725 = vmatmul.msk.f32.vlgmr.msra.gmra.mxu3 %vm204_vm1, %v1209_v51  ;;  %1159 = vmax.xlane.f32.xlu0 %v1158_v1 }
 0xa06   : > { %2736 = vmatpush.xpose.msk.msra.mxu3 %vm204_vm1, %v1523_v0 }
 0xa0d   : > { %2731 = vmatmul.msk.f32.vlgmr.msrb.gmra.mxu3 %vm204_vm1, %v1365_v58 }
 0xa10   : > { %v1311_v13 = vpop.f32.mrf.mxu2 }
 0xa11   : > { %v1314_v14 = vsel %vm229_vm2, %v1311_v13, -inf }
 0xa12   : > { %1315 = vmax.xlane.f32.xlu2 %v1314_v14 }
 0xa15   : > { %2737 = vmatmul.msk.f32.vlgmr.msra.gmra.mxu3 %vm204_vm1, %v1521_v16 }
 0xa18   : > { %v1467_v18 = vpop.f32.mrf.mxu2 }
 0xa19   : > { %v1470_v19 = vsel %vm229_vm2, %v1467_v18, -inf }
 0xa1a   : > { %1471 = vmax.xlane.f32.xlu1 %v1470_v19 }
 0xa78   : > { %v1160_v20 = vpop.xlane.xlu0 %1159 }
 0xa79   : > { %v1161_v21 = vsub.f32 %v1155_v11, %v1160_v20 }
 0xa7b   : > { %v1162_v23 = vmul.f32 1.442695, %v1161_v21 }
 0xa7d   : > { %2905 = vpow2.f32 %v1162_v23  ;;  %v1623_v35 = vpop.f32.mrf.mxu2 }
 0xa7e   : > { %v1626_v40 = vsel %vm229_vm2, %v1623_v35, -inf }
 0xa80   : > { %v3488_v22 = vpop.f32.mrf.mxu3 }
 0xa83   : > { %v3491_v28 = vpop.eup %2905 }
 0xa84   : > { %v1164_v33 = vsel %vm229_vm2, %v3491_v28, 0.0 }
 0xa85   : > { %v1316_v27 = vpop.xlane.xlu2 %1315 }
 0xa86   : > { %v1317_v30 = vsub.f32 %v1311_v13, %v1316_v27 }
 0xa88   : > { %v1233_v24 = vpop.f32.mrf.mxu3  ;;  %v1318_v34 = vmul.f32 1.442695, %v1317_v30 }
 0xa89   : > { %v1236_v25 = vsel %vm229_vm2, %v1233_v24, -inf }
 0xa8a   : > { %1237 = vmax.xlane.f32.xlu1 %v1236_v25 }
 0xa8d   : > { %v1472_v12 = vpop.xlane.xlu1 %1471 }
 0xa8e   : > { %v1473_v29 = vsub.f32 %v1467_v18, %v1472_v12 }
 0xa90   : > { %v1474_v31 = vmul.f32 1.442695, %v1473_v29  ;;  %v1389_v7 = vpop.f32.mrf.mxu3 }
 0xa91   : > { %v1392_v32 = vsel %vm229_vm2, %v1389_v7, -inf }
 0xa92   : > { %2907 = vpow2.f32 %v1474_v31  ;;  %1393 = vmax.xlane.f32.xlu0 %v1392_v32  ;;  %1165 = vadd.xlane.f32.xlu1 %v1164_v33 }
 0xa93   : > { %2909 = vpow2.f32 %v1318_v34 }
 0xa98   : > { %v3496_v38 = vpop.eup %2907  ;;  %v1545_v26 = vpop.f32.mrf.mxu3 }
 0xa99   : > { %v1476_v41 = vsel %vm229_vm2, %v3496_v38, 0.0  ;;  %v3501_v42 = vpop.eup %2909  ;;  %v1548_v45 = vsel %vm229_vm2, %v1545_v26, -inf }
 0xa9a   : > { %1627 = vmax.xlane.f32.xlu0 %v1626_v40  ;;  %1477 = vadd.xlane.f32.xlu2 %v1476_v41  ;;  %v1320_v44 = vsel %vm229_vm2, %v3501_v42, 0.0 }
 0xaa2   : > { %1321 = vadd.xlane.f32.xlu0 %v1320_v44  ;;  %1549 = vmax.xlane.f32.xlu2 %v1548_v45 }
 0xaab   : > { %1260 = vrot.lane.b32.xlu1 %v3431_v4, %s4026_s10 }
 0xab6   : > { %1182 = vrot.lane.b32.xlu0 %v3431_v4, %s4027_s11 }
 0xabe   : > { %1416 = vrot.lane.b32.xlu0 %v3431_v4, %s4028_s4 }
 0xac6   : > { %1494 = vrot.lane.b32.xlu0 %v3431_v4, %s4029_s28 }
 0xace   : > { %1650 = vrot.lane.b32.xlu0 %v3431_v4, %s4030_s17 }
 0xafd   : > { %v1238_v43 = vpop.xlane.xlu1 %1237 }
 0xafe   : > { %v1239_v37 = vsub.f32 %v1233_v24, %v1238_v43 }
 0xb00   : > { %v1240_v58 = vmul.f32 1.442695, %v1239_v37 }
 0xb05   : > { %v1394_v46 = vpop.xlane.xlu0 %1393  ;;  %v1166_v49 = vpop.xlane.xlu1 %1165 }
 0xb06   : > { %v1395_v47 = vsub.f32 %v1389_v7, %v1394_v46  ;;  %2911 = vrcp.f32 %v1166_v49  ;;  %v1178_v5 = vand.u32 2147483648, %v1166_v49  ;;  %vm1172_vm7 = vweird.f32 %v1166_v49 }
 0xb07   : > { %v1176_v59 = vand.u32 2147483647, %v1166_v49 }
 0xb08   : > { %v1396_v17 = vmul.f32 1.442695, %v1395_v47  ;;  %v1179_v13 = vor.u32 1.1754944e-38, %v1178_v5 }
 0xb09   : > { %vm1177_vm14 = vcmp.eq.f32.partialorder %v1176_v59, 8.507059e+37 }
 0xb0a   : > { %2913 = vpow2.f32 %v1396_v17 }
 0xb0c   : > { %v2912_v53 = vpop.eup %2911 }
 0xb0d   : > { %v1628_v50 = vpop.xlane.xlu0 %1627  ;;  %v3516_v51 = vpop.xlane.xlu2 %1477  ;;  %v1168_v57 = vmul.f32 %v2912_v53, %v1166_v49  ;;  %vm1173_vm6 = vweird.f32 %v2912_v53 }
 0xb0e   : > { %v1629_v52 = vsub.f32 %v1623_v35, %v1628_v50  ;;  %vm1174_vm8 = vmor %vm1172_vm7, %vm1173_vm6  ;;  %v1490_v47 = vand.u32 2147483648, %v3516_v51  ;;  %v1488_v49 = vand.u32 2147483647, %v3516_v51 }
 0xb0f   : > { %v1169_v61 = vsub.f32 1.0, %v1168_v57 }
 0xb10   : > { %v3518_v54 = vpop.eup %2913  ;;  %v1630_v56 = vmul.f32 1.442695, %v1629_v52 }
 0xb11   : > { %v1398_v55 = vsel %vm229_vm2, %v3518_v54, 0.0  ;;  %v1170_v48 = vmul.f32 %v2912_v53, %v1169_v61 }
 0xb12   : > { %2915 = vpow2.f32 %v1630_v56  ;;  %1399 = vadd.xlane.f32.xlu1 %v1398_v55  ;;  %v1491_v56 = vor.u32 1.1754944e-38, %v1490_v47  ;;  %v1025_v47 = vld [vmem:[%s3936_s1 + $0xc8] sm:$0xff] }
 0xb13   : > { %2917 = vpow2.f32 %v1240_v58  ;;  %v1171_v3 = vadd.f32 %v2912_v53, %v1170_v48 }
 0xb15   : > { %v1550_v60 = vpop.xlane.xlu2 %1549  ;;  %v1322_v8 = vpop.xlane.xlu0 %1321  ;;  %v1175_v11 = vsel %vm1174_vm8, %v2912_v53, %v1171_v3  ;;  %vm1484_vm8 = vweird.f32 %v3516_v51 }
 0xb16   : > { %v1551_v62 = vsub.f32 %v1545_v26, %v1550_v60  ;;  %v1180_v14 = vsel %vm1177_vm14, %v1179_v13, %v1175_v11  ;;  %v1334_v7 = vand.u32 2147483648, %v1322_v8  ;;  %vm1328_vm3 = vweird.f32 %v1322_v8 }
 0xb17   : > { %v1181_v18 = vmul.f32 %v3491_v28, %v1180_v14  ;;  %v1332_v33 = vand.u32 2147483647, %v1322_v8 }
 0xb18   : > { %v3522_v63 = vpop.eup %2915  ;;  %v1552_v0 = vmul.f32 1.442695, %v1551_v62  ;;  %v1335_v43 = vor.u32 1.1754944e-38, %v1334_v7 }
 0xb19   : > { %v1632_v6 = vsel %vm229_vm2, %v3522_v63, 0.0  ;;  %v3526_v2 = vpop.eup %2917  ;;  %vm1333_vm7 = vcmp.eq.f32.partialorder %v1332_v33, 8.507059e+37 }
 0xb1a   : > { %1633 = vadd.xlane.f32.xlu2 %v1632_v6  ;;  %2919 = vpow2.f32 %v1552_v0  ;;  %v1242_v10 = vsel %vm229_vm2, %v3526_v2, 0.0 }
 0xb1b   : > { %2921 = vrcp.f32 %v1322_v8 }
 0xb1c   : > { %2923 = vrcp.f32 %v3516_v51 }
 0xb1d   : > { %v1261_v15 = vpop.permute.xlu1 %1260 }
 0xb1e   : > { %1281 = vmatpush.msrb.mxu0 %v1261_v15 }
 0xb20   : > { %v3528_v9 = vpop.eup %2919 }
 0xb21   : > { %v1554_v1 = vsel %vm229_vm2, %v3528_v9, 0.0  ;;  %v2922_v20 = vpop.eup %2921 }
 0xb22   : > { %1243 = vadd.xlane.f32.xlu2 %v1242_v10  ;;  %1555 = vadd.xlane.f32.xlu1 %v1554_v1  ;;  %v1324_v21 = vmul.f32 %v2922_v20, %v1322_v8  ;;  %v2924_v23 = vpop.eup %2923  ;;  %vm1329_vm15 = vweird.f32 %v2922_v20 }
 0xb23   : > { %v1480_v25 = vmul.f32 %v2924_v23, %v3516_v51  ;;  %vm3552_vm4 = vmor %vm1328_vm3, %vm1329_vm15  ;;  %vm1485_vm6 = vweird.f32 %v2924_v23  ;;  %vm1489_vm15 = vcmp.eq.f32.partialorder %v1488_v49, 8.507059e+37  ;;  %v1024_v49 = vld [vmem:[%s3936_s1 + $0xc0] sm:$0xff] }
 0xb24   : > { %v1325_v24 = vsub.f32 1.0, %v1324_v21  ;;  %vm1486_vm14 = vmor %vm1484_vm8, %vm1485_vm6 }
 0xb25   : > { %v1481_v29 = vsub.f32 1.0, %v1480_v25 }
 0xb26   : > { %v1326_v28 = vmul.f32 %v2922_v20, %v1325_v24 }
 0xb27   : > { %v1482_v31 = vmul.f32 %v2924_v23, %v1481_v29 }
 0xb28   : > { %v1183_v16 = vpop.permute.xlu0 %1182 }
 0xb29   : > { %1203 = vmatpush.msra.mxu1 %v1183_v16  ;;  %v1483_v45 = vadd.f32 %v2924_v23, %v1482_v31 }
 0xb2a   : > { %2723 = vmatmul.msk.f32.vlgmr.msra.gmra.mxu1 %vm229_vm2, %v1181_v18 }
 0xb2b   : > { %v1487_v53 = vsel %vm1486_vm14, %v2924_v23, %v1483_v45 }
 0xb2c   : > { %v1492_v61 = vsel %vm1489_vm15, %v1491_v56, %v1487_v53 }
 0xb2d   : > { %v1493_v5 = vmul.f32 %v3496_v38, %v1492_v61 }
 0xb30   : > { %v1417_v19 = vpop.permute.xlu0 %1416 }
 0xb31   : > { %1437 = vmatpush.msra.mxu0 %v1417_v19 }
 0xb38   : > { %v1495_v40 = vpop.permute.xlu0 %1494 }
 0xb3a   : > { %1338 = vrot.lane.b32.xlu2 %v3431_v4, %s4031_s27 }
 0xb3b   : > { %1572 = vrot.lane.b32.xlu1 %v3431_v4, %s4032_s24  ;;  %v1327_v4 = vadd.f32 %v2922_v20, %v1326_v28 }
 0xb3d   : > { %v1331_v26 = vsel %vm3552_vm4, %v2922_v20, %v1327_v4 }
 0xb3e   : > { %v1336_v17 = vsel %vm1333_vm7, %v1335_v43, %v1331_v26 }
 0xb3f   : > { %v1337_v58 = vmul.f32 %v3501_v42, %v1336_v17 }
 0xb40   : > { %v1651_v51 = vpop.permute.xlu0 %1650 }
 0xb85   : > { %v3542_v27 = vpop.xlane.xlu1 %1399 }
 0xb86   : > { %v1412_v38 = vand.u32 2147483648, %v3542_v27  ;;  %vm1406_vm0 = vweird.f32 %v3542_v27  ;;  %v1410_v20 = vand.u32 2147483647, %v3542_v27 }
 0xb88   : > { %v1413_v28 = vor.u32 1.1754944e-38, %v1412_v38  ;;  %v1774_v38 = vld [vmem:[%s3936_s1 + $0x128] sm:$0xff] }
 0xb8d   : > { %v3544_v12 = vpop.xlane.xlu2 %1633 }
 0xb8e   : > { %2925 = vrcp.f32 %v3544_v12  ;;  %vm1640_vm8 = vweird.f32 %v3544_v12  ;;  %v1644_v10 = vand.u32 2147483647, %v3544_v12  ;;  %v1646_v11 = vand.u32 2147483648, %v3544_v12 }
 0xb8f   : > { %2927 = vrcp.f32 %v3542_v27 }
 0xb90   : > { %v1647_v25 = vor.u32 1.1754944e-38, %v1646_v11  ;;  %v1767_v11 = vld [vmem:[%s3936_s1 + $0xf8] sm:$0xff] }
 0xb94   : > { %v3548_v30 = vpop.eup %2925 }
 0xb95   : > { %v3550_v32 = vpop.eup %2927  ;;  %v1244_v34 = vpop.xlane.xlu2 %1243  ;;  %v1636_v44 = vmul.f32 %v3548_v30, %v3544_v12  ;;  %vm1641_vm6 = vweird.f32 %v3548_v30 }
 0xb96   : > { %2929 = vrcp.f32 %v1244_v34  ;;  %v3556_v41 = vpop.xlane.xlu1 %1555  ;;  %v1402_v46 = vmul.f32 %v3550_v32, %v3542_v27  ;;  %v1256_v48 = vand.u32 2147483648, %v1244_v34  ;;  %v1254_v3 = vand.u32 2147483647, %v1244_v34  ;;  %vm3585_vm5 = vmor %vm1640_vm8, %vm1641_vm6 }
 0xb97   : > { %2931 = vrcp.f32 %v3556_v41  ;;  %v1637_v50 = vsub.f32 1.0, %v1636_v44  ;;  %vm1407_vm4 = vweird.f32 %v3550_v32  ;;  %vm1250_vm7 = vweird.f32 %v1244_v34 }
 0xb98   : > { %v1403_v37 = vsub.f32 1.0, %v1402_v46  ;;  %v1257_v1 = vor.u32 1.1754944e-38, %v1256_v48  ;;  %vm1255_vm15 = vcmp.eq.f32.partialorder %v1254_v3, 8.507059e+37  ;;  %vm1645_vm6 = vcmp.eq.f32.partialorder %v1644_v10, 8.507059e+37  ;;  %v1026_v46 = vld [vmem:[%s3936_s1 + $0xd0] sm:$0xff] }
 0xb99   : > { %v1638_v62 = vmul.f32 %v3548_v30, %v1637_v50  ;;  %v1568_v31 = vand.u32 2147483648, %v3556_v41 }
 0xb9a   : > { %v1404_v6 = vmul.f32 %v3550_v32, %v1403_v37 }
 0xb9b   : > { %v1639_v59 = vadd.f32 %v3548_v30, %v1638_v62  ;;  %v1569_v35 = vor.u32 1.1754944e-38, %v1568_v31  ;;  %v2856_v31 = vld [vmem:[%s3937_s2 + $0xb] ss:$0 sm:$0xff] }
 0xb9c   : > { %v2930_v52 = vpop.eup %2929  ;;  %v1405_v13 = vadd.f32 %v3550_v32, %v1404_v6 }
 0xb9d   : > { %v1246_v55 = vmul.f32 %v2930_v52, %v1244_v34  ;;  %v1339_v57 = vpop.permute.xlu2 %1338  ;;  %v3569_v60 = vpop.eup %2931  ;;  %vm1251_vm3 = vweird.f32 %v2930_v52  ;;  %v1643_v21 = vsel %vm3585_vm5, %v3548_v30, %v1639_v59  ;;  %vm1411_vm5 = vcmp.eq.f32.partialorder %v1410_v20, 8.507059e+37  ;;  %v1773_v20 = vld [vmem:[%s3936_s1 + $0x120] sm:$0xff] }
 0xb9e   : > { %1359 = vmatpush.msrb.mxu1 %v1339_v57  ;;  %v1558_v42 = vmul.f32 %v3569_v60, %v3556_v41  ;;  %vm1252_vm14 = vmor %vm1250_vm7, %vm1251_vm3  ;;  %v1648_v29 = vsel %vm1645_vm6, %v1647_v25, %v1643_v21  ;;  %vm1563_vm7 = vweird.f32 %v3569_v60 }
 0xb9f   : > { %v1247_v0 = vsub.f32 1.0, %v1246_v55  ;;  %2729 = vmatmul.msk.f32.vlgmr.msrb.gmra.mxu1 %vm229_vm2, %v1337_v58  ;;  %vm1408_vm3 = vmor %vm1406_vm0, %vm1407_vm4  ;;  %vm1562_vm0 = vweird.f32 %v3556_v41 }
 0xba0   : > { %1515 = vmatpush.msra.mxu1 %v1495_v40  ;;  %v1559_v16 = vsub.f32 1.0, %v1558_v42  ;;  %v1409_v12 = vsel %vm1408_vm3, %v3550_v32, %v1405_v13  ;;  %v1566_v32 = vand.u32 2147483647, %v3556_v41  ;;  %vm1564_vm4 = vmor %vm1562_vm0, %vm1563_vm7  ;;  %v1764_v13 = vld [vmem:[%s3936_s1 + $0xe0] sm:$0xff] }
 0xba1   : > { %v1248_v15 = vmul.f32 %v2930_v52, %v1247_v0  ;;  %v1414_v4 = vsel %vm1411_vm5, %v1413_v28, %v1409_v12 }
 0xba2   : > { %1671 = vmatpush.msrb.mxu1 %v1651_v51  ;;  %v1560_v27 = vmul.f32 %v3569_v60, %v1559_v16  ;;  %v1415_v33 = vmul.f32 %v3518_v54, %v1414_v4  ;;  %vm1567_vm8 = vcmp.eq.f32.partialorder %v1566_v32, 8.507059e+37  ;;  %v1775_v16 = vld [vmem:[%s3936_s1 + $0x130] sm:$0xff]  ;;  %v2855_v4 = vld [vmem:[%s3937_s2 + $0xa] ss:$0 sm:$0xff] }
 0xba3   : > { %v1249_v8 = vadd.f32 %v2930_v52, %v1248_v15 }
 0xba4   : > { %v1561_v30 = vadd.f32 %v3569_v60, %v1560_v27 }
 0xba5   : > { %v1253_v14 = vsel %vm1252_vm14, %v2930_v52, %v1249_v8  ;;  %vm4044_vm14 = vcmask 261120  }
 0xba6   : > { %v1258_v19 = vsel %vm1255_vm15, %v1257_v1, %v1253_v14  ;;  %v1565_v34 = vsel %vm1564_vm4, %v3569_v60, %v1561_v30  ;;  %vm4045_vm15 = vmmov %vm4044_vm14  ;;  %v1765_v1 = vld [vmem:[%s3936_s1 + $0xe8] sm:$0xff]  ;;  %v1776_v14 = vld [vmem:[%s3936_s1 + $0x138] sm:$0xff]  ;;  %vm4048_vm4 = vcmask 523264  }
 0xba7   : > { %v1205_v23 = vpop.f32.mrf.mxu1  ;;  %2735 = vmatmul.msk.f32.vlgmr.msra.gmra.mxu1 %vm229_vm2, %v1493_v5  ;;  %v1259_v24 = vmul.f32 %v3526_v2, %v1258_v19  ;;  %v1649_v2 = vmul.f32 %v3522_v63, %v1648_v29  ;;  %v1570_v63 = vsel %vm1567_vm8, %v1569_v35, %v1565_v34  ;;  %vm4046_vm3 = vmmov %vm4044_vm14  ;;  %1815 = vmatpush.msra.mxu2 %v1776_v14  ;;  %v1770_v34 = vld [vmem:[%s3936_s1 + $0x108] sm:$0xff]  ;;  %v1769_v35 = vld [vmem:[%s3936_s1 + $0x100] sm:$0xff] }
 0xba8   : > { %1677 = vrot.lane.b32.xlu2 %v1205_v23, %s4037_s19  ;;  %v1571_v40 = vmul.f32 %v3528_v9, %v1570_v63  ;;  %v1027_v9 = vld [vmem:[%s3936_s1 + $0xd8] sm:$0xff]  ;;  %vm4047_vm0 = vmmov %vm4046_vm3  ;;  %v2857_v63 = vld [vmem:[%s3937_s2 + $0xc] ss:$0 sm:$0xff] }
 0xba9   : > { %2726 = vmatmul.msk.f32.vlgmr.msrb.gmra.mxu0 %vm229_vm2, %v1259_v24  ;;  %1727 = vmatpush.msrb.mxu3 %v1027_v9  ;;  %v1772_v23 = vld [vmem:[%s3936_s1 + $0x118] sm:$0xff]  ;;  %vm4049_vm8 = vmmov %vm4047_vm0 }
 0xbaa   : > { %1816 = vmatpush.msra.mxu2 %v1775_v16 }
 0xbab   : > { %1728 = vmatpush.msrb.mxu3 %v1026_v46 }
 0xbac   : > { %1817 = vmatpush.msra.mxu2 %v1774_v38 }
 0xbad   : > { %v1573_v7 = vpop.permute.xlu1 %1572  ;;  %1729 = vmatpush.msrb.mxu3 %v1025_v47 }
 0xbae   : > { %1593 = vmatpush.msrb.mxu0 %v1573_v7  ;;  %1818 = vmatpush.msra.mxu2 %v1773_v20 }
 0xbaf   : > { %2741 = vmatmul.msk.f32.vlgmr.msrb.gmra.mxu1 %vm229_vm2, %v1649_v2  ;;  %1730 = vmatpush.msrb.mxu3 %v1024_v49 }
 0xbb0   : > { %1819 = vmatpush.msra.mxu2 %v1772_v23 }
 0xbb1   : > { %2732 = vmatmul.msk.f32.vlgmr.msra.gmra.mxu0 %vm229_vm2, %v1415_v33  ;;  %v1771_v33 = vld [vmem:[%s3936_s1 + $0x110] sm:$0xff] }
 0xbb2   : > { %1794 = vmatpush.msra.mxu0 %v1767_v11  ;;  %1820 = vmatpush.msra.mxu2 %v1771_v33 }
 0xbb4   : > { %1821 = vmatpush.msra.mxu2 %v1770_v34 }
 0xbb6   : > { %1822 = vmatpush.msra.mxu2 %v1769_v35 }
 0xbb9   : > { %2738 = vmatmul.msk.f32.vlgmr.msrb.gmra.mxu0 %vm229_vm2, %v1571_v40 }
 0xc02   : > { %v1678_v17 = vpop.permute.xlu2 %1677 }
 0xc03   : > { %v1704_v53 = vsel %vm204_vm1, %v3488_v22, %v1678_v17  ;;  %v2854_v22 = vld [vmem:[%s3937_s2 + $0x9] ss:$0 sm:$0xff] }
 0xc1c   : > { %v1361_v26 = vpop.f32.mrf.mxu1 }
 0xc1d   : > { %1685 = vrot.lane.b32.xlu0 %v1361_v26, %s4038_s20 }
 0xc24   : > { %v1517_v44 = vpop.f32.mrf.mxu1 }
 0xc26   : > { %v1283_v41 = vpop.f32.mrf.mxu0 }
 0xc27   : > { %1681 = vrot.lane.b32.xlu1 %v1283_v41, %s4039_s9 }
 0xc2c   : > { %v1673_v45 = vpop.f32.mrf.mxu1 }
 0xc2e   : > { %v1439_v54 = vpop.f32.mrf.mxu0 }
 0xc2f   : > { %1693 = vrot.lane.b32.xlu1 %v1517_v44, %s4040_s0  ;;  %1689 = vrot.lane.b32.xlu2 %v1439_v54, %s4041_s21  ;;  %v2858_v44 = vld [vmem:[%s3937_s2 + $0xd] ss:$0 sm:$0xff] }
 0xc36   : > { %v1595_v43 = vpop.f32.mrf.mxu0 }
 0xc37   : > { %1701 = vrot.lane.b32.xlu2 %v1673_v45, %s4042_s14  ;;  %1697 = vrot.lane.b32.xlu0 %v1595_v43, %s4043_s18  ;;  %s4052_s14 = smov 64   ;;  %s4053_s18 = smov 96  }
 0xc89   : > { %v1690_v52 = vpop.permute.xlu2 %1689 }
 0xc8f   : > { %v1686_v37 = vpop.permute.xlu0 %1685 }
 0xc91   : > { %v1702_v62 = vpop.permute.xlu2 %1701 }
 0xc99   : > { %v1682_v50 = vpop.permute.xlu1 %1681 }
 0xc9a   : > { %v1705_v56 = vsel %vm229_vm2, %v1704_v53, %v1682_v50  ;;  %v1858_v53 = vld [vmem:[%s3936_s1 + $0x150] sm:$0xff] }
 0xc9b   : > { %v1706_v55 = vsel %vm856_vm9, %v1705_v56, %v1686_v37  ;;  %v1857_v37 = vld [vmem:[%s3936_s1 + $0x148] sm:$0xff]  ;;  %v1856_v56 = vld [vmem:[%s3936_s1 + $0x140] sm:$0xff] }
 0xc9c   : > { %v1707_v58 = vsel %vm858_vm10, %v1706_v55, %v1690_v52  ;;  %v1859_v52 = vld [vmem:[%s3936_s1 + $0x158] sm:$0xff] }
 0xc9d   : > { %1882 = vmatpush.msra.mxu1 %v1859_v52 }
 0xc9f   : > { %1883 = vmatpush.msra.mxu1 %v1858_v53 }
 0xca1   : > { %v1694_v57 = vpop.permute.xlu1 %1693  ;;  %1884 = vmatpush.msra.mxu1 %v1857_v37 }
 0xca2   : > { %v1708_v60 = vsel %vm860_vm11, %v1707_v58, %v1694_v57 }
 0xca3   : > { %1885 = vmatpush.msra.mxu1 %v1856_v56 }
 0xca9   : > { %v1698_v61 = vpop.permute.xlu0 %1697 }
 0xcaa   : > { %v1709_v0 = vsel %vm862_vm12, %v1708_v60, %v1698_v61 }
 0xcab   : > { %v1710_v51 = vsel %vm864_vm13, %v1709_v0, %v1702_v62 }
 0xcac   : > { %2742 = vmatmul.msk.f32.vlgmr.msrb.gmra.mxu3 %vm4044_vm14, %v1710_v51  ;;  %vm4050_vm14 = vmmov %vm4047_vm0 }
 0xd2f   : > { %v1732_v6 = vpop.f32.mrf.mxu3 }
 0xd30   : > { %v1733_v48 = vadd.f32 %v2854_v22, %v1732_v6  ;;  %v2859_v6 = vld [vmem:[%s3937_s2 + $0xe] ss:$0 sm:$0xff] }
 0xd32   : > { %v1735_v15 = vadd.f32 %v1733_v48, %v3424_v39  ;;  %v1766_v39 = vld [vmem:[%s3936_s1 + $0xf0] sm:$0xff] }
 0xd33   : > { %1795 = vmatpush.msra.mxu0 %v1766_v39 }
 0xd34   : > { %v1738_v3 = vsel %vm4045_vm15, %v1735_v15, 0.0 }
 0xd35   : > { %1739 = vadd.xlane.f32.xlu1 %v1738_v3  ;;  %1796 = vmatpush.msra.mxu0 %v1765_v1 }
 0xd37   : > { %1797 = vmatpush.msra.mxu0 %v1764_v13 }
 0xda8   : > { %v1740_v42 = vpop.xlane.xlu1 %1739 }
 0xda9   : > { %v1741_v5 = vmul.f32 %v1740_v42, %v3347_v36 }
 0xdab   : > { %v1742_v59 = vsub.f32 %v1735_v15, %v1741_v5  ;;  %v2861_v5 = vld [vmem:[%s3937_s2 + $0x10] ss:$0 sm:$0xff] }
 0xdad   : > { %v1743_v8 = vmul.f32 %v1742_v59, %v1742_v59 }
 0xdaf   : > { %v1744_v10 = vsel %vm4046_vm3, %v1743_v8, 0.0 }
 0xdb0   : > { %1745 = vadd.xlane.f32.xlu0 %v1744_v10 }
 0xe23   : > { %v1746_v18 = vpop.xlane.xlu0 %1745 }
 0xe24   : > { %v1747_v19 = vmul.f32 %v1746_v18, %v3347_v36 }
 0xe26   : > { %v1748_v21 = vadd.f32 1e-05, %v1747_v19 }
 0xe28   : > { %2933 = vrsqrt.f32 %v1748_v21  ;;  %vm1755_vm5 = vweird.f32 %v1748_v21 }
 0xe2e   : > { %v2934_v24 = vpop.eup %2933 }
 0xe2f   : > { %v1750_v25 = vmul.f32 %v2934_v24, %v1748_v21  ;;  %vm1756_vm6 = vweird.f32 %v2934_v24 }
 0xe30   : > { %vm1757_vm7 = vmor %vm1755_vm5, %vm1756_vm6 }
 0xe31   : > { %v1751_v12 = vmul.f32 %v2934_v24, %v1750_v25  ;;  %vm4051_vm5 = vmmov %vm4047_vm0 }
 0xe33   : > { %v1752_v27 = vmul.f32 0.5, %v1751_v12 }
 0xe35   : > { %v1753_v28 = vsub.f32 1.5, %v1752_v27 }
 0xe37   : > { %v1754_v29 = vmul.f32 %v2934_v24, %v1753_v28 }
 0xe39   : > { %v1758_v30 = vsel %vm1757_vm7, %v2934_v24, %v1754_v29 }
 0xe3a   : > { %v1759_v2 = vmul.f32 %v1758_v30, %v1742_v59 }
 0xe3c   : > { %v1761_v7 = vmul.f32 %v2855_v4, %v1759_v2 }
 0xe3e   : > { %v1763_v32 = vadd.f32 %v2856_v31, %v1761_v7 }
 0xe40   : > { %2743 = vmatmul.msk.f32.vlgmr.msra.gmra.mxu0 %vm4047_vm0, %v1763_v32 }
 0xebd   : > { %v1799_v40 = vpop.f32.mrf.mxu0 }
 0xebe   : > { %v1800_v26 = vadd.f32 %v2857_v63, %v1799_v40 }
 0xec0   : > { %v1802_v41 = vmax.f32 %v1800_v26, 0.0 }
 0xec2   : > { %2744 = vmatmul.msk.f32.vlgmr.msra.gmra.mxu2 %vm4048_vm4, %v1802_v41 }
 0xf45   : > { %v1824_v54 = vpop.f32.mrf.mxu2 }
 0xf46   : > { %v1825_v45 = vadd.f32 %v2858_v44, %v1824_v54 }
 0xf48   : > { %v1827_v43 = vadd.f32 %v1825_v45, %v1763_v32 }
 0xf4a   : > { %v1830_v9 = vsel %vm4049_vm8, %v1827_v43, 0.0 }
 0xf4b   : > { %1831 = vadd.xlane.f32.xlu2 %v1830_v9 }
 0xfbe   : > { %v1832_v46 = vpop.xlane.xlu2 %1831 }
 0xfbf   : > { %v1833_v47 = vmul.f32 %v1832_v46, %v3347_v36 }
 0xfc1   : > { %v1834_v49 = vsub.f32 %v1827_v43, %v1833_v47 }
 0xfc3   : > { %v1835_v17 = vmul.f32 %v1834_v49, %v1834_v49 }
 0xfc5   : > { %v1836_v50 = vsel %vm4050_vm14, %v1835_v17, 0.0 }
 0xfc6   : > { %1837 = vadd.xlane.f32.xlu1 %v1836_v50 }
0x1039   : > { %v1838_v55 = vpop.xlane.xlu1 %1837 }
0x103a   : > { %v1839_v57 = vmul.f32 %v1838_v55, %v3347_v36  ;;  %v2860_v36 = vld [vmem:[%s3937_s2 + $0xf] ss:$0 sm:$0xff] }
0x103c   : > { %v1840_v58 = vadd.f32 1e-05, %v1839_v57 }
0x103e   : > { %2935 = vrsqrt.f32 %v1840_v58  ;;  %vm1847_vm3 = vweird.f32 %v1840_v58 }
0x1044   : > { %v2936_v60 = vpop.eup %2935 }
0x1045   : > { %v1842_v61 = vmul.f32 %v2936_v60, %v1840_v58  ;;  %vm1848_vm15 = vweird.f32 %v2936_v60 }
0x1046   : > { %vm1849_vm6 = vmor %vm1847_vm3, %vm1848_vm15 }
0x1047   : > { %v1843_v62 = vmul.f32 %v2936_v60, %v1842_v61 }
0x1049   : > { %v1844_v0 = vmul.f32 0.5, %v1843_v62 }
0x104b   : > { %v1845_v51 = vsub.f32 1.5, %v1844_v0 }
0x104d   : > { %v1846_v22 = vmul.f32 %v2936_v60, %v1845_v51 }
0x104f   : > { %v1850_v48 = vsel %vm1849_vm6, %v2936_v60, %v1846_v22 }
0x1050   : > { %v1851_v15 = vmul.f32 %v1850_v48, %v1834_v49 }
0x1052   : > { %v1853_v3 = vmul.f32 %v2859_v6, %v1851_v15 }
0x1054   : > { %v1855_v42 = vadd.f32 %v2860_v36, %v1853_v3 }
0x1056   : > { %2745 = vmatmul.msk.f32.vlgmr.msra.gmra.mxu1 %vm4051_vm5, %v1855_v42 }
0x10d3   : > { %v1887_v59 = vpop.f32.mrf.mxu1 }
0x10d4   : > { %v3725_v8 = vadd.f32 %v2861_v5, %v1887_v59 }
0x10d6   : > { %1941 = vrot.lane.b32.xlu1 %v3725_v8, %s4052_s14  ;;  %1891 = vrot.lane.b32.xlu0 %v3725_v8, %s4053_s18  ;;  %s4064_s14 = sld [smem:[#allocation6_spill]] }
0x10d7   : > { %s4065_s18 = sld [smem:[#allocation9_spill]] }
0x10de   : > { %2123 = vrot.lane.b32.xlu1 %v3725_v8, %s4021_s26  ;;  %1967 = vrot.lane.b32.xlu0 %v3725_v8, %s4054_s3  ;;  %s4058_s26 = smov 80   ;;  %s159_s3 = sand.u32 1, %s4064_s14  }
0x10e6   : > { %2201 = vrot.lane.b32.xlu1 %v3725_v8, %s4022_s29  ;;  %2047 = vrot.lane.b32.xlu0 %v3725_v8, %s4020_s25  ;;  %s4057_s25 = smov 84   ;;  %s4059_s29 = smov 108  }
0x10ee   : > { %2045 = vrot.lane.b32.xlu0 %v3725_v8, %s4055_s12 }
0x10f6   : > { %2281 = vrot.lane.b32.xlu0 %v3725_v8, %s4056_s13 }
0x10fe   : > { %2359 = vrot.lane.b32.xlu0 %v3725_v8, %s4024_s6 }
0x1106   : > { %2435 = vrot.lane.b32.xlu0 %v3725_v8, %s4025_s8 }
0x1148   : > { %v1942_v10 = vpop.permute.xlu1 %1941  ;;  %v1892_v11 = vpop.permute.xlu0 %1891 }
0x1149   : > { %2746 = vmatpush.xpose.msk.msra.mxu3 %vm204_vm1, %v1892_v11  ;;  %1962 = vmatpush.msrb.mxu0 %v1942_v10 }
0x114c   : > { %2747 = vmatmul.msk.f32.vlgmr.msra.gmra.mxu3 %vm204_vm1, %v3725_v8 }
0x1150   : > { %v1968_v39 = vpop.permute.xlu0 %1967  ;;  %v2124_v12 = vpop.permute.xlu1 %2123 }
0x1158   : > { %v2048_v1 = vpop.permute.xlu0 %2047  ;;  %v2202_v29 = vpop.permute.xlu1 %2201 }
0x1159   : > { %2752 = vmatpush.xpose.msk.msra.mxu0 %vm204_vm1, %v2048_v1 }
0x1160   : > { %v2046_v19 = vpop.permute.xlu0 %2045 }
0x1168   : > { %v2282_v25 = vpop.permute.xlu0 %2281 }
0x1170   : > { %v2360_v41 = vpop.permute.xlu0 %2359 }
0x1178   : > { %v2436_v46 = vpop.permute.xlu0 %2435 }
0x11cf   : > { %v1914_v13 = vpop.f32.mrf.mxu3 }
0x11d0   : > { %v1917_v14 = vsel %vm229_vm2, %v1914_v13, -inf }
0x11d1   : > { %1918 = vmax.xlane.f32.xlu2 %v1917_v14 }
0x11e9   : > { %1969 = vrot.lane.b32.xlu2 %v3725_v8, %s4019_s7 }
0x11f1   : > { %2125 = vrot.lane.b32.xlu2 %v3725_v8, %s4057_s25  ;;  %s4068_s25 = sld [smem:[#allocation15_spill]] }
0x11f7   : > { %s2991_s7 = scalar_lea.hbm %s4068_s25, 2 }
0x11f9   : > { %2203 = vrot.lane.b32.xlu2 %v3725_v8, %s4058_s26 }
0x1201   : > { %2279 = vrot.lane.b32.xlu2 %v3725_v8, %s4059_s29  ;;  %s2625_s29 = scalar_lea.hbm %s4068_s25, %s4065_s18 }
0x1209   : > { %2357 = vrot.lane.b32.xlu2 %v3725_v8, %s4018_s30 }
0x1244   : > { %v1919_v16 = vpop.xlane.xlu2 %1918 }
0x1245   : > { %v1920_v38 = vsub.f32 %v1914_v13, %v1919_v16 }
0x1247   : > { %v1921_v18 = vmul.f32 1.442695, %v1920_v38 }
0x1249   : > { %2937 = vpow2.f32 %v1921_v18 }
0x124c   : > { %v1970_v20 = vpop.permute.xlu2 %1969 }
0x124d   : > { %2749 = vmatpush.xpose.msk.msrb.mxu1 %vm204_vm1, %v1970_v20 }
0x124f   : > { %v2938_v21 = vpop.eup %2937 }
0x1250   : > { %2750 = vmatmul.msk.f32.vlgmr.msrb.gmra.mxu1 %vm204_vm1, %v1968_v39  ;;  %v1923_v23 = vsel %vm229_vm2, %v2938_v21, 0.0 }
0x1251   : > { %1924 = vadd.xlane.f32.xlu1 %v1923_v23 }
0x1254   : > { %v2126_v24 = vpop.permute.xlu2 %2125 }
0x1255   : > { %2755 = vmatpush.xpose.msk.msra.mxu1 %vm204_vm1, %v2126_v24 }
0x1258   : > { %2756 = vmatmul.msk.f32.vlgmr.msra.gmra.mxu1 %vm204_vm1, %v2124_v12 }
0x1259   : > { %2761 = vmatpush.xpose.msk.msrb.mxu1 %vm204_vm1, %v2282_v25 }
0x125c   : > { %v2204_v27 = vpop.permute.xlu2 %2203 }
0x1264   : > { %v2280_v28 = vpop.permute.xlu2 %2279 }
0x1265   : > { %2762 = vmatmul.msk.f32.vlgmr.msrb.gmra.mxu1 %vm204_vm1, %v2280_v28 }
0x126a   : > { %2437 = vrot.lane.b32.xlu1 %v3725_v8, %s4023_s5 }
0x126c   : > { %v2358_v17 = vpop.permute.xlu2 %2357 }
0x12c4   : > { %v1925_v4 = vpop.xlane.xlu1 %1924 }
0x12c5   : > { %2939 = vrcp.f32 %v1925_v4  ;;  %v1937_v33 = vand.u32 2147483648, %v1925_v4  ;;  %v1935_v35 = vand.u32 2147483647, %v1925_v4  ;;  %vm1931_vm0 = vweird.f32 %v1925_v4 }
0x12c7   : > { %v1938_v40 = vor.u32 1.1754944e-38, %v1937_v33  ;;  %vm1936_vm8 = vcmp.eq.f32.partialorder %v1935_v35, 8.507059e+37 }
0x12cb   : > { %v2940_v30 = vpop.eup %2939 }
0x12cc   : > { %v1927_v2 = vmul.f32 %v2940_v30, %v1925_v4  ;;  %vm1932_vm7 = vweird.f32 %v2940_v30 }
0x12cd   : > { %v1992_v31 = vpop.f32.mrf.mxu1  ;;  %vm1933_vm4 = vmor %vm1931_vm0, %vm1932_vm7 }
0x12ce   : > { %v1928_v7 = vsub.f32 1.0, %v1927_v2  ;;  %v1995_v32 = vsel %vm229_vm2, %v1992_v31, -inf }
0x12cf   : > { %1996 = vmax.xlane.f32.xlu1 %v1995_v32 }
0x12d0   : > { %v1929_v34 = vmul.f32 %v2940_v30, %v1928_v7 }
0x12d2   : > { %v1930_v63 = vadd.f32 %v2940_v30, %v1929_v34 }
0x12d4   : > { %v1934_v26 = vsel %vm1933_vm4, %v2940_v30, %v1930_v63 }
0x12d5   : > { %v1939_v44 = vsel %vm1936_vm8, %v1938_v40, %v1934_v26  ;;  %v2148_v54 = vpop.f32.mrf.mxu1 }
0x12d6   : > { %v2151_v45 = vsel %vm229_vm2, %v2148_v54, -inf  ;;  %v1940_v43 = vmul.f32 %v2938_v21, %v1939_v44 }
0x12d7   : > { %2152 = vmax.xlane.f32.xlu0 %v2151_v45 }
0x12d8   : > { %2748 = vmatmul.msk.f32.vlgmr.msrb.gmra.mxu0 %vm229_vm2, %v1940_v43 }
0x12d9   : > { %2758 = vmatpush.xpose.msk.msrb.mxu0 %vm204_vm1, %v2204_v27 }
0x12dc   : > { %v2438_v9 = vpop.permute.xlu1 %2437 }
0x12dd   : > { %2767 = vmatpush.xpose.msk.msra.mxu1 %vm204_vm1, %v2438_v9 }
0x12e0   : > { %2753 = vmatmul.msk.f32.vlgmr.msra.gmra.mxu0 %vm204_vm1, %v2046_v19  ;;  %2768 = vmatmul.msk.f32.vlgmr.msra.gmra.mxu1 %vm204_vm1, %v2436_v46 }
0x12e1   : > { %2764 = vmatpush.xpose.msk.msra.mxu0 %vm204_vm1, %v2360_v41 }
0x12e2   : > { %v2304_v47 = vpop.f32.mrf.mxu1 }
0x12e3   : > { %v2307_v49 = vsel %vm229_vm2, %v2304_v47, -inf }
0x12e4   : > { %2308 = vmax.xlane.f32.xlu1 %v2307_v49 }
0x12e8   : > { %2759 = vmatmul.msk.f32.vlgmr.msrb.gmra.mxu0 %vm204_vm1, %v2202_v29 }
0x12f0   : > { %2765 = vmatmul.msk.f32.vlgmr.msra.gmra.mxu0 %vm204_vm1, %v2358_v17 }
0x1342   : > { %v1997_v50 = vpop.xlane.xlu1 %1996 }
0x1343   : > { %v1998_v52 = vsub.f32 %v1992_v31, %v1997_v50 }
0x1345   : > { %v1999_v53 = vmul.f32 1.442695, %v1998_v52 }
0x1347   : > { %2941 = vpow2.f32 %v1999_v53 }
0x134a   : > { %v2153_v51 = vpop.xlane.xlu0 %2152 }
0x134b   : > { %v2154_v6 = vsub.f32 %v2148_v54, %v2153_v51 }
0x134d   : > { %v3782_v37 = vpop.eup %2941  ;;  %v2155_v36 = vmul.f32 1.442695, %v2154_v6 }
0x134e   : > { %v2001_v56 = vsel %vm229_vm2, %v3782_v37, 0.0 }
0x134f   : > { %2002 = vadd.xlane.f32.xlu1 %v2001_v56 }
0x1355   : > { %v3786_v55 = vpop.f32.mrf.mxu0 }
0x1357   : > { %v2309_v57 = vpop.xlane.xlu1 %2308 }
0x1358   : > { %v2310_v58 = vsub.f32 %v2304_v47, %v2309_v57 }
0x135a   : > { %v2311_v60 = vmul.f32 1.442695, %v2310_v58 }
0x135c   : > { %2943 = vpow2.f32 %v2311_v60 }
0x135d   : > { %v3788_v61 = vpop.f32.mrf.mxu0  ;;  %v2460_v3 = vpop.f32.mrf.mxu1  ;;  %2945 = vpow2.f32 %v2155_v36 }
0x135e   : > { %v2073_v62 = vsel %vm229_vm2, %v3788_v61, -inf  ;;  %v2463_v42 = vsel %vm229_vm2, %v2460_v3, -inf }
0x135f   : > { %2074 = vmax.xlane.f32.xlu2 %v2073_v62 }
0x1362   : > { %v3792_v0 = vpop.eup %2943 }
0x1363   : > { %v2313_v22 = vsel %vm229_vm2, %v3792_v0, 0.0  ;;  %v3800_v5 = vpop.eup %2945 }
0x1364   : > { %2314 = vadd.xlane.f32.xlu0 %v2313_v22  ;;  %v2157_v59 = vsel %vm229_vm2, %v3800_v5, 0.0 }
0x1365   : > { %v2226_v48 = vpop.f32.mrf.mxu0 }
0x1366   : > { %v2229_v15 = vsel %vm229_vm2, %v2226_v48, -inf }
0x1367   : > { %2230 = vmax.xlane.f32.xlu2 %v2229_v15 }
0x1368   : > { %2097 = vrot.lane.b32.xlu1 %v3725_v8, %s4026_s10 }
0x136d   : > { %v2382_v34 = vpop.f32.mrf.mxu0 }
0x136e   : > { %v2385_v35 = vsel %vm229_vm2, %v2382_v34, -inf }
0x136f   : > { %2464 = vmax.xlane.f32.xlu2 %v2463_v42 }
0x1377   : > { %2158 = vadd.xlane.f32.xlu2 %v2157_v59 }
0x138f   : > { %2019 = vrot.lane.b32.xlu2 %v3725_v8, %s4027_s11 }
0x1397   : > { %2253 = vrot.lane.b32.xlu2 %v3725_v8, %s4028_s4 }
0x139f   : > { %2331 = vrot.lane.b32.xlu2 %v3725_v8, %s4029_s28  ;;  %s2629_s28 = sshll.u32 %s2625_s29, 4  ;;  %s2630_s28 = int_to_ptr.hbm [resolvable:$true] %s2629_s28 }
0x13a0   : > { %s2985_s4 = sshra.s32 %s2630_s28, 4  ;;  %s2986_s4 = int_to_ptr.hbm [resolvable:$true] %s2985_s4 }
0x13a1   : > { %p2992_p0 = scmp.lt.s32.totalorder %s2986_s4, %s4068_s25 }
0x13c2   : > { %v2003_v10 = vpop.xlane.xlu1 %2002 }
0x13c3   : > { %2947 = vrcp.f32 %v2003_v10  ;;  %v2015_v27 = vand.u32 2147483648, %v2003_v10  ;;  %vm2009_vm15 = vweird.f32 %v2003_v10  ;;  %v2013_v28 = vand.u32 2147483647, %v2003_v10 }
0x13c5   : > { %v2016_v2 = vor.u32 1.1754944e-38, %v2015_v27  ;;  %vm2014_vm6 = vcmp.eq.f32.partialorder %v2013_v28, 8.507059e+37 }
0x13c9   : > { %v2948_v39 = vpop.eup %2947 }
0x13ca   : > { %v2005_v16 = vmul.f32 %v2948_v39, %v2003_v10  ;;  %vm2010_vm14 = vweird.f32 %v2948_v39 }
0x13cb   : > { %vm2011_vm3 = vmor %vm2009_vm15, %vm2010_vm14 }
0x13cc   : > { %v2006_v18 = vsub.f32 1.0, %v2005_v16 }
0x13ce   : > { %v2007_v21 = vmul.f32 %v2948_v39, %v2006_v18 }
0x13d0   : > { %v2008_v12 = vadd.f32 %v2948_v39, %v2007_v21 }
0x13d2   : > { %v2075_v11 = vpop.xlane.xlu2 %2074  ;;  %v2012_v4 = vsel %vm2011_vm3, %v2948_v39, %v2008_v12 }
0x13d3   : > { %v2017_v7 = vsel %vm2014_vm6, %v2016_v2, %v2012_v4  ;;  %v2076_v40 = vsub.f32 %v3788_v61, %v2075_v11 }
0x13d4   : > { %v2018_v33 = vmul.f32 %v3782_v37, %v2017_v7 }
0x13d5   : > { %v2077_v26 = vmul.f32 1.442695, %v2076_v40 }
0x13d7   : > { %v2315_v54 = vpop.xlane.xlu0 %2314 }
0x13d8   : > { %v2327_v36 = vand.u32 2147483648, %v2315_v54  ;;  %vm2321_vm14 = vweird.f32 %v2315_v54 }
0x13da   : > { %v2231_v1 = vpop.xlane.xlu2 %2230  ;;  %v2098_v13 = vpop.permute.xlu1 %2097  ;;  %v2328_v39 = vor.u32 1.1754944e-38, %v2327_v36 }
0x13db   : > { %v2232_v14 = vsub.f32 %v2226_v48, %v2231_v1  ;;  %2118 = vmatpush.msrb.mxu2 %v2098_v13 }
0x13dd   : > { %v2233_v38 = vmul.f32 1.442695, %v2232_v14 }
0x13df   : > { %2949 = vpow2.f32 %v2233_v38 }
0x13e2   : > { %v2465_v19 = vpop.xlane.xlu2 %2464 }
0x13e3   : > { %v2466_v20 = vsub.f32 %v2460_v3, %v2465_v19  ;;  %v2325_v3 = vand.u32 2147483647, %v2315_v54 }
0x13e5   : > { %v3810_v23 = vpop.eup %2949  ;;  %v2467_v24 = vmul.f32 1.442695, %v2466_v20  ;;  %vm2326_vm3 = vcmp.eq.f32.partialorder %v2325_v3, 8.507059e+37 }
0x13e6   : > { %v2235_v25 = vsel %vm229_vm2, %v3810_v23, 0.0 }
0x13e7   : > { %2951 = vpow2.f32 %v2467_v24  ;;  %2236 = vadd.xlane.f32.xlu1 %v2235_v25 }
0x13e8   : > { %2953 = vpow2.f32 %v2077_v26 }
0x13ea   : > { %v2159_v29 = vpop.xlane.xlu2 %2158 }
0x13eb   : > { %2955 = vrcp.f32 %v2159_v29  ;;  %v2171_v57 = vand.u32 2147483648, %v2159_v29  ;;  %vm2165_vm7 = vweird.f32 %v2159_v29  ;;  %v2169_v60 = vand.u32 2147483647, %v2159_v29 }
0x13ec   : > { %2957 = vrcp.f32 %v2315_v54 }
0x13ed   : > { %v3814_v30 = vpop.eup %2951  ;;  %v2172_v6 = vor.u32 1.1754944e-38, %v2171_v57  ;;  %vm2170_vm4 = vcmp.eq.f32.partialorder %v2169_v60, 8.507059e+37 }
0x13ee   : > { %v2469_v31 = vsel %vm229_vm2, %v3814_v30, 0.0  ;;  %v3824_v41 = vpop.eup %2953 }
0x13ef   : > { %2470 = vadd.xlane.f32.xlu0 %v2469_v31  ;;  %v2079_v44 = vsel %vm229_vm2, %v3824_v41, 0.0 }
0x13f1   : > { %v2956_v43 = vpop.eup %2955 }
0x13f2   : > { %v2020_v32 = vpop.permute.xlu2 %2019  ;;  %v2161_v9 = vmul.f32 %v2956_v43, %v2159_v29  ;;  %v2958_v17 = vpop.eup %2957  ;;  %vm2166_vm5 = vweird.f32 %v2956_v43 }
0x13f3   : > { %2040 = vmatpush.msrb.mxu3 %v2020_v32  ;;  %v2317_v52 = vmul.f32 %v2958_v17, %v2315_v54  ;;  %vm2167_vm0 = vmor %vm2165_vm7, %vm2166_vm5  ;;  %vm2322_vm8 = vweird.f32 %v2958_v17 }
0x13f4   : > { %2751 = vmatmul.msk.f32.vlgmr.msrb.gmra.mxu3 %vm229_vm2, %v2018_v33  ;;  %v2162_v47 = vsub.f32 1.0, %v2161_v9  ;;  %vm2323_vm15 = vmor %vm2321_vm14, %vm2322_vm8 }
0x13f5   : > { %v2318_v37 = vsub.f32 1.0, %v2317_v52 }
0x13f6   : > { %v2163_v53 = vmul.f32 %v2956_v43, %v2162_v47 }
0x13f7   : > { %2386 = vmax.xlane.f32.xlu0 %v2385_v35  ;;  %v2319_v62 = vmul.f32 %v2958_v17, %v2318_v37 }
0x13f8   : > { %v2164_v56 = vadd.f32 %v2956_v43, %v2163_v53 }
0x13f9   : > { %v2320_v15 = vadd.f32 %v2958_v17, %v2319_v62 }
0x13fa   : > { %v2254_v63 = vpop.permute.xlu2 %2253  ;;  %v2168_v51 = vsel %vm2167_vm0, %v2956_v43, %v2164_v56 }
0x13fb   : > { %2274 = vmatpush.msra.mxu2 %v2254_v63  ;;  %v2173_v48 = vsel %vm2170_vm4, %v2172_v6, %v2168_v51  ;;  %v2324_v10 = vsel %vm2323_vm15, %v2958_v17, %v2320_v15 }
0x13fc   : > { %v2174_v59 = vmul.f32 %v3800_v5, %v2173_v48  ;;  %v2329_v1 = vsel %vm2326_vm3, %v2328_v39, %v2324_v10  ;;  %v1861_v10 = vld [vmem:[%s3936_s1 + $0x160] sm:$0xff] }
0x13fd   : > { %v2330_v13 = vmul.f32 %v3792_v0, %v2329_v1 }
0x1402   : > { %v2332_v11 = vpop.permute.xlu2 %2331 }
0x140b   : > { %2175 = vrot.lane.b32.xlu0 %v3725_v8, %s4031_s27 }
0x1435   : > { %2080 = vadd.xlane.f32.xlu0 %v2079_v44 }
0x1449   : > { %2409 = vrot.lane.b32.xlu0 %v3725_v8, %s4032_s24  ;;  %s4062_s24 = smov 28  }
0x145a   : > { %v2237_v14 = vpop.xlane.xlu1 %2236 }
0x145b   : > { %v2249_v4 = vand.u32 2147483648, %v2237_v14  ;;  %vm2243_vm8 = vweird.f32 %v2237_v14  ;;  %v2247_v31 = vand.u32 2147483647, %v2237_v14 }
0x145d   : > { %vm2248_vm15 = vcmp.eq.f32.partialorder %v2247_v31, 8.507059e+37 }
0x1462   : > { %v3830_v45 = vpop.xlane.xlu0 %2470 }
0x1463   : > { %v2483_v52 = vand.u32 2147483648, %v3830_v45  ;;  %v2481_v37 = vand.u32 2147483647, %v3830_v45 }
0x1465   : > { %v2484_v62 = vor.u32 1.1754944e-38, %v2483_v52 }
0x146a   : > { %v2387_v46 = vpop.xlane.xlu0 %2386 }
0x146b   : > { %v2388_v49 = vsub.f32 %v2382_v34, %v2387_v46  ;;  %v2250_v34 = vor.u32 1.1754944e-38, %v2249_v4 }
0x146d   : > { %v2389_v50 = vmul.f32 1.442695, %v2388_v49 }
0x146f   : > { %2959 = vpow2.f32 %v2389_v50 }
0x1470   : > { %2961 = vrcp.f32 %v2237_v14 }
0x1475   : > { %v3832_v58 = vpop.eup %2959 }
0x1476   : > { %v2391_v61 = vsel %vm229_vm2, %v3832_v58, 0.0  ;;  %v2962_v16 = vpop.eup %2961 }
0x1477   : > { %v2042_v22 = vpop.f32.mrf.mxu3  ;;  %2392 = vadd.xlane.f32.xlu1 %v2391_v61  ;;  %v2239_v38 = vmul.f32 %v2962_v16, %v2237_v14  ;;  %vm2244_vm0 = vweird.f32 %v2962_v16 }
0x1478   : > { %2514 = vrot.lane.b32.xlu2 %v2042_v22, %s4037_s19  ;;  %vm2245_vm14 = vmor %vm2243_vm8, %vm2244_vm0  ;;  %vm2477_vm0 = vweird.f32 %v3830_v45  ;;  %s4061_s19 = smov 24  }
0x1479   : > { %v2240_v19 = vsub.f32 1.0, %v2239_v38 }
0x147b   : > { %v2241_v25 = vmul.f32 %v2962_v16, %v2240_v19 }
0x147d   : > { %v2176_v42 = vpop.permute.xlu0 %2175 }
0x147e   : > { %2196 = vmatpush.msra.mxu3 %v2176_v42  ;;  %v1863_v42 = vld [vmem:[%s3936_s1 + $0x170] sm:$0xff] }
0x147f   : > { %2757 = vmatmul.msk.f32.vlgmr.msra.gmra.mxu3 %vm229_vm2, %v2174_v59  ;;  %v1862_v59 = vld [vmem:[%s3936_s1 + $0x168] sm:$0xff] }
0x1480   : > { %2352 = vmatpush.msrb.mxu3 %v2332_v11 }
0x1487   : > { %2763 = vmatmul.msk.f32.vlgmr.msrb.gmra.mxu3 %vm229_vm2, %v2330_v13 }
0x1490   : > { %2487 = vrot.lane.b32.xlu1 %v3725_v8, %s4030_s17  ;;  %v2242_v8 = vadd.f32 %v2962_v16, %v2241_v25  ;;  %s4060_s17 = smov 16  }
0x1492   : > { %v2246_v33 = vsel %vm2245_vm14, %v2962_v16, %v2242_v8  ;;  %vm2482_vm14 = vcmp.eq.f32.partialorder %v2481_v37, 8.507059e+37 }
0x1493   : > { %v2251_v35 = vsel %vm2248_vm15, %v2250_v34, %v2246_v33  ;;  %vm4063_vm15 = vcmask 261120  }
0x1494   : > { %v2252_v63 = vmul.f32 %v3810_v23, %v2251_v35 }
0x14a8   : > { %v2081_v5 = vpop.xlane.xlu0 %2080 }
0x14a9   : > { %2963 = vrcp.f32 %v2081_v5  ;;  %v2093_v24 = vand.u32 2147483648, %v2081_v5  ;;  %v2091_v0 = vand.u32 2147483647, %v2081_v5  ;;  %vm2087_vm5 = vweird.f32 %v2081_v5 }
0x14aa   : > { %2965 = vrcp.f32 %v3830_v45 }
0x14ab   : > { %v2094_v28 = vor.u32 1.1754944e-38, %v2093_v24  ;;  %vm2092_vm4 = vcmp.eq.f32.partialorder %v2091_v0, 8.507059e+37  ;;  %v2588_v0 = vld [vmem:[%s3936_s1 + $0x188] sm:$0xff] }
0x14af   : > { %v2964_v18 = vpop.eup %2963 }
0x14b0   : > { %v2083_v20 = vmul.f32 %v2964_v18, %v2081_v5  ;;  %vm2088_vm6 = vweird.f32 %v2964_v18  ;;  %v2966_v40 = vpop.eup %2965 }
0x14b1   : > { %vm2089_vm7 = vmor %vm2087_vm5, %vm2088_vm6  ;;  %vm2478_vm6 = vweird.f32 %v2966_v40 }
0x14b2   : > { %v2084_v21 = vsub.f32 1.0, %v2083_v20  ;;  %vm2479_vm8 = vmor %vm2477_vm0, %vm2478_vm6 }
0x14b4   : > { %v2085_v12 = vmul.f32 %v2964_v18, %v2084_v21 }
0x14b6   : > { %v2086_v27 = vadd.f32 %v2964_v18, %v2085_v12  ;;  %v2589_v12 = vld [vmem:[%s3936_s1 + $0x190] sm:$0xff] }
0x14b8   : > { %v2090_v29 = vsel %vm2089_vm7, %v2964_v18, %v2086_v27  ;;  %v2587_v27 = vld [vmem:[%s3936_s1 + $0x180] sm:$0xff] }
0x14b9   : > { %v2095_v2 = vsel %vm2092_vm4, %v2094_v28, %v2090_v29  ;;  %v3066_v28 = vmov 8.0   ;;  %v2862_v29 = vld [vmem:[%s3937_s2 + $0x11] ss:$0 sm:$0xff] }
0x14ba   : > { %v2096_v7 = vmul.f32 %v3824_v41, %v2095_v2  ;;  %v2473_v41 = vmul.f32 %v2966_v40, %v3830_v45 }
0x14bb   : > { %v2410_v32 = vpop.permute.xlu0 %2409 }
0x14bc   : > { %2754 = vmatmul.msk.f32.vlgmr.msrb.gmra.mxu2 %vm229_vm2, %v2096_v7  ;;  %v2474_v44 = vsub.f32 1.0, %v2473_v41 }
0x14bd   : > { %2430 = vmatpush.msrb.mxu2 %v2410_v32 }
0x14be   : > { %v2475_v9 = vmul.f32 %v2966_v40, %v2474_v44 }
0x14c0   : > { %v2476_v50 = vadd.f32 %v2966_v40, %v2475_v9  ;;  %v2591_v9 = vld [vmem:[%s3937_s2 + $0x12] sm:$0x1] }
0x14c2   : > { %v2480_v60 = vsel %vm2479_vm8, %v2966_v40, %v2476_v50 }
0x14c3   : > { %v2485_v51 = vsel %vm2482_vm14, %v2484_v62, %v2480_v60 }
0x14c4   : > { %2760 = vmatmul.msk.f32.vlgmr.msra.gmra.mxu2 %vm229_vm2, %v2252_v63  ;;  %v2486_v48 = vmul.f32 %v3814_v30, %v2485_v51  ;;  %v1864_v30 = vld [vmem:[%s3936_s1 + $0x178] sm:$0xff] }
0x14c5   : > { %2564 = vmatpush.msrb.mxu0 %v1864_v30 }
0x14c7   : > { %2565 = vmatpush.msrb.mxu0 %v1863_v42 }
0x14c9   : > { %2566 = vmatpush.msrb.mxu0 %v1862_v59 }
0x14cb   : > { %2567 = vmatpush.msrb.mxu0 %v1861_v10 }
0x14d2   : > { %v2515_v11 = vpop.permute.xlu2 %2514 }
0x14d3   : > { %v2541_v1 = vsel %vm204_vm1, %v3786_v55, %v2515_v11  ;;  %v2590_v55 = vld [vmem:[%s3936_s1 + $0x198] sm:$0xff]  ;;  %vm4066_vm1 = vmmov %vm4063_vm15 }
0x14d4   : > { %2607 = vmatpush.msra.mxu2 %v2590_v55 }
0x14d6   : > { %2608 = vmatpush.msra.mxu2 %v2589_v12 }
0x14d8   : > { %2609 = vmatpush.msra.mxu2 %v2588_v0 }
0x14da   : > { %2610 = vmatpush.msra.mxu2 %v2587_v27 }
0x14ea   : > { %v2393_v26 = vpop.xlane.xlu1 %2392 }
0x14eb   : > { %2967 = vrcp.f32 %v2393_v26  ;;  %v2405_v47 = vand.u32 2147483648, %v2393_v26  ;;  %v2403_v17 = vand.u32 2147483647, %v2393_v26  ;;  %vm2399_vm5 = vweird.f32 %v2393_v26 }
0x14ec   : > { %2969 = vrcp.f32 %v3066_v28 }
0x14ed   : > { %v2406_v53 = vor.u32 1.1754944e-38, %v2405_v47  ;;  %vm2404_vm4 = vcmp.eq.f32.partialorder %v2403_v17, 8.507059e+37 }
0x14f1   : > { %v2968_v54 = vpop.eup %2967 }
0x14f2   : > { %v2395_v43 = vmul.f32 %v2968_v54, %v2393_v26  ;;  %vm2400_vm3 = vweird.f32 %v2968_v54  ;;  %v2970_v8 = vpop.eup %2969 }
0x14f3   : > { %vm2401_vm7 = vmor %vm2399_vm5, %vm2400_vm3  ;;  %v2580_v4 = vmul.f32 8.0, %v2970_v8 }
0x14f4   : > { %v2396_v46 = vsub.f32 1.0, %v2395_v43 }
0x14f5   : > { %v2581_v7 = vsub.f32 1.0, %v2580_v4 }
0x14f6   : > { %v2397_v49 = vmul.f32 %v2968_v54, %v2396_v46 }
0x14f7   : > { %v2582_v34 = vmul.f32 %v2970_v8, %v2581_v7 }
0x14f8   : > { %v2398_v23 = vadd.f32 %v2968_v54, %v2397_v49 }
0x14f9   : > { %v2583_v40 = vadd.f32 %v2970_v8, %v2582_v34 }
0x14fa   : > { %v2402_v56 = vsel %vm2401_vm7, %v2968_v54, %v2398_v23 }
0x14fb   : > { %v2407_v57 = vsel %vm2404_vm4, %v2406_v53, %v2402_v56 }
0x14fc   : > { %v2408_v61 = vmul.f32 %v3832_v58, %v2407_v57 }
0x14fe   : > { %2766 = vmatmul.msk.f32.vlgmr.msrb.gmra.mxu2 %vm229_vm2, %v2408_v61 }
0x1502   : > { %v2488_v22 = vpop.permute.xlu1 %2487  ;;  %v2198_v6 = vpop.f32.mrf.mxu3 }
0x1503   : > { %2508 = vmatpush.msra.mxu3 %v2488_v22  ;;  %2522 = vrot.lane.b32.xlu1 %v2198_v6, %s4038_s20  ;;  %s2617_s20 = scalar_lea.sflag [#allocation3], %s159_s3 }
0x1504   : > { %2769 = vmatmul.msk.f32.vlgmr.msra.gmra.mxu3 %vm229_vm2, %v2486_v48 }
0x150a   : > { %v2354_v15 = vpop.f32.mrf.mxu3 }
0x153f   : > { %v2120_v45 = vpop.f32.mrf.mxu2 }
0x1540   : > { %2518 = vrot.lane.b32.xlu0 %v2120_v45, %s4039_s9  ;;  %s2987_s9 = scalar_lea.hbm %s2986_s4, 1 }
0x1541   : > { %p2988_p11 = scmp.ne.s32.totalorder %s2986_s4, %s2987_s9  ;;  %p2993_p1 = scmp.lt.s32.totalorder %s2991_s7, %s2987_s9 }
0x1543   : > { %p2989_p12 = pnand %p2988_p11, %p3125_p5  ;;  %p2994_p2 = por %p2993_p1, %p2992_p0 }
0x1545   : > { %p2990_p13 = pneg %p2989_p12 }
0x1547   : > { %v2276_v36 = vpop.f32.mrf.mxu2  ;;  %p2995_p3 = pnand %p2994_p2, %p2990_p13 }
0x1548   : > { %2530 = vrot.lane.b32.xlu0 %v2354_v15, %s4040_s0  ;;  %2526 = vrot.lane.b32.xlu2 %v2276_v36, %s4060_s17 }
0x1575   : > { %v2523_v13 = vpop.permute.xlu1 %2522 }
0x1581   : > { %v2432_v58 = vpop.f32.mrf.mxu2 }
0x1582   : > { %2534 = vrot.lane.b32.xlu1 %v2432_v58, %s4061_s19 }
0x1587   : > { %v2510_v3 = vpop.f32.mrf.mxu3 }
0x1588   : > { %2538 = vrot.lane.b32.xlu2 %v2510_v3, %s4062_s24  ;;  %s160_s24 = scalar_lea.vmem [#allocation2], %s159_s3 }
0x1589   : > { %s2627_s27 = sshll.u32 %s160_s24, 4  ;;  %s2628_s27 = int_to_ptr.vmem [resolvable:$true] %s2627_s27 }
0x15a2   : > { %v2527_v14 = vpop.permute.xlu2 %2526 }
0x15b2   : > { %v2519_v39 = vpop.permute.xlu0 %2518 }
0x15b3   : > { %v2542_v5 = vsel %vm229_vm2, %v2541_v1, %v2519_v39  ;;  %vm2584_vm2 = vweird.f32 %v2970_v8 }
0x15b4   : > { %v2543_v16 = vsel %vm856_vm9, %v2542_v5, %v2523_v13  ;;  %v2585_v44 = vsel %vm2584_vm2, %v2970_v8, %v2583_v40  ;;  %vm4067_vm9 = vmmov %vm4066_vm1 }
0x15b5   : > { %v2544_v18 = vsel %vm858_vm10, %v2543_v16, %v2527_v14 }
0x15ba   : > { %v2531_v38 = vpop.permute.xlu0 %2530 }
0x15bb   : > { %v2545_v19 = vsel %vm860_vm11, %v2544_v18, %v2531_v38 }
0x15e2   : > { %v2539_v21 = vpop.permute.xlu2 %2538 }
0x15f4   : > { %v2535_v20 = vpop.permute.xlu1 %2534 }
0x15f5   : > { %v2546_v24 = vsel %vm862_vm12, %v2545_v19, %v2535_v20 }
0x15f6   : > { %v2547_v25 = vsel %vm864_vm13, %v2546_v24, %v2539_v21 }
0x15f7   : > { %2770 = vmatmul.msk.f32.vlgmr.msrb.gmra.mxu0 %vm4063_vm15, %v2547_v25 }
0x1674   : > { %v2569_v2 = vpop.f32.mrf.mxu0 }
0x1675   : > { %v2570_v31 = vadd.f32 %v2862_v29, %v2569_v2 }
0x1677   : > { %v2572_v32 = vsel %vm4066_vm1, %v2570_v31, 0.0 }
0x1678   : > { %v2573_v33 = vrot.slane %v2572_v32, 4 }
0x167a   : > { %v2574_v35 = vadd.f32 %v2573_v33, %v2572_v32 }
0x167c   : > { %v2575_v63 = vrot.slane %v2574_v35, 2 }
0x167e   : > { %v2576_v26 = vadd.f32 %v2575_v63, %v2574_v35 }
0x1680   : > { %v2577_v41 = vrot.slane %v2576_v26, 1 }
0x1682   : > { %v2578_v54 = vadd.f32 %v2577_v41, %v2576_v26 }
0x1684   : > { %v2586_v43 = vmul.f32 %v2585_v44, %v2578_v54 }
0x1686   : > { %2771 = vmatmul.msk.f32.vlgmr.msra.gmra.mxu2 %vm4067_vm9, %v2586_v43 }
0x1709   : > { %v2612_v46 = vpop.f32.mrf.mxu2 }
0x170a   : > { %v2613_v47 = vadd.f32 %v2612_v46, %v2591_v9 }
0x170c   : > { %2615 = vst [vmem:[%s160_s24] sm:$0x1] %v2613_v47 }
0x170d   : > { %2998 = shalt.err (!%p2995_p3)
}
0x170e   : > { %2774 = dma.vmem_to_hbm [thread:$0]  (%p3125_p5), %s2628_s27, 16, %s2630_s28, %s2617_s20  }
0x170f PF: > { %s4070_s8 = sld [smem:[#allocation8_spill]] }
0x1710   : > { %s4071_s10 = sld [smem:[#allocation5_spill]] }
0x1715   : > { %p2780_p4 = scmp.ge.s32.totalorder %s4070_s8, 2 }
0x1716   : > { %s2641_s15 = sand.u32 1, %s4071_s10  }
0x1717   : > { %p2777_p7 = pnand %p2780_p4, %p3129_p6  ;;  %s2642_s16 = scalar_lea.sflag [#allocation3], %s2641_s15 }
0x1719   : > { %p2778_p8 = pneg %p2777_p7 }
0x171b   : > { %3016 = dma.done.wait (%p2778_p8), %s2642_s16, 16  }
0x171c   : > { %3018 = vsyncadd (%p2778_p8), %s2642_s16, 4294967280  ;;  %s4073_s15 = sld [smem:[#allocation10_spill]] }
0x171d   : > { %s4074_s12 = sld [smem:[#allocation6_spill]] }
0x171e   : > { %s4075_s13 = sld [smem:[#allocation7_spill]] }
0x171f   : > { %s4076_s14 = sld [smem:[#allocation11_spill]] }
0x1722   : > { %p13_p9 = scmp.ge.s32.totalorder %s4073_s15, 4  }
0x1724   :  { %15 = sbr.rel (!%p13_p9) target bundleno = 6 (0x6), region = 67 }
0x1729   :  { %2647 = vsyncpa [#allocation3], 1 }
0x172a   :  { %2649 = vsyncpa [#allocation3 + $0x1], 1 }

</bundles_post_ra>
